<compile_context>
chip_gen: v7x
topology: tpu7x:2x2x1
jax: 0.10.0
libtpu: 0.0.40
codegen_flags: <defaults>
</compile_context>

<pallas_src>
import jax
import jax.numpy as jnp
from jax import lax
from jax.experimental import pallas as pl
from jax.experimental.pallas import tpu as pltpu


def _round_up(x, m):
    return (x + m - 1) // m * m


def _sigmoid(x):
    # sigmoid(x) = 0.5*(tanh(0.5x)+1): single EUP op, no exp+divide lowering.
    return 0.5 * jnp.tanh(0.5 * x) + 0.5


# ---------------------------------------------------------------------------
# Pallas kernel: one (batch-tile, layer) grid step of the LSTM + final head
# ---------------------------------------------------------------------------
def lstm_head_kernel(x_ref, wih0_ref, wihr_ref, whh_ref, b_ref, wfc_ref, bfc_ref,
                     out_ref, g_ref, hseq_ref, h_ref, c_ref):
    rows = x_ref.shape[1]                 # T * Bt
    Bt, Hp = h_ref.shape
    T = rows // Bt
    l = pl.program_id(1)
    n_layers = pl.num_programs(1)
    unroll = True if T <= 32 else 8

    bias = b_ref[0]                       # (1, 4Hp) f32, broadcast over rows

    # ---- hoisted input projection + bias: big MXU matmuls, time-chunked ----
    tc_rows = min(T, 64) * Bt             # <=64 time steps per chunk bounds f32 temp
    chunk_bounds = [(r0, min(tc_rows, rows - r0)) for r0 in range(0, rows, tc_rows)]

    @pl.when(l == 0)
    def _():
        w = wih0_ref[...]                 # (Ep, 4Hp) bf16
        for r0, rc in chunk_bounds:
            g_ref[r0:r0 + rc, :] = (
                jnp.dot(x_ref[0, r0:r0 + rc, :], w,
                        preferred_element_type=jnp.float32) + bias)

    @pl.when(l > 0)
    def _():
        w = wihr_ref[0]                   # (Hp, 4Hp) bf16
        for r0, rc in chunk_bounds:
            g_ref[r0:r0 + rc, :] = (
                jnp.dot(hseq_ref[r0:r0 + rc, :].astype(jnp.bfloat16), w,
                        preferred_element_type=jnp.float32) + bias)

    # ---- serial recurrence over time ----
    h_ref[...] = jnp.zeros(h_ref.shape, h_ref.dtype)
    c_ref[...] = jnp.zeros(c_ref.shape, c_ref.dtype)
    whh = whh_ref[0]                      # (Hp, 4Hp) bf16, loaded once per layer
    write_hseq = l < n_layers - 1         # top layer's per-step outputs never read
    # TODO(synk): pin whh as MXU RHS across the time loop via pltpu.matmul_push_rhs /
    # matmul_acc_lhs / matmul_pop (per-step RHS re-push dominates for small Bt).

    def step(t, carry):
        h = h_ref[...]
        c = c_ref[...]
        row = pl.multiple_of(t * Bt, Bt)
        gates = g_ref[pl.ds(row, Bt), :] + jnp.dot(
            h.astype(jnp.bfloat16), whh, preferred_element_type=jnp.float32)
        # 128-aligned gate blocks -> full-vreg VPU/EUP slices, no masked extracts.
        # NOTE: pad columns [H,Hp) of every gate have zero pre-activations; c/h pad
        # lanes stay exactly 0 because c starts at 0 and all pad weight rows are 0.
        i = _sigmoid(gates[:, 0 * Hp:1 * Hp])
        f = _sigmoid(gates[:, 1 * Hp:2 * Hp])
        g = jnp.tanh(gates[:, 2 * Hp:3 * Hp])
        o = _sigmoid(gates[:, 3 * Hp:4 * Hp])
        c_new = f * c + i * g
        h_new = o * jnp.tanh(c_new)
        c_ref[...] = c_new
        h_ref[...] = h_new

        @pl.when(write_hseq)
        def _():
            hseq_ref[pl.ds(row, Bt), :] = h_new     # lane-dense (Bt, Hp) f32 store
        return carry

    lax.fori_loop(0, T, step, 0, unroll=unroll)

    # hidden[-1] of top layer -> dropout (identity at inference) -> fc -> sigmoid.
    # TODO(synk): nn.Dropout omitted (eval/inference semantics = identity).
    # TODO(synk): for large Bt, a lane-dense (n_tiles, Bt) output + VPU dot would avoid
    # the masked last-dim-1 store; negligible at current sizes.
    @pl.when(l == n_layers - 1)
    def _():
        logits = (jnp.dot(h_ref[...], wfc_ref[...],
                          preferred_element_type=jnp.float32) + bfc_ref[...])
        out_ref[...] = _sigmoid(logits)


# ---------------------------------------------------------------------------
# Wrapper: embedding lookup + layout plumbing in JAX, recurrence in the kernel
# ---------------------------------------------------------------------------
def vanilla_lstm_forward(input_ids, params):
    emb = params["embedding"][input_ids]                       # (B, T, E) f32 gather
    B, T, E = emb.shape
    Hp = params["hidden_pad"]
    Ep = params["emb_pad"]
    L = params["num_layers"]

    # Batch tile: multiple of 8 sublanes, capped at 128 (fills v5e's 128 MXU rows,
    # half of v6e/v7x's 256; keeps >=2 batch grid steps sooner for v7x's two TCs).
    Bt = min(_round_up(B, 8), 128)
    Bp = _round_up(B, Bt)
    nbt = Bp // Bt

    # Wrapper-side layout plumbing: pad, tile the batch, flatten time-major inside each
    # tile so the kernel never reshapes, and cast the matmul LHS to bf16 up front.
    x = jnp.pad(emb.astype(jnp.float32), ((0, Bp - B), (0, 0), (0, Ep - E)))
    x = (x.reshape(nbt, Bt, T, Ep).transpose(0, 2, 1, 3)
          .reshape(nbt, T * Bt, Ep).astype(jnp.bfloat16))

    wih0, wihr, whh, bias = params["wih0"], params["wihr"], params["whh"], params["bias"]
    wfc, bfc = params["wfc"], params["bfc"]

    # VMEM budget: per-layer weight blocks + x block (double-buffered) + f32 scratches.
    wb = (Ep * 4 * Hp + 2 * Hp * 4 * Hp) * 2 + (4 * Hp + Hp + 1) * 4
    xb = T * Bt * Ep * 2
    scratch = (T * Bt * 4 * Hp + T * Bt * Hp + 2 * Bt * Hp) * 4
    est = 2 * (wb + xb + Bt * 4) + scratch + (4 << 20)
    try:
        vmem_cap = int(getattr(pltpu.get_tpu_info(), "vmem_capacity_bytes", 64 << 20))
    except Exception:
        vmem_cap = 64 << 20
    ceiling = (vmem_cap * 3) // 4          # ~48 MiB on v7x, ~96 MiB on v5e/v6e
    vmem_limit = int(min(max(est, 16 << 20), ceiling))

    out = pl.pallas_call(
        lstm_head_kernel,
        out_shape=jax.ShapeDtypeStruct((Bp, 1), jnp.float32),
        grid=(nbt, L),
        in_specs=[
            pl.BlockSpec((1, T * Bt, Ep), lambda b, l: (b, 0, 0)),        # x batch tile
            pl.BlockSpec((Ep, 4 * Hp), lambda b, l: (0, 0)),              # wih layer 0
            pl.BlockSpec((1, Hp, 4 * Hp),                                 # wih layers 1+
                         lambda b, l: (jnp.maximum(l - 1, 0), 0, 0)),
            pl.BlockSpec((1, Hp, 4 * Hp), lambda b, l: (l, 0, 0)),        # whh[l]
            pl.BlockSpec((1, 1, 4 * Hp), lambda b, l: (l, 0, 0)),         # bias[l]
            pl.BlockSpec((Hp, 1), lambda b, l: (0, 0)),                   # fc weight
            pl.BlockSpec((1, 1), lambda b, l: (0, 0)),                    # fc bias
        ],
        out_specs=pl.BlockSpec((Bt, 1), lambda b, l: (b, 0)),
        scratch_shapes=[
            pltpu.VMEM((T * Bt, 4 * Hp), jnp.float32),   # hoisted gate pre-activations
            pltpu.VMEM((T * Bt, Hp), jnp.float32),       # layer output sequence
            pltpu.VMEM((Bt, Hp), jnp.float32),           # h state
            pltpu.VMEM((Bt, Hp), jnp.float32),           # c state
        ],
        compiler_params=pltpu.CompilerParams(
            dimension_semantics=("parallel", "arbitrary"),
            vmem_limit_bytes=vmem_limit),
        # TODO(synk): pipeline_mode=pl.Buffered(1) on the constant-index weight specs
        # would drop their second buffer; left at the default for lowering safety.
    )(x, wih0, wihr, whh, bias, wfc, bfc)
    return out[:B]


# ---------------------------------------------------------------------------
# Deterministic parameter construction (PyTorch-style shapes & init ranges)
# ---------------------------------------------------------------------------
def make_params(key, vocab_size, embedding_dim, hidden_dim, num_layers):
    E, H, L = embedding_dim, hidden_dim, num_layers
    Hp = _round_up(H, 128)          # lane-aligned hidden
    Ep = _round_up(E, 128)          # lane-aligned embedding
    k_lstm = 1.0 / jnp.sqrt(H)
    k_fc = 1.0 / jnp.sqrt(H)

    keys = jax.random.split(key, 3 + 4 * L)
    emb_table = jax.random.normal(keys[0], (vocab_size, E), jnp.float32)

    def bf16_round(a):
        # Kernel stores the matmul weights in bf16; use the same rounded values in the
        # f32 reference so the comparison only sees activation rounding.
        return a.astype(jnp.bfloat16).astype(jnp.float32)

    def pack_gate_cols(w, n_rows_pad, dtype=jnp.bfloat16):
        # w: (rows, 4H), PyTorch gate order [i|f|g|o]; gate k -> cols [k*Hp, k*Hp+H).
        # TODO(synk): for H < 128 a compact 4H-wide packing would avoid 128/H lane waste.
        rows = w.shape[0]
        out = jnp.zeros((n_rows_pad, 4 * Hp), jnp.float32)
        for k in range(4):
            out = out.at[:rows, k * Hp:k * Hp + H].set(w[:, k * H:(k + 1) * H])
        return out.astype(dtype)

    raw_layers = []
    wih0 = None
    wihr_list, whh_list, b_list = [], [], []
    for l in range(L):
        in_dim = E if l == 0 else H
        k0, k1, k2, k3 = keys[3 + 4 * l:3 + 4 * l + 4]
        w_ih = bf16_round(jax.random.uniform(k0, (4 * H, in_dim), jnp.float32, -k_lstm, k_lstm))
        w_hh = bf16_round(jax.random.uniform(k1, (4 * H, H), jnp.float32, -k_lstm, k_lstm))
        b_ih = jax.random.uniform(k2, (4 * H,), jnp.float32, -k_lstm, k_lstm)
        b_hh = jax.random.uniform(k3, (4 * H,), jnp.float32, -k_lstm, k_lstm)
        raw_layers.append((w_ih, w_hh, b_ih, b_hh))

        if l == 0:
            wih0 = pack_gate_cols(w_ih.T, Ep)                             # (Ep, 4Hp) bf16
        else:
            wihr_list.append(pack_gate_cols(w_ih.T, Hp))                  # (Hp, 4Hp) bf16
        whh_list.append(pack_gate_cols(w_hh.T, Hp))                       # (Hp, 4Hp) bf16
        b_list.append(pack_gate_cols((b_ih + b_hh)[None, :], 1, jnp.float32))  # (1, 4Hp)

    if not wihr_list:                                                     # L == 1 dummy
        wihr_list.append(jnp.zeros((Hp, 4 * Hp), jnp.bfloat16))

    w_fc = jax.random.uniform(keys[1], (1, H), jnp.float32, -k_fc, k_fc)
    b_fc = jax.random.uniform(keys[2], (1,), jnp.float32, -k_fc, k_fc)
    wfc_pad = jnp.zeros((Hp, 1), jnp.float32).at[:H, :].set(w_fc.T)

    params = {
        "embedding": emb_table,
        "wih0": wih0,                      # (Ep, 4Hp) bf16
        "wihr": jnp.stack(wihr_list),      # (max(L-1,1), Hp, 4Hp) bf16
        "whh": jnp.stack(whh_list),        # (L, Hp, 4Hp) bf16
        "bias": jnp.stack(b_list),         # (L, 1, 4Hp) f32 (ih+hh folded)
        "wfc": wfc_pad,                    # (Hp, 1) f32
        "bfc": b_fc[None, :],              # (1, 1) f32
        "hidden_pad": Hp,
        "emb_pad": Ep,
        "num_layers": L,
    }
    return params, raw_layers, w_fc, b_fc


# ---------------------------------------------------------------------------
# Pure-JAX reference (mirrors PyTorch nn.LSTM semantics) for verification
# ---------------------------------------------------------------------------
def reference_forward(input_ids, emb_table, raw_layers, w_fc, b_fc):
    x = emb_table[input_ids]                           # (B, T, E)
    B, T, _ = x.shape
    layer_in = x
    h = None
    for (w_ih, w_hh, b_ih, b_hh) in raw_layers:
        H = w_hh.shape[1]
        h = jnp.zeros((B, H), jnp.float32)
        c = jnp.zeros((B, H), jnp.float32)
        outs = []
        for t in range(T):
            gates = layer_in[:, t] @ w_ih.T + b_ih + h @ w_hh.T + b_hh
            i, f, g, o = jnp.split(gates, 4, axis=1)
            i, f, o = jax.nn.sigmoid(i), jax.nn.sigmoid(f), jax.nn.sigmoid(o)
            g = jnp.tanh(g)
            c = f * c + i * g
            h = o * jnp.tanh(c)
            outs.append(h)
        layer_in = jnp.stack(outs, axis=1)
    return jax.nn.sigmoid(h @ w_fc.T + b_fc)


if __name__ == "__main__":
    VOCAB, EMB, HIDDEN, LAYERS = 100, 32, 32, 2
    BATCH, SEQ = 2, 8

    key = jax.random.PRNGKey(0)
    pkey, dkey = jax.random.split(key)
    params, raw_layers, w_fc, b_fc = make_params(pkey, VOCAB, EMB, HIDDEN, LAYERS)

    input_ids = jax.random.randint(dkey, (BATCH, SEQ), 0, VOCAB, dtype=jnp.int32)

    out = vanilla_lstm_forward(input_ids, params)
    out = jax.block_until_ready(out)

    ref = reference_forward(input_ids, params["embedding"], raw_layers, w_fc, b_fc)
    assert out.shape == (BATCH, 1)
    # bf16 weights / matmul LHS -> compare against the f32 reference with a loose, but
    # still discriminating, tolerance (expected diff ~1e-3 on sigmoid outputs).
    assert jnp.allclose(out, ref, atol=2e-2, rtol=2e-2), (out, ref)

    print("KERNEL_OK")
</pallas_src>

<mosaic_0001>
module attributes {stable_mosaic.version = 11 : i64} {
  func.func @lstm_head_kernel(%arg0: i32, %arg1: i32, %arg2: memref<1x64x128xbf16, #tpu.memory_space<vmem>>, %arg3: memref<128x512xbf16, #tpu.memory_space<vmem>>, %arg4: memref<1x128x512xbf16, #tpu.memory_space<vmem>>, %arg5: memref<1x128x512xbf16, #tpu.memory_space<vmem>>, %arg6: memref<1x1x512xf32, #tpu.memory_space<vmem>>, %arg7: memref<128x1xf32, #tpu.memory_space<vmem>>, %arg8: memref<1x1xf32, #tpu.memory_space<vmem>>, %arg9: memref<8x1xf32, #tpu.memory_space<vmem>>, %arg10: memref<64x512xf32, #tpu.memory_space<vmem>>, %arg11: memref<64x128xf32, #tpu.memory_space<vmem>>, %arg12: memref<8x128xf32, #tpu.memory_space<vmem>>, %arg13: memref<8x128xf32, #tpu.memory_space<vmem>>) attributes {dimension_semantics = [#tpu.dimension_semantics<parallel>, #tpu.dimension_semantics<arbitrary>], iteration_bounds = array<i64: 1, 2>, scalar_prefetch = 0 : i64, scratch_operands = 4 : i64, tpu.core_type = #tpu.core_type<tc>, window_params = [{transform_indices = @transform_0, window_bounds = array<i64: 1, 64, 128>}, {pipeline_mode = #tpu.pipeline_mode<synchronous>, transform_indices = @transform_1, window_bounds = array<i64: 128, 512>}, {transform_indices = @transform_2, window_bounds = array<i64: 1, 128, 512>}, {transform_indices = @transform_3, window_bounds = array<i64: 1, 128, 512>}, {transform_indices = @transform_4, window_bounds = array<i64: 1, 1, 512>}, {pipeline_mode = #tpu.pipeline_mode<synchronous>, transform_indices = @transform_5, window_bounds = array<i64: 128, 1>}, {pipeline_mode = #tpu.pipeline_mode<synchronous>, transform_indices = @transform_6, window_bounds = array<i64: 1, 1>}, {transform_indices = @transform_7, window_bounds = array<i64: 8, 1>}]} {
    %c0 = arith.constant 0 : index
    %c0_0 = arith.constant 0 : index
    %c0_1 = arith.constant 0 : index
    %0 = vector.load %arg6[%c0, %c0_0, %c0_1] : memref<1x1x512xf32, #tpu.memory_space<vmem>>, vector<1x1x512xf32>
    %1 = vector.shape_cast %0 : vector<1x1x512xf32> to vector<1x512xf32>
    %c0_i32 = arith.constant 0 : i32
    %2 = arith.cmpi eq, %arg1, %c0_i32 : i32
    %3 = arith.extui %2 : i1 to i32
    %c0_i32_2 = arith.constant 0 : i32
    %4 = arith.cmpi ne, %3, %c0_i32_2 : i32
    scf.if %4 {
      %c0_185 = arith.constant 0 : index
      %c0_186 = arith.constant 0 : index
      %370 = vector.load %arg3[%c0_185, %c0_186] : memref<128x512xbf16, #tpu.memory_space<vmem>>, vector<128x512xbf16>
      %c0_187 = arith.constant 0 : index
      %c0_188 = arith.constant 0 : index
      %c0_189 = arith.constant 0 : index
      %371 = vector.load %arg2[%c0_187, %c0_188, %c0_189] : memref<1x64x128xbf16, #tpu.memory_space<vmem>>, vector<1x64x128xbf16>
      %372 = vector.shape_cast %371 : vector<1x64x128xbf16> to vector<64x128xbf16>
      %cst_190 = arith.constant dense<0.000000e+00> : vector<64x512xf32>
      %373 = tpu.matmul %372, %370, %cst_190 {dimension_numbers = #tpu.dot_dimension_numbers<[1], [0], [0], [1], [0, 0, 1, 1], [], []>} : vector<64x128xbf16>, vector<128x512xbf16>, vector<64x512xf32> -> vector<64x512xf32>
      %374 = vector.broadcast %1 : vector<1x512xf32> to vector<64x512xf32>
      %375 = arith.addf %373, %374 : vector<64x512xf32>
      %c0_191 = arith.constant 0 : index
      %c0_192 = arith.constant 0 : index
      %376 = vector.load %arg10[%c0_191, %c0_192] : memref<64x512xf32, #tpu.memory_space<vmem>>, vector<64x512xf32>
      tpu.vector_store %arg10[%c0_191, %c0_192], %375 {strides = array<i32>} : memref<64x512xf32, #tpu.memory_space<vmem>>, vector<64x512xf32>,
    } else {
    }
    %c0_i32_3 = arith.constant 0 : i32
    %5 = arith.cmpi sgt, %arg1, %c0_i32_3 : i32
    %6 = arith.extui %5 : i1 to i32
    %c0_i32_4 = arith.constant 0 : i32
    %7 = arith.cmpi ne, %6, %c0_i32_4 : i32
    scf.if %7 {
      %c0_185 = arith.constant 0 : index
      %c0_186 = arith.constant 0 : index
      %c0_187 = arith.constant 0 : index
      %370 = vector.load %arg4[%c0_185, %c0_186, %c0_187] : memref<1x128x512xbf16, #tpu.memory_space<vmem>>, vector<1x128x512xbf16>
      %371 = vector.shape_cast %370 : vector<1x128x512xbf16> to vector<128x512xbf16>
      %c0_188 = arith.constant 0 : index
      %c0_189 = arith.constant 0 : index
      %372 = vector.load %arg11[%c0_188, %c0_189] : memref<64x128xf32, #tpu.memory_space<vmem>>, vector<64x128xf32>
      %373 = arith.truncf %372 : vector<64x128xf32> to vector<64x128xbf16>
      %cst_190 = arith.constant dense<0.000000e+00> : vector<64x512xf32>
      %374 = tpu.matmul %373, %371, %cst_190 {dimension_numbers = #tpu.dot_dimension_numbers<[1], [0], [0], [1], [0, 0, 1, 1], [], []>} : vector<64x128xbf16>, vector<128x512xbf16>, vector<64x512xf32> -> vector<64x512xf32>
      %375 = vector.broadcast %1 : vector<1x512xf32> to vector<64x512xf32>
      %376 = arith.addf %374, %375 : vector<64x512xf32>
      %c0_191 = arith.constant 0 : index
      %c0_192 = arith.constant 0 : index
      %377 = vector.load %arg10[%c0_191, %c0_192] : memref<64x512xf32, #tpu.memory_space<vmem>>, vector<64x512xf32>
      tpu.vector_store %arg10[%c0_191, %c0_192], %376 {strides = array<i32>} : memref<64x512xf32, #tpu.memory_space<vmem>>, vector<64x512xf32>,
    } else {
    }
    %cst = arith.constant 0.000000e+00 : f32
    %8 = vector.broadcast %cst : f32 to vector<8x128xf32>
    %c0_5 = arith.constant 0 : index
    %c0_6 = arith.constant 0 : index
    %9 = vector.load %arg12[%c0_5, %c0_6] : memref<8x128xf32, #tpu.memory_space<vmem>>, vector<8x128xf32>
    tpu.vector_store %arg12[%c0_5, %c0_6], %8 {strides = array<i32>} : memref<8x128xf32, #tpu.memory_space<vmem>>, vector<8x128xf32>,
    %cst_7 = arith.constant 0.000000e+00 : f32
    %10 = vector.broadcast %cst_7 : f32 to vector<8x128xf32>
    %c0_8 = arith.constant 0 : index
    %c0_9 = arith.constant 0 : index
    %11 = vector.load %arg13[%c0_8, %c0_9] : memref<8x128xf32, #tpu.memory_space<vmem>>, vector<8x128xf32>
    tpu.vector_store %arg13[%c0_8, %c0_9], %10 {strides = array<i32>} : memref<8x128xf32, #tpu.memory_space<vmem>>, vector<8x128xf32>,
    %c0_10 = arith.constant 0 : index
    %c0_11 = arith.constant 0 : index
    %c0_12 = arith.constant 0 : index
    %12 = vector.load %arg5[%c0_10, %c0_11, %c0_12] : memref<1x128x512xbf16, #tpu.memory_space<vmem>>, vector<1x128x512xbf16>
    %13 = vector.shape_cast %12 : vector<1x128x512xbf16> to vector<128x512xbf16>
    %c1_i32 = arith.constant 1 : i32
    %14 = arith.cmpi slt, %arg1, %c1_i32 : i32
    %c0_i32_13 = arith.constant 0 : i32
    %c0_14 = arith.constant 0 : index
    %c0_15 = arith.constant 0 : index
    %15 = vector.load %arg12[%c0_14, %c0_15] : memref<8x128xf32, #tpu.memory_space<vmem>>, vector<8x128xf32>
    %c0_16 = arith.constant 0 : index
    %c0_17 = arith.constant 0 : index
    %16 = vector.load %arg13[%c0_16, %c0_17] : memref<8x128xf32, #tpu.memory_space<vmem>>, vector<8x128xf32>
    %c8_i32 = arith.constant 8 : i32
    %17 = arith.muli %c0_i32_13, %c8_i32 : i32
    %18 = tpu.assume_multiple %17, 8 : i32
    %19 = arith.index_cast %18 : i32 to index
    %c0_18 = arith.constant 0 : index
    %20 = vector.load %arg10[%19, %c0_18] : memref<64x512xf32, #tpu.memory_space<vmem>>, vector<8x512xf32>
    %21 = arith.truncf %15 : vector<8x128xf32> to vector<8x128xbf16>
    %cst_19 = arith.constant dense<0.000000e+00> : vector<8x512xf32>
    %22 = tpu.matmul %21, %13, %cst_19 {dimension_numbers = #tpu.dot_dimension_numbers<[1], [0], [0], [1], [0, 0, 1, 1], [], []>} : vector<8x128xbf16>, vector<128x512xbf16>, vector<8x512xf32> -> vector<8x512xf32>
    %23 = arith.addf %20, %22 : vector<8x512xf32>
    %24 = vector.extract_strided_slice %23 {offsets = [0, 0], sizes = [8, 128], strides = [1, 1]} : vector<8x512xf32> to vector<8x128xf32>
    %cst_20 = arith.constant 5.000000e-01 : f32
    %25 = vector.broadcast %cst_20 : f32 to vector<8x128xf32>
    %26 = arith.mulf %25, %24 : vector<8x128xf32>
    %27 = math.tanh %26 : vector<8x128xf32>
    %cst_21 = arith.constant 5.000000e-01 : f32
    %28 = vector.broadcast %cst_21 : f32 to vector<8x128xf32>
    %29 = arith.mulf %28, %27 : vector<8x128xf32>
    %cst_22 = arith.constant 5.000000e-01 : f32
    %30 = vector.broadcast %cst_22 : f32 to vector<8x128xf32>
    %31 = arith.addf %29, %30 : vector<8x128xf32>
    %32 = vector.extract_strided_slice %23 {offsets = [0, 128], sizes = [8, 128], strides = [1, 1]} : vector<8x512xf32> to vector<8x128xf32>
    %cst_23 = arith.constant 5.000000e-01 : f32
    %33 = vector.broadcast %cst_23 : f32 to vector<8x128xf32>
    %34 = arith.mulf %33, %32 : vector<8x128xf32>
    %35 = math.tanh %34 : vector<8x128xf32>
    %cst_24 = arith.constant 5.000000e-01 : f32
    %36 = vector.broadcast %cst_24 : f32 to vector<8x128xf32>
    %37 = arith.mulf %36, %35 : vector<8x128xf32>
    %cst_25 = arith.constant 5.000000e-01 : f32
    %38 = vector.broadcast %cst_25 : f32 to vector<8x128xf32>
    %39 = arith.addf %37, %38 : vector<8x128xf32>
    %40 = vector.extract_strided_slice %23 {offsets = [0, 256], sizes = [8, 128], strides = [1, 1]} : vector<8x512xf32> to vector<8x128xf32>
    %41 = math.tanh %40 : vector<8x128xf32>
    %42 = vector.extract_strided_slice %23 {offsets = [0, 384], sizes = [8, 128], strides = [1, 1]} : vector<8x512xf32> to vector<8x128xf32>
    %cst_26 = arith.constant 5.000000e-01 : f32
    %43 = vector.broadcast %cst_26 : f32 to vector<8x128xf32>
    %44 = arith.mulf %43, %42 : vector<8x128xf32>
    %45 = math.tanh %44 : vector<8x128xf32>
    %cst_27 = arith.constant 5.000000e-01 : f32
    %46 = vector.broadcast %cst_27 : f32 to vector<8x128xf32>
    %47 = arith.mulf %46, %45 : vector<8x128xf32>
    %cst_28 = arith.constant 5.000000e-01 : f32
    %48 = vector.broadcast %cst_28 : f32 to vector<8x128xf32>
    %49 = arith.addf %47, %48 : vector<8x128xf32>
    %50 = arith.mulf %39, %16 : vector<8x128xf32>
    %51 = arith.mulf %31, %41 : vector<8x128xf32>
    %52 = arith.addf %50, %51 : vector<8x128xf32>
    %53 = math.tanh %52 : vector<8x128xf32>
    %54 = arith.mulf %49, %53 : vector<8x128xf32>
    %c0_29 = arith.constant 0 : index
    %c0_30 = arith.constant 0 : index
    %55 = vector.load %arg13[%c0_29, %c0_30] : memref<8x128xf32, #tpu.memory_space<vmem>>, vector<8x128xf32>
    tpu.vector_store %arg13[%c0_29, %c0_30], %52 {strides = array<i32>} : memref<8x128xf32, #tpu.memory_space<vmem>>, vector<8x128xf32>,
    %c0_31 = arith.constant 0 : index
    %c0_32 = arith.constant 0 : index
    %56 = vector.load %arg12[%c0_31, %c0_32] : memref<8x128xf32, #tpu.memory_space<vmem>>, vector<8x128xf32>
    tpu.vector_store %arg12[%c0_31, %c0_32], %54 {strides = array<i32>} : memref<8x128xf32, #tpu.memory_space<vmem>>, vector<8x128xf32>,
    %57 = arith.extui %14 : i1 to i32
    %c0_i32_33 = arith.constant 0 : i32
    %58 = arith.cmpi ne, %57, %c0_i32_33 : i32
    scf.if %58 {
      %370 = arith.index_cast %18 : i32 to index
      %c0_185 = arith.constant 0 : index
      %371 = vector.load %arg11[%370, %c0_185] : memref<64x128xf32, #tpu.memory_space<vmem>>, vector<8x128xf32>
      tpu.vector_store %arg11[%370, %c0_185], %54 {strides = array<i32>} : memref<64x128xf32, #tpu.memory_space<vmem>>, vector<8x128xf32>,
    } else {
    }
    %c1_i32_34 = arith.constant 1 : i32
    %c0_35 = arith.constant 0 : index
    %c0_36 = arith.constant 0 : index
    %59 = vector.load %arg12[%c0_35, %c0_36] : memref<8x128xf32, #tpu.memory_space<vmem>>, vector<8x128xf32>
    %c0_37 = arith.constant 0 : index
    %c0_38 = arith.constant 0 : index
    %60 = vector.load %arg13[%c0_37, %c0_38] : memref<8x128xf32, #tpu.memory_space<vmem>>, vector<8x128xf32>
    %c8_i32_39 = arith.constant 8 : i32
    %61 = arith.muli %c1_i32_34, %c8_i32_39 : i32
    %62 = tpu.assume_multiple %61, 8 : i32
    %63 = arith.index_cast %62 : i32 to index
    %c0_40 = arith.constant 0 : index
    %64 = vector.load %arg10[%63, %c0_40] : memref<64x512xf32, #tpu.memory_space<vmem>>, vector<8x512xf32>
    %65 = arith.truncf %59 : vector<8x128xf32> to vector<8x128xbf16>
    %cst_41 = arith.constant dense<0.000000e+00> : vector<8x512xf32>
    %66 = tpu.matmul %65, %13, %cst_41 {dimension_numbers = #tpu.dot_dimension_numbers<[1], [0], [0], [1], [0, 0, 1, 1], [], []>} : vector<8x128xbf16>, vector<128x512xbf16>, vector<8x512xf32> -> vector<8x512xf32>
    %67 = arith.addf %64, %66 : vector<8x512xf32>
    %68 = vector.extract_strided_slice %67 {offsets = [0, 0], sizes = [8, 128], strides = [1, 1]} : vector<8x512xf32> to vector<8x128xf32>
    %cst_42 = arith.constant 5.000000e-01 : f32
    %69 = vector.broadcast %cst_42 : f32 to vector<8x128xf32>
    %70 = arith.mulf %69, %68 : vector<8x128xf32>
    %71 = math.tanh %70 : vector<8x128xf32>
    %cst_43 = arith.constant 5.000000e-01 : f32
    %72 = vector.broadcast %cst_43 : f32 to vector<8x128xf32>
    %73 = arith.mulf %72, %71 : vector<8x128xf32>
    %cst_44 = arith.constant 5.000000e-01 : f32
    %74 = vector.broadcast %cst_44 : f32 to vector<8x128xf32>
    %75 = arith.addf %73, %74 : vector<8x128xf32>
    %76 = vector.extract_strided_slice %67 {offsets = [0, 128], sizes = [8, 128], strides = [1, 1]} : vector<8x512xf32> to vector<8x128xf32>
    %cst_45 = arith.constant 5.000000e-01 : f32
    %77 = vector.broadcast %cst_45 : f32 to vector<8x128xf32>
    %78 = arith.mulf %77, %76 : vector<8x128xf32>
    %79 = math.tanh %78 : vector<8x128xf32>
    %cst_46 = arith.constant 5.000000e-01 : f32
    %80 = vector.broadcast %cst_46 : f32 to vector<8x128xf32>
    %81 = arith.mulf %80, %79 : vector<8x128xf32>
    %cst_47 = arith.constant 5.000000e-01 : f32
    %82 = vector.broadcast %cst_47 : f32 to vector<8x128xf32>
    %83 = arith.addf %81, %82 : vector<8x128xf32>
    %84 = vector.extract_strided_slice %67 {offsets = [0, 256], sizes = [8, 128], strides = [1, 1]} : vector<8x512xf32> to vector<8x128xf32>
    %85 = math.tanh %84 : vector<8x128xf32>
    %86 = vector.extract_strided_slice %67 {offsets = [0, 384], sizes = [8, 128], strides = [1, 1]} : vector<8x512xf32> to vector<8x128xf32>
    %cst_48 = arith.constant 5.000000e-01 : f32
    %87 = vector.broadcast %cst_48 : f32 to vector<8x128xf32>
    %88 = arith.mulf %87, %86 : vector<8x128xf32>
    %89 = math.tanh %88 : vector<8x128xf32>
    %cst_49 = arith.constant 5.000000e-01 : f32
    %90 = vector.broadcast %cst_49 : f32 to vector<8x128xf32>
    %91 = arith.mulf %90, %89 : vector<8x128xf32>
    %cst_50 = arith.constant 5.000000e-01 : f32
    %92 = vector.broadcast %cst_50 : f32 to vector<8x128xf32>
    %93 = arith.addf %91, %92 : vector<8x128xf32>
    %94 = arith.mulf %83, %60 : vector<8x128xf32>
    %95 = arith.mulf %75, %85 : vector<8x128xf32>
    %96 = arith.addf %94, %95 : vector<8x128xf32>
    %97 = math.tanh %96 : vector<8x128xf32>
    %98 = arith.mulf %93, %97 : vector<8x128xf32>
    %c0_51 = arith.constant 0 : index
    %c0_52 = arith.constant 0 : index
    %99 = vector.load %arg13[%c0_51, %c0_52] : memref<8x128xf32, #tpu.memory_space<vmem>>, vector<8x128xf32>
    tpu.vector_store %arg13[%c0_51, %c0_52], %96 {strides = array<i32>} : memref<8x128xf32, #tpu.memory_space<vmem>>, vector<8x128xf32>,
    %c0_53 = arith.constant 0 : index
    %c0_54 = arith.constant 0 : index
    %100 = vector.load %arg12[%c0_53, %c0_54] : memref<8x128xf32, #tpu.memory_space<vmem>>, vector<8x128xf32>
    tpu.vector_store %arg12[%c0_53, %c0_54], %98 {strides = array<i32>} : memref<8x128xf32, #tpu.memory_space<vmem>>, vector<8x128xf32>,
    %101 = arith.extui %14 : i1 to i32
    %c0_i32_55 = arith.constant 0 : i32
    %102 = arith.cmpi ne, %101, %c0_i32_55 : i32
    scf.if %102 {
      %370 = arith.index_cast %62 : i32 to index
      %c0_185 = arith.constant 0 : index
      %371 = vector.load %arg11[%370, %c0_185] : memref<64x128xf32, #tpu.memory_space<vmem>>, vector<8x128xf32>
      tpu.vector_store %arg11[%370, %c0_185], %98 {strides = array<i32>} : memref<64x128xf32, #tpu.memory_space<vmem>>, vector<8x128xf32>,
    } else {
    }
    %c2_i32 = arith.constant 2 : i32
    %c0_56 = arith.constant 0 : index
    %c0_57 = arith.constant 0 : index
    %103 = vector.load %arg12[%c0_56, %c0_57] : memref<8x128xf32, #tpu.memory_space<vmem>>, vector<8x128xf32>
    %c0_58 = arith.constant 0 : index
    %c0_59 = arith.constant 0 : index
    %104 = vector.load %arg13[%c0_58, %c0_59] : memref<8x128xf32, #tpu.memory_space<vmem>>, vector<8x128xf32>
    %c8_i32_60 = arith.constant 8 : i32
    %105 = arith.muli %c2_i32, %c8_i32_60 : i32
    %106 = tpu.assume_multiple %105, 8 : i32
    %107 = arith.index_cast %106 : i32 to index
    %c0_61 = arith.constant 0 : index
    %108 = vector.load %arg10[%107, %c0_61] : memref<64x512xf32, #tpu.memory_space<vmem>>, vector<8x512xf32>
    %109 = arith.truncf %103 : vector<8x128xf32> to vector<8x128xbf16>
    %cst_62 = arith.constant dense<0.000000e+00> : vector<8x512xf32>
    %110 = tpu.matmul %109, %13, %cst_62 {dimension_numbers = #tpu.dot_dimension_numbers<[1], [0], [0], [1], [0, 0, 1, 1], [], []>} : vector<8x128xbf16>, vector<128x512xbf16>, vector<8x512xf32> -> vector<8x512xf32>
    %111 = arith.addf %108, %110 : vector<8x512xf32>
    %112 = vector.extract_strided_slice %111 {offsets = [0, 0], sizes = [8, 128], strides = [1, 1]} : vector<8x512xf32> to vector<8x128xf32>
    %cst_63 = arith.constant 5.000000e-01 : f32
    %113 = vector.broadcast %cst_63 : f32 to vector<8x128xf32>
    %114 = arith.mulf %113, %112 : vector<8x128xf32>
    %115 = math.tanh %114 : vector<8x128xf32>
    %cst_64 = arith.constant 5.000000e-01 : f32
    %116 = vector.broadcast %cst_64 : f32 to vector<8x128xf32>
    %117 = arith.mulf %116, %115 : vector<8x128xf32>
    %cst_65 = arith.constant 5.000000e-01 : f32
    %118 = vector.broadcast %cst_65 : f32 to vector<8x128xf32>
    %119 = arith.addf %117, %118 : vector<8x128xf32>
    %120 = vector.extract_strided_slice %111 {offsets = [0, 128], sizes = [8, 128], strides = [1, 1]} : vector<8x512xf32> to vector<8x128xf32>
    %cst_66 = arith.constant 5.000000e-01 : f32
    %121 = vector.broadcast %cst_66 : f32 to vector<8x128xf32>
    %122 = arith.mulf %121, %120 : vector<8x128xf32>
    %123 = math.tanh %122 : vector<8x128xf32>
    %cst_67 = arith.constant 5.000000e-01 : f32
    %124 = vector.broadcast %cst_67 : f32 to vector<8x128xf32>
    %125 = arith.mulf %124, %123 : vector<8x128xf32>
    %cst_68 = arith.constant 5.000000e-01 : f32
    %126 = vector.broadcast %cst_68 : f32 to vector<8x128xf32>
    %127 = arith.addf %125, %126 : vector<8x128xf32>
    %128 = vector.extract_strided_slice %111 {offsets = [0, 256], sizes = [8, 128], strides = [1, 1]} : vector<8x512xf32> to vector<8x128xf32>
    %129 = math.tanh %128 : vector<8x128xf32>
    %130 = vector.extract_strided_slice %111 {offsets = [0, 384], sizes = [8, 128], strides = [1, 1]} : vector<8x512xf32> to vector<8x128xf32>
    %cst_69 = arith.constant 5.000000e-01 : f32
    %131 = vector.broadcast %cst_69 : f32 to vector<8x128xf32>
    %132 = arith.mulf %131, %130 : vector<8x128xf32>
    %133 = math.tanh %132 : vector<8x128xf32>
    %cst_70 = arith.constant 5.000000e-01 : f32
    %134 = vector.broadcast %cst_70 : f32 to vector<8x128xf32>
    %135 = arith.mulf %134, %133 : vector<8x128xf32>
    %cst_71 = arith.constant 5.000000e-01 : f32
    %136 = vector.broadcast %cst_71 : f32 to vector<8x128xf32>
    %137 = arith.addf %135, %136 : vector<8x128xf32>
    %138 = arith.mulf %127, %104 : vector<8x128xf32>
    %139 = arith.mulf %119, %129 : vector<8x128xf32>
    %140 = arith.addf %138, %139 : vector<8x128xf32>
    %141 = math.tanh %140 : vector<8x128xf32>
    %142 = arith.mulf %137, %141 : vector<8x128xf32>
    %c0_72 = arith.constant 0 : index
    %c0_73 = arith.constant 0 : index
    %143 = vector.load %arg13[%c0_72, %c0_73] : memref<8x128xf32, #tpu.memory_space<vmem>>, vector<8x128xf32>
    tpu.vector_store %arg13[%c0_72, %c0_73], %140 {strides = array<i32>} : memref<8x128xf32, #tpu.memory_space<vmem>>, vector<8x128xf32>,
    %c0_74 = arith.constant 0 : index
    %c0_75 = arith.constant 0 : index
    %144 = vector.load %arg12[%c0_74, %c0_75] : memref<8x128xf32, #tpu.memory_space<vmem>>, vector<8x128xf32>
    tpu.vector_store %arg12[%c0_74, %c0_75], %142 {strides = array<i32>} : memref<8x128xf32, #tpu.memory_space<vmem>>, vector<8x128xf32>,
    %145 = arith.extui %14 : i1 to i32
    %c0_i32_76 = arith.constant 0 : i32
    %146 = arith.cmpi ne, %145, %c0_i32_76 : i32
    scf.if %146 {
      %370 = arith.index_cast %106 : i32 to index
      %c0_185 = arith.constant 0 : index
      %371 = vector.load %arg11[%370, %c0_185] : memref<64x128xf32, #tpu.memory_space<vmem>>, vector<8x128xf32>
      tpu.vector_store %arg11[%370, %c0_185], %142 {strides = array<i32>} : memref<64x128xf32, #tpu.memory_space<vmem>>, vector<8x128xf32>,
    } else {
    }
    %c3_i32 = arith.constant 3 : i32
    %c0_77 = arith.constant 0 : index
    %c0_78 = arith.constant 0 : index
    %147 = vector.load %arg12[%c0_77, %c0_78] : memref<8x128xf32, #tpu.memory_space<vmem>>, vector<8x128xf32>
    %c0_79 = arith.constant 0 : index
    %c0_80 = arith.constant 0 : index
    %148 = vector.load %arg13[%c0_79, %c0_80] : memref<8x128xf32, #tpu.memory_space<vmem>>, vector<8x128xf32>
    %c8_i32_81 = arith.constant 8 : i32
    %149 = arith.muli %c3_i32, %c8_i32_81 : i32
    %150 = tpu.assume_multiple %149, 8 : i32
    %151 = arith.index_cast %150 : i32 to index
    %c0_82 = arith.constant 0 : index
    %152 = vector.load %arg10[%151, %c0_82] : memref<64x512xf32, #tpu.memory_space<vmem>>, vector<8x512xf32>
    %153 = arith.truncf %147 : vector<8x128xf32> to vector<8x128xbf16>
    %cst_83 = arith.constant dense<0.000000e+00> : vector<8x512xf32>
    %154 = tpu.matmul %153, %13, %cst_83 {dimension_numbers = #tpu.dot_dimension_numbers<[1], [0], [0], [1], [0, 0, 1, 1], [], []>} : vector<8x128xbf16>, vector<128x512xbf16>, vector<8x512xf32> -> vector<8x512xf32>
    %155 = arith.addf %152, %154 : vector<8x512xf32>
    %156 = vector.extract_strided_slice %155 {offsets = [0, 0], sizes = [8, 128], strides = [1, 1]} : vector<8x512xf32> to vector<8x128xf32>
    %cst_84 = arith.constant 5.000000e-01 : f32
    %157 = vector.broadcast %cst_84 : f32 to vector<8x128xf32>
    %158 = arith.mulf %157, %156 : vector<8x128xf32>
    %159 = math.tanh %158 : vector<8x128xf32>
    %cst_85 = arith.constant 5.000000e-01 : f32
    %160 = vector.broadcast %cst_85 : f32 to vector<8x128xf32>
    %161 = arith.mulf %160, %159 : vector<8x128xf32>
    %cst_86 = arith.constant 5.000000e-01 : f32
    %162 = vector.broadcast %cst_86 : f32 to vector<8x128xf32>
    %163 = arith.addf %161, %162 : vector<8x128xf32>
    %164 = vector.extract_strided_slice %155 {offsets = [0, 128], sizes = [8, 128], strides = [1, 1]} : vector<8x512xf32> to vector<8x128xf32>
    %cst_87 = arith.constant 5.000000e-01 : f32
    %165 = vector.broadcast %cst_87 : f32 to vector<8x128xf32>
    %166 = arith.mulf %165, %164 : vector<8x128xf32>
    %167 = math.tanh %166 : vector<8x128xf32>
    %cst_88 = arith.constant 5.000000e-01 : f32
    %168 = vector.broadcast %cst_88 : f32 to vector<8x128xf32>
    %169 = arith.mulf %168, %167 : vector<8x128xf32>
    %cst_89 = arith.constant 5.000000e-01 : f32
    %170 = vector.broadcast %cst_89 : f32 to vector<8x128xf32>
    %171 = arith.addf %169, %170 : vector<8x128xf32>
    %172 = vector.extract_strided_slice %155 {offsets = [0, 256], sizes = [8, 128], strides = [1, 1]} : vector<8x512xf32> to vector<8x128xf32>
    %173 = math.tanh %172 : vector<8x128xf32>
    %174 = vector.extract_strided_slice %155 {offsets = [0, 384], sizes = [8, 128], strides = [1, 1]} : vector<8x512xf32> to vector<8x128xf32>
    %cst_90 = arith.constant 5.000000e-01 : f32
    %175 = vector.broadcast %cst_90 : f32 to vector<8x128xf32>
    %176 = arith.mulf %175, %174 : vector<8x128xf32>
    %177 = math.tanh %176 : vector<8x128xf32>
    %cst_91 = arith.constant 5.000000e-01 : f32
    %178 = vector.broadcast %cst_91 : f32 to vector<8x128xf32>
    %179 = arith.mulf %178, %177 : vector<8x128xf32>
    %cst_92 = arith.constant 5.000000e-01 : f32
    %180 = vector.broadcast %cst_92 : f32 to vector<8x128xf32>
    %181 = arith.addf %179, %180 : vector<8x128xf32>
    %182 = arith.mulf %171, %148 : vector<8x128xf32>
    %183 = arith.mulf %163, %173 : vector<8x128xf32>
    %184 = arith.addf %182, %183 : vector<8x128xf32>
    %185 = math.tanh %184 : vector<8x128xf32>
    %186 = arith.mulf %181, %185 : vector<8x128xf32>
    %c0_93 = arith.constant 0 : index
    %c0_94 = arith.constant 0 : index
    %187 = vector.load %arg13[%c0_93, %c0_94] : memref<8x128xf32, #tpu.memory_space<vmem>>, vector<8x128xf32>
    tpu.vector_store %arg13[%c0_93, %c0_94], %184 {strides = array<i32>} : memref<8x128xf32, #tpu.memory_space<vmem>>, vector<8x128xf32>,
    %c0_95 = arith.constant 0 : index
    %c0_96 = arith.constant 0 : index
    %188 = vector.load %arg12[%c0_95, %c0_96] : memref<8x128xf32, #tpu.memory_space<vmem>>, vector<8x128xf32>
    tpu.vector_store %arg12[%c0_95, %c0_96], %186 {strides = array<i32>} : memref<8x128xf32, #tpu.memory_space<vmem>>, vector<8x128xf32>,
    %189 = arith.extui %14 : i1 to i32
    %c0_i32_97 = arith.constant 0 : i32
    %190 = arith.cmpi ne, %189, %c0_i32_97 : i32
    scf.if %190 {
      %370 = arith.index_cast %150 : i32 to index
      %c0_185 = arith.constant 0 : index
      %371 = vector.load %arg11[%370, %c0_185] : memref<64x128xf32, #tpu.memory_space<vmem>>, vector<8x128xf32>
      tpu.vector_store %arg11[%370, %c0_185], %186 {strides = array<i32>} : memref<64x128xf32, #tpu.memory_space<vmem>>, vector<8x128xf32>,
    } else {
    }
    %c4_i32 = arith.constant 4 : i32
    %c0_98 = arith.constant 0 : index
    %c0_99 = arith.constant 0 : index
    %191 = vector.load %arg12[%c0_98, %c0_99] : memref<8x128xf32, #tpu.memory_space<vmem>>, vector<8x128xf32>
    %c0_100 = arith.constant 0 : index
    %c0_101 = arith.constant 0 : index
    %192 = vector.load %arg13[%c0_100, %c0_101] : memref<8x128xf32, #tpu.memory_space<vmem>>, vector<8x128xf32>
    %c8_i32_102 = arith.constant 8 : i32
    %193 = arith.muli %c4_i32, %c8_i32_102 : i32
    %194 = tpu.assume_multiple %193, 8 : i32
    %195 = arith.index_cast %194 : i32 to index
    %c0_103 = arith.constant 0 : index
    %196 = vector.load %arg10[%195, %c0_103] : memref<64x512xf32, #tpu.memory_space<vmem>>, vector<8x512xf32>
    %197 = arith.truncf %191 : vector<8x128xf32> to vector<8x128xbf16>
    %cst_104 = arith.constant dense<0.000000e+00> : vector<8x512xf32>
    %198 = tpu.matmul %197, %13, %cst_104 {dimension_numbers = #tpu.dot_dimension_numbers<[1], [0], [0], [1], [0, 0, 1, 1], [], []>} : vector<8x128xbf16>, vector<128x512xbf16>, vector<8x512xf32> -> vector<8x512xf32>
    %199 = arith.addf %196, %198 : vector<8x512xf32>
    %200 = vector.extract_strided_slice %199 {offsets = [0, 0], sizes = [8, 128], strides = [1, 1]} : vector<8x512xf32> to vector<8x128xf32>
    %cst_105 = arith.constant 5.000000e-01 : f32
    %201 = vector.broadcast %cst_105 : f32 to vector<8x128xf32>
    %202 = arith.mulf %201, %200 : vector<8x128xf32>
    %203 = math.tanh %202 : vector<8x128xf32>
    %cst_106 = arith.constant 5.000000e-01 : f32
    %204 = vector.broadcast %cst_106 : f32 to vector<8x128xf32>
    %205 = arith.mulf %204, %203 : vector<8x128xf32>
    %cst_107 = arith.constant 5.000000e-01 : f32
    %206 = vector.broadcast %cst_107 : f32 to vector<8x128xf32>
    %207 = arith.addf %205, %206 : vector<8x128xf32>
    %208 = vector.extract_strided_slice %199 {offsets = [0, 128], sizes = [8, 128], strides = [1, 1]} : vector<8x512xf32> to vector<8x128xf32>
    %cst_108 = arith.constant 5.000000e-01 : f32
    %209 = vector.broadcast %cst_108 : f32 to vector<8x128xf32>
    %210 = arith.mulf %209, %208 : vector<8x128xf32>
    %211 = math.tanh %210 : vector<8x128xf32>
    %cst_109 = arith.constant 5.000000e-01 : f32
    %212 = vector.broadcast %cst_109 : f32 to vector<8x128xf32>
    %213 = arith.mulf %212, %211 : vector<8x128xf32>
    %cst_110 = arith.constant 5.000000e-01 : f32
    %214 = vector.broadcast %cst_110 : f32 to vector<8x128xf32>
    %215 = arith.addf %213, %214 : vector<8x128xf32>
    %216 = vector.extract_strided_slice %199 {offsets = [0, 256], sizes = [8, 128], strides = [1, 1]} : vector<8x512xf32> to vector<8x128xf32>
    %217 = math.tanh %216 : vector<8x128xf32>
    %218 = vector.extract_strided_slice %199 {offsets = [0, 384], sizes = [8, 128], strides = [1, 1]} : vector<8x512xf32> to vector<8x128xf32>
    %cst_111 = arith.constant 5.000000e-01 : f32
    %219 = vector.broadcast %cst_111 : f32 to vector<8x128xf32>
    %220 = arith.mulf %219, %218 : vector<8x128xf32>
    %221 = math.tanh %220 : vector<8x128xf32>
    %cst_112 = arith.constant 5.000000e-01 : f32
    %222 = vector.broadcast %cst_112 : f32 to vector<8x128xf32>
    %223 = arith.mulf %222, %221 : vector<8x128xf32>
    %cst_113 = arith.constant 5.000000e-01 : f32
    %224 = vector.broadcast %cst_113 : f32 to vector<8x128xf32>
    %225 = arith.addf %223, %224 : vector<8x128xf32>
    %226 = arith.mulf %215, %192 : vector<8x128xf32>
    %227 = arith.mulf %207, %217 : vector<8x128xf32>
    %228 = arith.addf %226, %227 : vector<8x128xf32>
    %229 = math.tanh %228 : vector<8x128xf32>
    %230 = arith.mulf %225, %229 : vector<8x128xf32>
    %c0_114 = arith.constant 0 : index
    %c0_115 = arith.constant 0 : index
    %231 = vector.load %arg13[%c0_114, %c0_115] : memref<8x128xf32, #tpu.memory_space<vmem>>, vector<8x128xf32>
    tpu.vector_store %arg13[%c0_114, %c0_115], %228 {strides = array<i32>} : memref<8x128xf32, #tpu.memory_space<vmem>>, vector<8x128xf32>,
    %c0_116 = arith.constant 0 : index
    %c0_117 = arith.constant 0 : index
    %232 = vector.load %arg12[%c0_116, %c0_117] : memref<8x128xf32, #tpu.memory_space<vmem>>, vector<8x128xf32>
    tpu.vector_store %arg12[%c0_116, %c0_117], %230 {strides = array<i32>} : memref<8x128xf32, #tpu.memory_space<vmem>>, vector<8x128xf32>,
    %233 = arith.extui %14 : i1 to i32
    %c0_i32_118 = arith.constant 0 : i32
    %234 = arith.cmpi ne, %233, %c0_i32_118 : i32
    scf.if %234 {
      %370 = arith.index_cast %194 : i32 to index
      %c0_185 = arith.constant 0 : index
      %371 = vector.load %arg11[%370, %c0_185] : memref<64x128xf32, #tpu.memory_space<vmem>>, vector<8x128xf32>
      tpu.vector_store %arg11[%370, %c0_185], %230 {strides = array<i32>} : memref<64x128xf32, #tpu.memory_space<vmem>>, vector<8x128xf32>,
    } else {
    }
    %c5_i32 = arith.constant 5 : i32
    %c0_119 = arith.constant 0 : index
    %c0_120 = arith.constant 0 : index
    %235 = vector.load %arg12[%c0_119, %c0_120] : memref<8x128xf32, #tpu.memory_space<vmem>>, vector<8x128xf32>
    %c0_121 = arith.constant 0 : index
    %c0_122 = arith.constant 0 : index
    %236 = vector.load %arg13[%c0_121, %c0_122] : memref<8x128xf32, #tpu.memory_space<vmem>>, vector<8x128xf32>
    %c8_i32_123 = arith.constant 8 : i32
    %237 = arith.muli %c5_i32, %c8_i32_123 : i32
    %238 = tpu.assume_multiple %237, 8 : i32
    %239 = arith.index_cast %238 : i32 to index
    %c0_124 = arith.constant 0 : index
    %240 = vector.load %arg10[%239, %c0_124] : memref<64x512xf32, #tpu.memory_space<vmem>>, vector<8x512xf32>
    %241 = arith.truncf %235 : vector<8x128xf32> to vector<8x128xbf16>
    %cst_125 = arith.constant dense<0.000000e+00> : vector<8x512xf32>
    %242 = tpu.matmul %241, %13, %cst_125 {dimension_numbers = #tpu.dot_dimension_numbers<[1], [0], [0], [1], [0, 0, 1, 1], [], []>} : vector<8x128xbf16>, vector<128x512xbf16>, vector<8x512xf32> -> vector<8x512xf32>
    %243 = arith.addf %240, %242 : vector<8x512xf32>
    %244 = vector.extract_strided_slice %243 {offsets = [0, 0], sizes = [8, 128], strides = [1, 1]} : vector<8x512xf32> to vector<8x128xf32>
    %cst_126 = arith.constant 5.000000e-01 : f32
    %245 = vector.broadcast %cst_126 : f32 to vector<8x128xf32>
    %246 = arith.mulf %245, %244 : vector<8x128xf32>
    %247 = math.tanh %246 : vector<8x128xf32>
    %cst_127 = arith.constant 5.000000e-01 : f32
    %248 = vector.broadcast %cst_127 : f32 to vector<8x128xf32>
    %249 = arith.mulf %248, %247 : vector<8x128xf32>
    %cst_128 = arith.constant 5.000000e-01 : f32
    %250 = vector.broadcast %cst_128 : f32 to vector<8x128xf32>
    %251 = arith.addf %249, %250 : vector<8x128xf32>
    %252 = vector.extract_strided_slice %243 {offsets = [0, 128], sizes = [8, 128], strides = [1, 1]} : vector<8x512xf32> to vector<8x128xf32>
    %cst_129 = arith.constant 5.000000e-01 : f32
    %253 = vector.broadcast %cst_129 : f32 to vector<8x128xf32>
    %254 = arith.mulf %253, %252 : vector<8x128xf32>
    %255 = math.tanh %254 : vector<8x128xf32>
    %cst_130 = arith.constant 5.000000e-01 : f32
    %256 = vector.broadcast %cst_130 : f32 to vector<8x128xf32>
    %257 = arith.mulf %256, %255 : vector<8x128xf32>
    %cst_131 = arith.constant 5.000000e-01 : f32
    %258 = vector.broadcast %cst_131 : f32 to vector<8x128xf32>
    %259 = arith.addf %257, %258 : vector<8x128xf32>
    %260 = vector.extract_strided_slice %243 {offsets = [0, 256], sizes = [8, 128], strides = [1, 1]} : vector<8x512xf32> to vector<8x128xf32>
    %261 = math.tanh %260 : vector<8x128xf32>
    %262 = vector.extract_strided_slice %243 {offsets = [0, 384], sizes = [8, 128], strides = [1, 1]} : vector<8x512xf32> to vector<8x128xf32>
    %cst_132 = arith.constant 5.000000e-01 : f32
    %263 = vector.broadcast %cst_132 : f32 to vector<8x128xf32>
    %264 = arith.mulf %263, %262 : vector<8x128xf32>
    %265 = math.tanh %264 : vector<8x128xf32>
    %cst_133 = arith.constant 5.000000e-01 : f32
    %266 = vector.broadcast %cst_133 : f32 to vector<8x128xf32>
    %267 = arith.mulf %266, %265 : vector<8x128xf32>
    %cst_134 = arith.constant 5.000000e-01 : f32
    %268 = vector.broadcast %cst_134 : f32 to vector<8x128xf32>
    %269 = arith.addf %267, %268 : vector<8x128xf32>
    %270 = arith.mulf %259, %236 : vector<8x128xf32>
    %271 = arith.mulf %251, %261 : vector<8x128xf32>
    %272 = arith.addf %270, %271 : vector<8x128xf32>
    %273 = math.tanh %272 : vector<8x128xf32>
    %274 = arith.mulf %269, %273 : vector<8x128xf32>
    %c0_135 = arith.constant 0 : index
    %c0_136 = arith.constant 0 : index
    %275 = vector.load %arg13[%c0_135, %c0_136] : memref<8x128xf32, #tpu.memory_space<vmem>>, vector<8x128xf32>
    tpu.vector_store %arg13[%c0_135, %c0_136], %272 {strides = array<i32>} : memref<8x128xf32, #tpu.memory_space<vmem>>, vector<8x128xf32>,
    %c0_137 = arith.constant 0 : index
    %c0_138 = arith.constant 0 : index
    %276 = vector.load %arg12[%c0_137, %c0_138] : memref<8x128xf32, #tpu.memory_space<vmem>>, vector<8x128xf32>
    tpu.vector_store %arg12[%c0_137, %c0_138], %274 {strides = array<i32>} : memref<8x128xf32, #tpu.memory_space<vmem>>, vector<8x128xf32>,
    %277 = arith.extui %14 : i1 to i32
    %c0_i32_139 = arith.constant 0 : i32
    %278 = arith.cmpi ne, %277, %c0_i32_139 : i32
    scf.if %278 {
      %370 = arith.index_cast %238 : i32 to index
      %c0_185 = arith.constant 0 : index
      %371 = vector.load %arg11[%370, %c0_185] : memref<64x128xf32, #tpu.memory_space<vmem>>, vector<8x128xf32>
      tpu.vector_store %arg11[%370, %c0_185], %274 {strides = array<i32>} : memref<64x128xf32, #tpu.memory_space<vmem>>, vector<8x128xf32>,
    } else {
    }
    %c6_i32 = arith.constant 6 : i32
    %c0_140 = arith.constant 0 : index
    %c0_141 = arith.constant 0 : index
    %279 = vector.load %arg12[%c0_140, %c0_141] : memref<8x128xf32, #tpu.memory_space<vmem>>, vector<8x128xf32>
    %c0_142 = arith.constant 0 : index
    %c0_143 = arith.constant 0 : index
    %280 = vector.load %arg13[%c0_142, %c0_143] : memref<8x128xf32, #tpu.memory_space<vmem>>, vector<8x128xf32>
    %c8_i32_144 = arith.constant 8 : i32
    %281 = arith.muli %c6_i32, %c8_i32_144 : i32
    %282 = tpu.assume_multiple %281, 8 : i32
    %283 = arith.index_cast %282 : i32 to index
    %c0_145 = arith.constant 0 : index
    %284 = vector.load %arg10[%283, %c0_145] : memref<64x512xf32, #tpu.memory_space<vmem>>, vector<8x512xf32>
    %285 = arith.truncf %279 : vector<8x128xf32> to vector<8x128xbf16>
    %cst_146 = arith.constant dense<0.000000e+00> : vector<8x512xf32>
    %286 = tpu.matmul %285, %13, %cst_146 {dimension_numbers = #tpu.dot_dimension_numbers<[1], [0], [0], [1], [0, 0, 1, 1], [], []>} : vector<8x128xbf16>, vector<128x512xbf16>, vector<8x512xf32> -> vector<8x512xf32>
    %287 = arith.addf %284, %286 : vector<8x512xf32>
    %288 = vector.extract_strided_slice %287 {offsets = [0, 0], sizes = [8, 128], strides = [1, 1]} : vector<8x512xf32> to vector<8x128xf32>
    %cst_147 = arith.constant 5.000000e-01 : f32
    %289 = vector.broadcast %cst_147 : f32 to vector<8x128xf32>
    %290 = arith.mulf %289, %288 : vector<8x128xf32>
    %291 = math.tanh %290 : vector<8x128xf32>
    %cst_148 = arith.constant 5.000000e-01 : f32
    %292 = vector.broadcast %cst_148 : f32 to vector<8x128xf32>
    %293 = arith.mulf %292, %291 : vector<8x128xf32>
    %cst_149 = arith.constant 5.000000e-01 : f32
    %294 = vector.broadcast %cst_149 : f32 to vector<8x128xf32>
    %295 = arith.addf %293, %294 : vector<8x128xf32>
    %296 = vector.extract_strided_slice %287 {offsets = [0, 128], sizes = [8, 128], strides = [1, 1]} : vector<8x512xf32> to vector<8x128xf32>
    %cst_150 = arith.constant 5.000000e-01 : f32
    %297 = vector.broadcast %cst_150 : f32 to vector<8x128xf32>
    %298 = arith.mulf %297, %296 : vector<8x128xf32>
    %299 = math.tanh %298 : vector<8x128xf32>
    %cst_151 = arith.constant 5.000000e-01 : f32
    %300 = vector.broadcast %cst_151 : f32 to vector<8x128xf32>
    %301 = arith.mulf %300, %299 : vector<8x128xf32>
    %cst_152 = arith.constant 5.000000e-01 : f32
    %302 = vector.broadcast %cst_152 : f32 to vector<8x128xf32>
    %303 = arith.addf %301, %302 : vector<8x128xf32>
    %304 = vector.extract_strided_slice %287 {offsets = [0, 256], sizes = [8, 128], strides = [1, 1]} : vector<8x512xf32> to vector<8x128xf32>
    %305 = math.tanh %304 : vector<8x128xf32>
    %306 = vector.extract_strided_slice %287 {offsets = [0, 384], sizes = [8, 128], strides = [1, 1]} : vector<8x512xf32> to vector<8x128xf32>
    %cst_153 = arith.constant 5.000000e-01 : f32
    %307 = vector.broadcast %cst_153 : f32 to vector<8x128xf32>
    %308 = arith.mulf %307, %306 : vector<8x128xf32>
    %309 = math.tanh %308 : vector<8x128xf32>
    %cst_154 = arith.constant 5.000000e-01 : f32
    %310 = vector.broadcast %cst_154 : f32 to vector<8x128xf32>
    %311 = arith.mulf %310, %309 : vector<8x128xf32>
    %cst_155 = arith.constant 5.000000e-01 : f32
    %312 = vector.broadcast %cst_155 : f32 to vector<8x128xf32>
    %313 = arith.addf %311, %312 : vector<8x128xf32>
    %314 = arith.mulf %303, %280 : vector<8x128xf32>
    %315 = arith.mulf %295, %305 : vector<8x128xf32>
    %316 = arith.addf %314, %315 : vector<8x128xf32>
    %317 = math.tanh %316 : vector<8x128xf32>
    %318 = arith.mulf %313, %317 : vector<8x128xf32>
    %c0_156 = arith.constant 0 : index
    %c0_157 = arith.constant 0 : index
    %319 = vector.load %arg13[%c0_156, %c0_157] : memref<8x128xf32, #tpu.memory_space<vmem>>, vector<8x128xf32>
    tpu.vector_store %arg13[%c0_156, %c0_157], %316 {strides = array<i32>} : memref<8x128xf32, #tpu.memory_space<vmem>>, vector<8x128xf32>,
    %c0_158 = arith.constant 0 : index
    %c0_159 = arith.constant 0 : index
    %320 = vector.load %arg12[%c0_158, %c0_159] : memref<8x128xf32, #tpu.memory_space<vmem>>, vector<8x128xf32>
    tpu.vector_store %arg12[%c0_158, %c0_159], %318 {strides = array<i32>} : memref<8x128xf32, #tpu.memory_space<vmem>>, vector<8x128xf32>,
    %321 = arith.extui %14 : i1 to i32
    %c0_i32_160 = arith.constant 0 : i32
    %322 = arith.cmpi ne, %321, %c0_i32_160 : i32
    scf.if %322 {
      %370 = arith.index_cast %282 : i32 to index
      %c0_185 = arith.constant 0 : index
      %371 = vector.load %arg11[%370, %c0_185] : memref<64x128xf32, #tpu.memory_space<vmem>>, vector<8x128xf32>
      tpu.vector_store %arg11[%370, %c0_185], %318 {strides = array<i32>} : memref<64x128xf32, #tpu.memory_space<vmem>>, vector<8x128xf32>,
    } else {
    }
    %c7_i32 = arith.constant 7 : i32
    %c0_161 = arith.constant 0 : index
    %c0_162 = arith.constant 0 : index
    %323 = vector.load %arg12[%c0_161, %c0_162] : memref<8x128xf32, #tpu.memory_space<vmem>>, vector<8x128xf32>
    %c0_163 = arith.constant 0 : index
    %c0_164 = arith.constant 0 : index
    %324 = vector.load %arg13[%c0_163, %c0_164] : memref<8x128xf32, #tpu.memory_space<vmem>>, vector<8x128xf32>
    %c8_i32_165 = arith.constant 8 : i32
    %325 = arith.muli %c7_i32, %c8_i32_165 : i32
    %326 = tpu.assume_multiple %325, 8 : i32
    %327 = arith.index_cast %326 : i32 to index
    %c0_166 = arith.constant 0 : index
    %328 = vector.load %arg10[%327, %c0_166] : memref<64x512xf32, #tpu.memory_space<vmem>>, vector<8x512xf32>
    %329 = arith.truncf %323 : vector<8x128xf32> to vector<8x128xbf16>
    %cst_167 = arith.constant dense<0.000000e+00> : vector<8x512xf32>
    %330 = tpu.matmul %329, %13, %cst_167 {dimension_numbers = #tpu.dot_dimension_numbers<[1], [0], [0], [1], [0, 0, 1, 1], [], []>} : vector<8x128xbf16>, vector<128x512xbf16>, vector<8x512xf32> -> vector<8x512xf32>
    %331 = arith.addf %328, %330 : vector<8x512xf32>
    %332 = vector.extract_strided_slice %331 {offsets = [0, 0], sizes = [8, 128], strides = [1, 1]} : vector<8x512xf32> to vector<8x128xf32>
    %cst_168 = arith.constant 5.000000e-01 : f32
    %333 = vector.broadcast %cst_168 : f32 to vector<8x128xf32>
    %334 = arith.mulf %333, %332 : vector<8x128xf32>
    %335 = math.tanh %334 : vector<8x128xf32>
    %cst_169 = arith.constant 5.000000e-01 : f32
    %336 = vector.broadcast %cst_169 : f32 to vector<8x128xf32>
    %337 = arith.mulf %336, %335 : vector<8x128xf32>
    %cst_170 = arith.constant 5.000000e-01 : f32
    %338 = vector.broadcast %cst_170 : f32 to vector<8x128xf32>
    %339 = arith.addf %337, %338 : vector<8x128xf32>
    %340 = vector.extract_strided_slice %331 {offsets = [0, 128], sizes = [8, 128], strides = [1, 1]} : vector<8x512xf32> to vector<8x128xf32>
    %cst_171 = arith.constant 5.000000e-01 : f32
    %341 = vector.broadcast %cst_171 : f32 to vector<8x128xf32>
    %342 = arith.mulf %341, %340 : vector<8x128xf32>
    %343 = math.tanh %342 : vector<8x128xf32>
    %cst_172 = arith.constant 5.000000e-01 : f32
    %344 = vector.broadcast %cst_172 : f32 to vector<8x128xf32>
    %345 = arith.mulf %344, %343 : vector<8x128xf32>
    %cst_173 = arith.constant 5.000000e-01 : f32
    %346 = vector.broadcast %cst_173 : f32 to vector<8x128xf32>
    %347 = arith.addf %345, %346 : vector<8x128xf32>
    %348 = vector.extract_strided_slice %331 {offsets = [0, 256], sizes = [8, 128], strides = [1, 1]} : vector<8x512xf32> to vector<8x128xf32>
    %349 = math.tanh %348 : vector<8x128xf32>
    %350 = vector.extract_strided_slice %331 {offsets = [0, 384], sizes = [8, 128], strides = [1, 1]} : vector<8x512xf32> to vector<8x128xf32>
    %cst_174 = arith.constant 5.000000e-01 : f32
    %351 = vector.broadcast %cst_174 : f32 to vector<8x128xf32>
    %352 = arith.mulf %351, %350 : vector<8x128xf32>
    %353 = math.tanh %352 : vector<8x128xf32>
    %cst_175 = arith.constant 5.000000e-01 : f32
    %354 = vector.broadcast %cst_175 : f32 to vector<8x128xf32>
    %355 = arith.mulf %354, %353 : vector<8x128xf32>
    %cst_176 = arith.constant 5.000000e-01 : f32
    %356 = vector.broadcast %cst_176 : f32 to vector<8x128xf32>
    %357 = arith.addf %355, %356 : vector<8x128xf32>
    %358 = arith.mulf %347, %324 : vector<8x128xf32>
    %359 = arith.mulf %339, %349 : vector<8x128xf32>
    %360 = arith.addf %358, %359 : vector<8x128xf32>
    %361 = math.tanh %360 : vector<8x128xf32>
    %362 = arith.mulf %357, %361 : vector<8x128xf32>
    %c0_177 = arith.constant 0 : index
    %c0_178 = arith.constant 0 : index
    %363 = vector.load %arg13[%c0_177, %c0_178] : memref<8x128xf32, #tpu.memory_space<vmem>>, vector<8x128xf32>
    tpu.vector_store %arg13[%c0_177, %c0_178], %360 {strides = array<i32>} : memref<8x128xf32, #tpu.memory_space<vmem>>, vector<8x128xf32>,
    %c0_179 = arith.constant 0 : index
    %c0_180 = arith.constant 0 : index
    %364 = vector.load %arg12[%c0_179, %c0_180] : memref<8x128xf32, #tpu.memory_space<vmem>>, vector<8x128xf32>
    tpu.vector_store %arg12[%c0_179, %c0_180], %362 {strides = array<i32>} : memref<8x128xf32, #tpu.memory_space<vmem>>, vector<8x128xf32>,
    %365 = arith.extui %14 : i1 to i32
    %c0_i32_181 = arith.constant 0 : i32
    %366 = arith.cmpi ne, %365, %c0_i32_181 : i32
    scf.if %366 {
      %370 = arith.index_cast %326 : i32 to index
      %c0_185 = arith.constant 0 : index
      %371 = vector.load %arg11[%370, %c0_185] : memref<64x128xf32, #tpu.memory_space<vmem>>, vector<8x128xf32>
      tpu.vector_store %arg11[%370, %c0_185], %362 {strides = array<i32>} : memref<64x128xf32, #tpu.memory_space<vmem>>, vector<8x128xf32>,
    } else {
    }
    %c8_i32_182 = arith.constant 8 : i32
    %c1_i32_183 = arith.constant 1 : i32
    %367 = arith.cmpi eq, %arg1, %c1_i32_183 : i32
    %368 = arith.extui %367 : i1 to i32
    %c0_i32_184 = arith.constant 0 : i32
    %369 = arith.cmpi ne, %368, %c0_i32_184 : i32
    scf.if %369 {
      %c0_185 = arith.constant 0 : index
      %c0_186 = arith.constant 0 : index
      %370 = vector.load %arg12[%c0_185, %c0_186] : memref<8x128xf32, #tpu.memory_space<vmem>>, vector<8x128xf32>
      %c0_187 = arith.constant 0 : index
      %c0_188 = arith.constant 0 : index
      %371 = vector.load %arg7[%c0_187, %c0_188] : memref<128x1xf32, #tpu.memory_space<vmem>>, vector<128x1xf32>
      %cst_189 = arith.constant dense<0.000000e+00> : vector<8x1xf32>
      %372 = tpu.matmul %370, %371, %cst_189 {dimension_numbers = #tpu.dot_dimension_numbers<[1], [0], [0], [1], [0, 0, 1, 1], [], []>} : vector<8x128xf32>, vector<128x1xf32>, vector<8x1xf32> -> vector<8x1xf32>
      %c0_190 = arith.constant 0 : index
      %c0_191 = arith.constant 0 : index
      %373 = vector.load %arg8[%c0_190, %c0_191] : memref<1x1xf32, #tpu.memory_space<vmem>>, vector<1x1xf32>
      %374 = vector.broadcast %373 : vector<1x1xf32> to vector<8x1xf32>
      %375 = arith.addf %372, %374 : vector<8x1xf32>
      %cst_192 = arith.constant 5.000000e-01 : f32
      %376 = vector.broadcast %cst_192 : f32 to vector<8x1xf32>
      %377 = arith.mulf %376, %375 : vector<8x1xf32>
      %378 = math.tanh %377 : vector<8x1xf32>
      %cst_193 = arith.constant 5.000000e-01 : f32
      %379 = vector.broadcast %cst_193 : f32 to vector<8x1xf32>
      %380 = arith.mulf %379, %378 : vector<8x1xf32>
      %cst_194 = arith.constant 5.000000e-01 : f32
      %381 = vector.broadcast %cst_194 : f32 to vector<8x1xf32>
      %382 = arith.addf %380, %381 : vector<8x1xf32>
      %c0_195 = arith.constant 0 : index
      %c0_196 = arith.constant 0 : index
      %383 = vector.load %arg9[%c0_195, %c0_196] : memref<8x1xf32, #tpu.memory_space<vmem>>, vector<8x1xf32>
      tpu.vector_store %arg9[%c0_195, %c0_196], %382 {strides = array<i32>} : memref<8x1xf32, #tpu.memory_space<vmem>>, vector<8x1xf32>,
    } else {
    }
    return
  }
  func.func @transform_0(%arg0: i32, %arg1: i32) -> (i32, i32, i32) {
    %c0_i32 = arith.constant 0 : i32
    %c0_i32_0 = arith.constant 0 : i32
    %c0_i32_1 = arith.constant 0 : i32
    return %arg0, %c0_i32, %c0_i32_0 : i32, i32, i32
  }
  func.func @transform_1(%arg0: i32, %arg1: i32) -> (i32, i32) {
    %c0_i32 = arith.constant 0 : i32
    %c0_i32_0 = arith.constant 0 : i32
    %c0_i32_1 = arith.constant 0 : i32
    return %c0_i32, %c0_i32_0 : i32, i32
  }
  func.func @transform_2(%arg0: i32, %arg1: i32) -> (i32, i32, i32) {
    %c1_i32 = arith.constant 1 : i32
    %0 = arith.subi %arg1, %c1_i32 : i32
    %c0_i32 = arith.constant 0 : i32
    %1 = arith.maxsi %0, %c0_i32 : i32
    %c0_i32_0 = arith.constant 0 : i32
    %c0_i32_1 = arith.constant 0 : i32
    %c0_i32_2 = arith.constant 0 : i32
    return %1, %c0_i32_0, %c0_i32_1 : i32, i32, i32
  }
  func.func @transform_3(%arg0: i32, %arg1: i32) -> (i32, i32, i32) {
    %c0_i32 = arith.constant 0 : i32
    %c0_i32_0 = arith.constant 0 : i32
    %c0_i32_1 = arith.constant 0 : i32
    return %arg1, %c0_i32, %c0_i32_0 : i32, i32, i32
  }
  func.func @transform_4(%arg0: i32, %arg1: i32) -> (i32, i32, i32) {
    %c0_i32 = arith.constant 0 : i32
    %c0_i32_0 = arith.constant 0 : i32
    %c0_i32_1 = arith.constant 0 : i32
    return %arg1, %c0_i32, %c0_i32_0 : i32, i32, i32
  }
  func.func @transform_5(%arg0: i32, %arg1: i32) -> (i32, i32) {
    %c0_i32 = arith.constant 0 : i32
    %c0_i32_0 = arith.constant 0 : i32
    %c0_i32_1 = arith.constant 0 : i32
    return %c0_i32, %c0_i32_0 : i32, i32
  }
  func.func @transform_6(%arg0: i32, %arg1: i32) -> (i32, i32) {
    %c0_i32 = arith.constant 0 : i32
    %c0_i32_0 = arith.constant 0 : i32
    %c0_i32_1 = arith.constant 0 : i32
    return %c0_i32, %c0_i32_0 : i32, i32
  }
  func.func @transform_7(%arg0: i32, %arg1: i32) -> (i32, i32) {
    %c0_i32 = arith.constant 0 : i32
    %c0_i32_0 = arith.constant 0 : i32
    return %arg0, %c0_i32 : i32, i32
  }
}

</mosaic_0001>

<bundles_post_ra>
// kernel: tpu_custom_call.1
= control target key start
LH: loop header
LB: loop body
LE: loop exit
PB: predicated region body
PF: predicated region fallthrough
CT: control target
= control target key end

     0   :  { %s4263_s0 = inlined_call_operand.vmem [shape: bf16[1,64,128], index: 0, kind: input, shape index: {}]   ;;  %s4264_s1 = inlined_call_operand.hbm [shape: bf16[128,512], index: 1, kind: input, shape index: {}]   ;;  %s4265_s2 = inlined_call_operand.hbm [shape: bf16[1,128,512], index: 2, kind: input, shape index: {}]   ;;  %s4266_s3 = inlined_call_operand.hbm [shape: bf16[2,128,512], index: 3, kind: input, shape index: {}]   ;;  %s4267_s4 = inlined_call_operand.vmem [shape: f32[2,1,512], index: 4, kind: input, shape index: {}]   ;;  %s4268_s5 = inlined_call_operand.vmem [shape: f32[128,1], index: 5, kind: input, shape index: {}]   ;;  %s4269_s6 = inlined_call_operand.<no memory space> [shape: f32[1,1], index: 6, kind: input, shape index: {}]   ;;  %s4270_s7 = inlined_call_operand.vmem [shape: f32[8,1], index: 7, kind: output, shape index: {}]  }
   0x1   :  { %4283 = sst [smem:[#allocation15_spill]] %s4264_s1  ;;  %v12_v0 = vstv %s4269_s6 }
   0x2   :  { %4284 = sst [smem:[#allocation16_spill]] %s4265_s2  ;;  %13 = vst [vmem:[#allocation6] sm:$0x1] %v12_v0 }
   0x3   :  { %14 = vsyncpa [#allocation8], 0 }
   0x4   :  { %15 = vsyncpa [#allocation10], 0 }
   0x5   :  { %17 = vsyncpa [#allocation10 + $0x1], 0  ;;  %s3420_s26 = smov 0   ;;  %s3422_s27 = smov 0  }
   0x6   :  { %s3424_s28 = smov 0   ;;  %s3426_s29 = smov 0  }
   0x7   :  { %s3428_s30 = smov 0   ;;  %s3430_s8 = smov 0  }
   0x8   :  { %s3432_s9 = smov 0   ;;  %s3434_s10 = smov 0  }
   0x9 LB: > { %s32_s6 = sadd.s32 1, %s3359_s9  ;;  %p3332_p1 = scmp.ne.s32.totalorder %s3351_s30, 0  ;;  %s3363_s10 = sphi %s3434_s10, %s23_s10   ;;  %s3359_s9 = sphi %s3432_s9, %s4311_s9   ;;  %s3355_s8 = sphi %s3430_s8, %s4310_s8   ;;  %s3351_s30 = sphi %s3428_s30, %s4253_s30   ;;  %s3347_s29 = sphi %s3426_s29, %s4309_s29   ;;  %s3343_s28 = sphi %s3424_s28, %s4308_s28   ;;  %s3339_s27 = sphi %s3422_s27, %s4307_s27   ;;  %s3335_s26 = sphi %s3420_s26, %s4306_s26  }
   0xa   : > { %p33_p0 = scmp.ge.s32.totalorder %s32_s6, 2  ;;  %p4272_p2 = scmp.eq.s32.totalorder %s3363_s10, 0 }
   0xb   : > { %p4271_p5 = scmp.lt.s32.totalorder %s3363_s10, 2  ;;  %s279_s13 = sand.u32 1, %s3363_s10  }
   0xc   : > { %s4313_s6 = smov (%p33_p0, %s32_s6), 0  ;;  %p104_p3 = por %p3332_p1, %p4272_p2 }
   0xd   : > { %s118_s11 = ssub.s32 %s3359_s9, %s4313_s6  ;;  %s3365_s14 = smov [#allocation9]  }
   0xe   : > { %p3469_p4 = scmp.eq.s32.totalorder %s118_s11, 0  ;;  %s293_s15 = sshll.u32 %s3365_s14, 4  ;;  %s3475_s15 = int_to_ptr.vmem [resolvable:$true] %s293_s15 }
   0xf   : > { %p3479_p6 = pnand %p4271_p5, %p104_p3  ;;  %s3483_s17 = scalar_lea.sflag [#allocation10], %s279_s13 }
  0x10   : > { %s4285_s12 = scalar_select %p3469_p4, 1, 0 }
  0x11   : > { %s4287_s2 = sld [smem:[#allocation16_spill]]  ;;  %p3198_p8 = pneg %p3479_p6 }
  0x17   : > { %s3196_s20 = scalar_lea.hbm %s4287_s2, 4096 }
  0x18   : > { %p3197_p7 = scmp.ne.s32.totalorder %s4287_s2, %s3196_s20  ;;  %p3203_p11 = scmp.lt.u32.totalorder %s3196_s20, %s3196_s20 }
  0x19   : > { %p3205_p12 = scmp.lt.u32.totalorder %s3196_s20, %s4287_s2 }
  0x1a   : > { %p3199_p9 = pnand %p3198_p8, %p3197_p7 }
  0x1b   : > { %p3206_p13 = por %p3205_p12, %p3203_p11 }
  0x1c   : > { %p3200_p10 = pneg %p3199_p9 }
  0x1e   : > { %p3207_p0 = pnand %p3206_p13, %p3200_p10 }
  0x20   : > { %3210 = shalt.err (!%p3207_p0)
}
  0x21   : > { %s3211_s25 = scalar_lea.vmem %s3475_s15, 4096  ;;  %s3218_s11 = scalar_lea.vmem %s3475_s15, 8192 }
  0x22   : > { %p3212_p1 = scmp.ne.s32.totalorder %s3475_s15, %s3211_s25  ;;  %p3219_p7 = scmp.lt.s32.totalorder %s3475_s15, %s3475_s15 }
  0x23   : > { %p3220_p9 = scmp.lt.s32.totalorder %s3218_s11, %s3211_s25 }
  0x24   : > { %p3214_p3 = pnand %p3212_p1, %p3198_p8 }
  0x25   : > { %p3221_p2 = por %p3220_p9, %p3219_p7 }
  0x26   : > { %p3215_p5 = pneg %p3214_p3 }
  0x28   : > { %p3222_p4 = pnand %p3221_p2, %p3215_p5 }
  0x2a   : > { %3225 = shalt.err (!%p3222_p4)
}
  0x2b   : > { %s4274_s13 = smov 256   ;;  %s4276_s14 = smov 16  }
  0x2c   : > { %2877 = dma.hbm_to_vmem [thread:$0]  (!%p3479_p6), %s4287_s2, 4096, %s3475_s15, %s3483_s17, %s4274_s13, %s4274_s13, %s4276_s14  }
  0x2d   : > { %s4273_s20 = sadd.s32 4294967295, %s3363_s10   ;;  %p108_p2 = scmp.ne.s32.totalorder %s3351_s30, %s3347_s29 }
  0x2e   : > { %p3516_p4 = scmp.eq.s32.totalorder %s4273_s20, 0  ;;  %p134_p5 = scmp.ne.s32.totalorder %s3339_s27, %s3335_s26 }
  0x2f   : > { %p2653_p8 = scmp.ge.s32.totalorder %s3363_s10, 1  ;;  %p239_p6 = scmp.lt.s32.totalorder %s3363_s10, 3 }
  0x30   : > { %s4288_s21 = scalar_select %p3516_p4, 1, 0 }
  0x31   : > { %p3525_p10 = por %p3516_p4, %p108_p2  ;;  %p3532_p11 = por %p134_p5, %p3516_p4 }
  0x32   : > { %p3536_p12 = pnand %p2653_p8, %p239_p6  ;;  %s3368_s22 = smov [#allocation7]  }
  0x33   : > { %s4289_s15 = scalar_select %p3525_p10, 1, 0 }
  0x34   : > { %s4290_s29 = scalar_select %p3532_p11, 1, 0 }
  0x35   : > { %s4291_s16 = scalar_select %p3536_p12, 1, 0 }
  0x36   : > { %s259_s23 = sshll.u32 %s3368_s22, 4  ;;  %p2870_p13 = pneg %p3536_p12  ;;  %s260_s23 = int_to_ptr.vmem [resolvable:$true] %s259_s23 }
  0x37   : > { %s2785_s26 = sshll.u32 %s3359_s9, 12  ;;  %s121_s25 = sadd.s32 1, %s3343_s28 }
  0x38   : > { %p3545_p0 = pnand %p2870_p13, %p3516_p4  ;;  %p4293_p1 = scmp.ne.s32.totalorder %s4285_s12, 0 }
  0x39   : > { %s4294_s1 = sld [smem:[#allocation15_spill]] }
  0x3a   : > { %s3553_s11 = scalar_select %p4293_p1, %s3343_s28, %s121_s25  }
  0x3b   : > { %p3228_p9 = pneg %p3545_p0 }
  0x3f   : > { %s3226_s20 = scalar_lea.hbm %s4294_s1, 4096 }
  0x40   : > { %p3227_p7 = scmp.ne.s32.totalorder %s4294_s1, %s3226_s20  ;;  %p3233_p8 = scmp.lt.u32.totalorder %s3226_s20, %s4294_s1 }
  0x42   : > { %p3229_p2 = pnand %p3228_p9, %p3227_p7 }
  0x44   : > { %p3230_p5 = pneg %p3229_p2 }
  0x46   : > { %p3235_p6 = pnand %p3233_p8, %p3230_p5 }
  0x48   : > { %3238 = shalt.err (!%p3235_p6)
}
  0x49   : > { %s3239_s12 = scalar_lea.vmem %s260_s23, 4096  ;;  %p3247_p11 = scmp.lt.s32.totalorder %s260_s23, %s260_s23 }
  0x4a   : > { %p3240_p13 = scmp.ne.s32.totalorder %s260_s23, %s3239_s12  ;;  %p3248_p10 = scmp.lt.s32.totalorder %s3239_s12, %s3239_s12 }
  0x4c   : > { %p3242_p1 = pnand %p3240_p13, %p3228_p9  ;;  %p3249_p4 = por %p3248_p10, %p3247_p11 }
  0x4e   : > { %p3243_p3 = pneg %p3242_p1 }
  0x50   : > { %p3250_p12 = pnand %p3249_p4, %p3243_p3 }
  0x52   : > { %3253 = shalt.err (!%p3250_p12)
}
  0x53   : > { %s4295_s13 = smov 16   ;;  %s4296_s25 = smov 256  }
  0x54   : > { %2873 = dma.hbm_to_vmem [thread:$0]  (!%p3545_p0), %s4294_s1, 4096, %s260_s23, [#allocation8], %s4296_s25, %s4296_s25, %s4295_s13  }
  0x55   : > { %p4297_p7 = scmp.eq.s32.totalorder %s3363_s10, 0  ;;  %p4298_p9 = scmp.ne.s32.totalorder %s3343_s28, %s3339_s27 }
  0x56   : > { %s305_s2 = sand.u32 1, %s3343_s28   ;;  %s3585_s24 = scalar_lea.hbm %s4266_s3, %s2785_s26 }
  0x57   : > { %p130_p2 = por %p4298_p9, %p4297_p7  ;;  %s2661_s14 = sshll.u32 %s305_s2, 8 }
  0x58   : > { %p4299_p4 = scmp.lt.s32.totalorder %s3363_s10, 2  ;;  %s307_s23 = scalar_lea.vmem [#allocation11], %s2661_s14 }
  0x59   : > { %s314_s18 = sshll.u32 %s307_s23, 4  ;;  %s3254_s19 = scalar_lea.hbm %s3585_s24, 4096  ;;  %s3593_s18 = int_to_ptr.vmem [resolvable:$true] %s314_s18 }
  0x5a   : > { %p3589_p10 = pnand %p4299_p4, %p130_p2  ;;  %p3255_p11 = scmp.ne.s32.totalorder %s3585_s24, %s3254_s19 }
  0x5b   : > { %s3259_s20 = scalar_lea.hbm %s4266_s3, 8192  ;;  %p3260_p5 = scmp.lt.u32.totalorder %s3585_s24, %s4266_s3 }
  0x5c   : > { %p3256_p12 = pneg %p3589_p10  ;;  %p3261_p8 = scmp.lt.u32.totalorder %s3259_s20, %s3254_s19 }
  0x5d   : > { %p3263_p13 = scmp.lt.u32.totalorder %s3254_s19, %s3585_s24 }
  0x5e   : > { %p3257_p0 = pnand %p3256_p12, %p3255_p11  ;;  %p3262_p6 = por %p3261_p8, %p3260_p5 }
  0x60   : > { %p3258_p3 = pneg %p3257_p0  ;;  %p3264_p1 = por %p3263_p13, %p3262_p6 }
  0x62   : > { %p3265_p7 = pnand %p3264_p1, %p3258_p3 }
  0x64   : > { %3268 = shalt.err (!%p3265_p7)
}
  0x65   : > { %s3269_s14 = scalar_lea.vmem %s3593_s18, 4096  ;;  %s3369_s23 = smov [#allocation11]  }
  0x66   : > { %p3270_p9 = scmp.ne.s32.totalorder %s3593_s18, %s3269_s14  ;;  %s3274_s26 = sshll.u32 %s3369_s23, 4  ;;  %s3275_s26 = int_to_ptr.vmem [resolvable:$false] %s3274_s26 }
  0x67   : > { %s3276_s1 = scalar_lea.vmem %s3275_s26, 8192  ;;  %p3277_p11 = scmp.lt.s32.totalorder %s3593_s18, %s3275_s26 }
  0x68   : > { %p3272_p2 = pnand %p3270_p9, %p3256_p12  ;;  %p3278_p0 = scmp.lt.s32.totalorder %s3276_s1, %s3269_s14 }
  0x6a   : > { %p3273_p4 = pneg %p3272_p2  ;;  %p3279_p5 = por %p3278_p0, %p3277_p11 }
  0x6c   : > { %p3280_p8 = pnand %p3279_p5, %p3273_p4 }
  0x6e   : > { %3283 = shalt.err (!%p3280_p8)
}
  0x6f   : > { %2880 = dma.hbm_to_vmem [thread:$0]  (!%p3589_p10), %s3585_s24, 4096, %s3593_s18, %s3483_s17, %s4296_s25, %s4296_s25, %s4295_s13  }
  0x70   : > { %p4301_p12 = scmp.ne.s32.totalorder %s4291_s16, 0 }
  0x71   : > { %p4302_p3 = scmp.ne.s32.totalorder (!%p4301_p12), %s4288_s21, 0 }
  0x72   : > { %333 = sbr.rel (%p4301_p12) target bundleno = 3212 (0xc8c), region = 48 }
  0x79   : > { %3321 = dma.done.wait (%p4302_p3), [#allocation8], 4096  }
  0x7a   : > { %3323 = vsyncadd (%p4302_p3), [#allocation8], 4294963200  ;;  %s4303_s19 = sadd.s32 4294967295, %s3363_s10   ;;  %s341_s2 = sand.u32 1, %s3351_s30  }
  0x7b   : > { %s339_s12 = sand.u32 1, %s4303_s19   ;;  %s2666_s20 = sshll.u32 %s341_s2, 8 }
  0x7c   : > { %s340_s22 = scalar_lea.sflag [#allocation10], %s339_s12  ;;  %s3633_s14 = scalar_lea.vmem [#allocation9], %s2666_s20 }
  0x7d   : > { %p4304_p10 = scmp.ne.s32.totalorder %s4289_s15, 0 }
  0x7f   : > { %3325 = dma.done.wait (%p4304_p10), %s340_s22, 4096  }
  0x80   : > { %3327 = vsyncadd (%p4304_p10), %s340_s22, 4294963200  ;;  %s350_s17 = sand.u32 1, %s3339_s27   ;;  %p4305_p6 = scmp.ne.s32.totalorder %s4290_s29, 0 }
  0x81   : > { %s2667_s21 = sshll.u32 %s350_s17, 8 }
  0x82   : > { %s3640_s16 = scalar_lea.vmem [#allocation11], %s2667_s21 }
  0x83   : > { %3329 = dma.done.wait (%p4305_p6), %s340_s22, 4096  }
  0x84   : > { %3331 = vsyncadd (%p4305_p6), %s340_s22, 4294963200  ;;  %p404_p13 = scmp.lt.s32.totalorder %s3355_s8, 1  ;;  %p2669_p1 = scmp.ne.s32.totalorder %s3355_s8, 0 }
  0x85   : > { %v2966_v2 = vld [vmem:[#allocation7 + $0x4] ss:$16 sps:$4 sm:$0xff] (!%p2669_p1)   ;;  %v2968_v3 = vld [vmem:[#allocation7 + $0xc] ss:$16 sps:$4 sm:$0xff] (!%p2669_p1)   ;;  %v3370_v4 = vmov (!%p2669_p1), 0   ;;  %v459_v39 = vlaneseq (!%p2669_p1) }
  0x86   : > { %s405_s13 = scalar_select %p404_p13, %s3355_s8, 1 }
  0x87   : > { %417 = sbr.rel (%p2669_p1) target bundleno = 410 (0x19a), region = 64  ;;  %695 = vmatprep.mubr.bf16.mxu0 (!%p2669_p1), %v3370_v4  ;;  %768 = vmatprep.mubr.bf16.mxu1 (!%p2669_p1), %v3370_v4  ;;  %v2970_v5 = vld [vmem:[#allocation7] ss:$16 sps:$4 sm:$0xff] (!%p2669_p1)   ;;  %v2971_v6 = vld [vmem:[#allocation7 + $0x8] ss:$16 sps:$4 sm:$0xff] (!%p2669_p1)   ;;  %v460_v40 = vshrl.u32 (!%p2669_p1), %v459_v39, 7 }
  0x88   : > { %s2668_s25 = sshll.u32 %s405_s13, 2  ;;  %663 = vmatprep.subr.bf16.mxu0 (!%p2669_p1), %v2966_v2  ;;  %736 = vmatprep.subr.bf16.mxu1 (!%p2669_p1), %v2968_v3  ;;  %v2972_v7 = vld [vmem:[#allocation7 + $0x24] ss:$16 sps:$4 sm:$0xff] (!%p2669_p1)   ;;  %v2974_v8 = vld [vmem:[#allocation7 + $0x2c] ss:$16 sps:$4 sm:$0xff] (!%p2669_p1)  }
  0x89   : > { %s407_s15 = scalar_lea.vmem %s4267_s4, %s2668_s25  ;;  %664 = vmatpush1.bf16.msra.mxu0 (!%p2669_p1), %v2970_v5  ;;  %737 = vmatpush1.bf16.msra.mxu1 (!%p2669_p1), %v2971_v6  ;;  %v2976_v9 = vld [vmem:[#allocation7 + $0x20] ss:$16 sps:$4 sm:$0xff] (!%p2669_p1)   ;;  %v2977_v10 = vld [vmem:[#allocation7 + $0x28] ss:$16 sps:$4 sm:$0xff] (!%p2669_p1)   ;;  %v2978_v11 = vld [vmem:[#allocation7 + $0x44] ss:$16 sps:$4 sm:$0xff] (!%p2669_p1)  }
  0x8a   : > { %v3651_v1 = vld [vmem:[%s407_s15] sm:$0xf]  ;;  %665 = vmatprep.subr.bf16.mxu0 (!%p2669_p1), %v2972_v7  ;;  %738 = vmatprep.subr.bf16.mxu1 (!%p2669_p1), %v2974_v8  ;;  %v2983_v14 = vld [vmem:[#allocation7 + $0x48] ss:$16 sps:$4 sm:$0xff] (!%p2669_p1)   ;;  %v2984_v15 = vld [vmem:[#allocation7 + $0x64] ss:$16 sps:$4 sm:$0xff] (!%p2669_p1)  }
  0x8b   : > { %v2980_v12 = vld [vmem:[#allocation7 + $0x4c] ss:$16 sps:$4 sm:$0xff] (!%p2669_p1)   ;;  %v2982_v13 = vld [vmem:[#allocation7 + $0x40] ss:$16 sps:$4 sm:$0xff] (!%p2669_p1)   ;;  %v2989_v18 = vld [vmem:[#allocation7 + $0x68] ss:$16 sps:$4 sm:$0xff] (!%p2669_p1)  }
  0x8c   : > { %v2986_v16 = vld [vmem:[#allocation7 + $0x6c] ss:$16 sps:$4 sm:$0xff] (!%p2669_p1)   ;;  %v2988_v17 = vld [vmem:[#allocation7 + $0x60] ss:$16 sps:$4 sm:$0xff] (!%p2669_p1)   ;;  %v2990_v19 = vld [vmem:[#allocation7 + $0x84] ss:$16 sps:$4 sm:$0xff] (!%p2669_p1)  }
  0x8d   : > { %666 = vmatpush1.bf16.msra.mxu0 (!%p2669_p1), %v2976_v9  ;;  %739 = vmatpush1.bf16.msra.mxu1 (!%p2669_p1), %v2977_v10  ;;  %v2992_v20 = vld [vmem:[#allocation7 + $0x8c] ss:$16 sps:$4 sm:$0xff] (!%p2669_p1)   ;;  %v2994_v21 = vld [vmem:[#allocation7 + $0x80] ss:$16 sps:$4 sm:$0xff] (!%p2669_p1)   ;;  %v2995_v22 = vld [vmem:[#allocation7 + $0x88] ss:$16 sps:$4 sm:$0xff] (!%p2669_p1)  }
  0x8e   : > { %667 = vmatprep.subr.bf16.mxu0 %v2978_v11  ;;  %740 = vmatprep.subr.bf16.mxu1 %v2980_v12  ;;  %v2996_v23 = vld [vmem:[#allocation7 + $0xa4] ss:$16 sps:$4 sm:$0xff]   ;;  %v2998_v24 = vld [vmem:[#allocation7 + $0xac] ss:$16 sps:$4 sm:$0xff]   ;;  %v3000_v25 = vld [vmem:[#allocation7 + $0xa0] ss:$16 sps:$4 sm:$0xff]  }
  0x8f   : > { %v3001_v26 = vld [vmem:[#allocation7 + $0xa8] ss:$16 sps:$4 sm:$0xff]   ;;  %v3002_v27 = vld [vmem:[#allocation7 + $0xc4] ss:$16 sps:$4 sm:$0xff]   ;;  %v3004_v28 = vld [vmem:[#allocation7 + $0xcc] ss:$16 sps:$4 sm:$0xff]  }
  0x90   : > { %v3006_v29 = vld [vmem:[#allocation7 + $0xc0] ss:$16 sps:$4 sm:$0xff]   ;;  %v3007_v30 = vld [vmem:[#allocation7 + $0xc8] ss:$16 sps:$4 sm:$0xff]   ;;  %v3008_v31 = vld [vmem:[#allocation7 + $0xe4] ss:$16 sps:$4 sm:$0xff]  }
  0x91   : > { %668 = vmatpush1.bf16.msra.mxu0 %v2982_v13  ;;  %741 = vmatpush1.bf16.msra.mxu1 %v2983_v14  ;;  %v3010_v32 = vld [vmem:[#allocation7 + $0xec] ss:$16 sps:$4 sm:$0xff]   ;;  %v3012_v33 = vld [vmem:[#allocation7 + $0xe0] ss:$16 sps:$4 sm:$0xff]   ;;  %v3013_v34 = vld [vmem:[#allocation7 + $0xe8] ss:$16 sps:$4 sm:$0xff]  }
  0x92   : > { %669 = vmatprep.subr.bf16.mxu0 %v2984_v15  ;;  %742 = vmatprep.subr.bf16.mxu1 %v2986_v16  ;;  %v3014_v35 = vld [vmem:[%s4263_s0] sm:$0xff]   ;;  %v3015_v36 = vld [vmem:[%s4263_s0 + $0x8] sm:$0xff]   ;;  %v3016_v37 = vld [vmem:[%s4263_s0 + $0x10] sm:$0xff]   ;;  %v461_v41 = vsub.s32 0, %v460_v40  ;;  %v469_v42 = vsub.s32 2, %v460_v40  ;;  %v465_v43 = vsub.s32 1, %v460_v40 }
  0x93   : > { %v3017_v38 = vld [vmem:[%s4263_s0 + $0x18] sm:$0xff]   ;;  %v473_v44 = vsub.s32 3, %v460_v40 }
  0x94   : > { %v3675_v45 = vrot.slane %v3651_v1, %v461_v41  ;;  %v3678_v46 = vrot.slane %v3651_v1, %v469_v42  ;;  %v3681_v47 = vrot.slane %v3651_v1, %v465_v43 }
  0x95   : > { %670 = vmatpush1.bf16.msra.mxu0 %v2988_v17  ;;  %743 = vmatpush1.bf16.msra.mxu1 %v2989_v18  ;;  %v3684_v48 = vrot.slane %v3651_v1, %v473_v44 }
  0x96   : > { %671 = vmatprep.subr.bf16.mxu0 %v2990_v19  ;;  %744 = vmatprep.subr.bf16.mxu1 %v2992_v20 }
  0x99   : > { %672 = vmatpush1.bf16.msra.mxu0 %v2994_v21  ;;  %745 = vmatpush1.bf16.msra.mxu1 %v2995_v22 }
  0x9a   : > { %673 = vmatprep.subr.bf16.mxu0 %v2996_v23  ;;  %746 = vmatprep.subr.bf16.mxu1 %v2998_v24 }
  0x9d   : > { %674 = vmatpush1.bf16.msra.mxu0 %v3000_v25  ;;  %747 = vmatpush1.bf16.msra.mxu1 %v3001_v26 }
  0x9e   : > { %675 = vmatprep.subr.bf16.mxu0 %v3002_v27  ;;  %748 = vmatprep.subr.bf16.mxu1 %v3004_v28 }
  0xa1   : > { %676 = vmatpush1.bf16.msra.mxu0 %v3006_v29  ;;  %749 = vmatpush1.bf16.msra.mxu1 %v3007_v30 }
  0xa2   : > { %677 = vmatprep.subr.bf16.mxu0 %v3008_v31  ;;  %750 = vmatprep.subr.bf16.mxu1 %v3010_v32 }
  0xa5   : > { %678 = vmatpush1.bf16.msra.mxu0 %v3012_v33  ;;  %751 = vmatpush1.bf16.msra.mxu1 %v3013_v34 }
  0xa8   : > { %696 = vmatmul.mubr.bf16.vlgmr.msra.gmra.mrb[0].mxu0 %v3014_v35  ;;  %769 = vmatmul.mubr.bf16.vlgmr.msra.gmra.mrb[0].mxu1 %v3014_v35 }
  0xa9   : > { %705 = vmatprep.mubr.bf16.mxu0 %v3370_v4  ;;  %778 = vmatprep.mubr.bf16.mxu1 %v3370_v4 }
  0xb0   : > { %706 = vmatmul.mubr.bf16.gmra.mrb[4].mxu0 %v3015_v36  ;;  %779 = vmatmul.mubr.bf16.gmra.mrb[4].mxu1 %v3015_v36 }
  0xb1   : > { %715 = vmatprep.mubr.bf16.mxu0 %v3370_v4  ;;  %788 = vmatprep.mubr.bf16.mxu1 %v3370_v4 }
  0xb8   : > { %716 = vmatmul.mubr.bf16.gmra.mrb[8].mxu0 %v3016_v37  ;;  %789 = vmatmul.mubr.bf16.gmra.mrb[8].mxu1 %v3016_v37 }
  0xb9   : > { %725 = vmatprep.mubr.bf16.mxu0 %v3370_v4  ;;  %798 = vmatprep.mubr.bf16.mxu1 %v3370_v4 }
  0xc0   : > { %726 = vmatmul.mubr.bf16.gmra.mrb[12].mxu0 %v3017_v38  ;;  %799 = vmatmul.mubr.bf16.gmra.mrb[12].mxu1 %v3017_v38 }
 0x17b   : > { %v697_v49 = vpop.f32.mrb[0].mxu0  ;;  %v770_v50 = vpop.f32.mrb[0].mxu1 }
 0x17c   : > { %v698_v51 = vadd.f32 %v697_v49, %v3675_v45  ;;  %v771_v52 = vadd.f32 %v770_v50, %v3678_v46  ;;  %v699_v53 = vpop.f32.mrb[1].mxu0  ;;  %v772_v54 = vpop.f32.mrb[1].mxu1 }
 0x17d   : > { %v700_v55 = vadd.f32 %v699_v53, %v3681_v47  ;;  %v773_v56 = vadd.f32 %v772_v54, %v3684_v48  ;;  %v701_v57 = vpop.f32.mrb[2].mxu0  ;;  %v774_v58 = vpop.f32.mrb[2].mxu1 }
 0x17e   : > { %809 = vst [vmem:[#allocation2] sm:$0xff] %v698_v51  ;;  %811 = vst [vmem:[#allocation2 + $0x10] sm:$0xff] %v771_v52  ;;  %v702_v59 = vadd.f32 %v701_v57, %v3675_v45  ;;  %v775_v60 = vadd.f32 %v774_v58, %v3678_v46  ;;  %v703_v61 = vpop.f32.mrb[3].mxu0  ;;  %v776_v62 = vpop.f32.mrb[3].mxu1 }
 0x17f   : > { %810 = vst [vmem:[#allocation2 + $0x8] sm:$0xff] %v700_v55  ;;  %812 = vst [vmem:[#allocation2 + $0x18] sm:$0xff] %v773_v56  ;;  %v704_v63 = vadd.f32 %v703_v61, %v3681_v47  ;;  %v777_v0 = vadd.f32 %v776_v62, %v3684_v48 }
 0x180   : > { %813 = vst [vmem:[#allocation2 + $0x20] sm:$0xff] %v702_v59  ;;  %815 = vst [vmem:[#allocation2 + $0x30] sm:$0xff] %v775_v60 }
 0x181   : > { %814 = vst [vmem:[#allocation2 + $0x28] sm:$0xff] %v704_v63  ;;  %816 = vst [vmem:[#allocation2 + $0x38] sm:$0xff] %v777_v0 }
 0x183   : > { %v707_v2 = vpop.f32.mrb[4].mxu0  ;;  %v780_v3 = vpop.f32.mrb[4].mxu1 }
 0x184   : > { %v708_v4 = vadd.f32 %v707_v2, %v3675_v45  ;;  %v781_v5 = vadd.f32 %v780_v3, %v3678_v46  ;;  %v709_v6 = vpop.f32.mrb[5].mxu0  ;;  %v782_v7 = vpop.f32.mrb[5].mxu1 }
 0x185   : > { %v710_v8 = vadd.f32 %v709_v6, %v3681_v47  ;;  %v783_v9 = vadd.f32 %v782_v7, %v3684_v48  ;;  %v711_v10 = vpop.f32.mrb[6].mxu0  ;;  %v784_v11 = vpop.f32.mrb[6].mxu1 }
 0x186   : > { %817 = vst [vmem:[#allocation2 + $0x40] sm:$0xff] %v708_v4  ;;  %819 = vst [vmem:[#allocation2 + $0x50] sm:$0xff] %v781_v5  ;;  %v712_v12 = vadd.f32 %v711_v10, %v3675_v45  ;;  %v785_v13 = vadd.f32 %v784_v11, %v3678_v46  ;;  %v713_v14 = vpop.f32.mrb[7].mxu0  ;;  %v786_v15 = vpop.f32.mrb[7].mxu1 }
 0x187   : > { %818 = vst [vmem:[#allocation2 + $0x48] sm:$0xff] %v710_v8  ;;  %820 = vst [vmem:[#allocation2 + $0x58] sm:$0xff] %v783_v9  ;;  %v714_v16 = vadd.f32 %v713_v14, %v3681_v47  ;;  %v787_v17 = vadd.f32 %v786_v15, %v3684_v48 }
 0x188   : > { %821 = vst [vmem:[#allocation2 + $0x60] sm:$0xff] %v712_v12  ;;  %823 = vst [vmem:[#allocation2 + $0x70] sm:$0xff] %v785_v13 }
 0x189   : > { %822 = vst [vmem:[#allocation2 + $0x68] sm:$0xff] %v714_v16  ;;  %824 = vst [vmem:[#allocation2 + $0x78] sm:$0xff] %v787_v17 }
 0x18b   : > { %v717_v18 = vpop.f32.mrb[8].mxu0  ;;  %v790_v19 = vpop.f32.mrb[8].mxu1 }
 0x18c   : > { %v718_v20 = vadd.f32 %v717_v18, %v3675_v45  ;;  %v791_v21 = vadd.f32 %v790_v19, %v3678_v46  ;;  %v719_v22 = vpop.f32.mrb[9].mxu0  ;;  %v792_v23 = vpop.f32.mrb[9].mxu1 }
 0x18d   : > { %v720_v24 = vadd.f32 %v719_v22, %v3681_v47  ;;  %v793_v25 = vadd.f32 %v792_v23, %v3684_v48  ;;  %v721_v26 = vpop.f32.mrb[10].mxu0  ;;  %v794_v27 = vpop.f32.mrb[10].mxu1 }
 0x18e   : > { %825 = vst [vmem:[#allocation2 + $0x80] sm:$0xff] %v718_v20  ;;  %827 = vst [vmem:[#allocation2 + $0x90] sm:$0xff] %v791_v21  ;;  %v722_v28 = vadd.f32 %v721_v26, %v3675_v45  ;;  %v795_v29 = vadd.f32 %v794_v27, %v3678_v46  ;;  %v723_v30 = vpop.f32.mrb[11].mxu0  ;;  %v796_v31 = vpop.f32.mrb[11].mxu1 }
 0x18f   : > { %826 = vst [vmem:[#allocation2 + $0x88] sm:$0xff] %v720_v24  ;;  %828 = vst [vmem:[#allocation2 + $0x98] sm:$0xff] %v793_v25  ;;  %v724_v32 = vadd.f32 %v723_v30, %v3681_v47  ;;  %v797_v33 = vadd.f32 %v796_v31, %v3684_v48 }
 0x190   : > { %829 = vst [vmem:[#allocation2 + $0xa0] sm:$0xff] %v722_v28  ;;  %831 = vst [vmem:[#allocation2 + $0xb0] sm:$0xff] %v795_v29 }
 0x191   : > { %830 = vst [vmem:[#allocation2 + $0xa8] sm:$0xff] %v724_v32  ;;  %832 = vst [vmem:[#allocation2 + $0xb8] sm:$0xff] %v797_v33 }
 0x193   : > { %v727_v34 = vpop.f32.mrb[12].mxu0  ;;  %v800_v35 = vpop.f32.mrb[12].mxu1 }
 0x194   : > { %v728_v36 = vadd.f32 %v727_v34, %v3675_v45  ;;  %v801_v37 = vadd.f32 %v800_v35, %v3678_v46  ;;  %v729_v38 = vpop.f32.mrb[13].mxu0  ;;  %v802_v39 = vpop.f32.mrb[13].mxu1 }
 0x195   : > { %v730_v40 = vadd.f32 %v729_v38, %v3681_v47  ;;  %v803_v41 = vadd.f32 %v802_v39, %v3684_v48  ;;  %v731_v42 = vpop.f32.mrb[14].mxu0  ;;  %v804_v43 = vpop.f32.mrb[14].mxu1 }
 0x196   : > { %833 = vst [vmem:[#allocation2 + $0xc0] sm:$0xff] %v728_v36  ;;  %835 = vst [vmem:[#allocation2 + $0xd0] sm:$0xff] %v801_v37  ;;  %v732_v44 = vadd.f32 %v731_v42, %v3675_v45  ;;  %v805_v49 = vadd.f32 %v804_v43, %v3678_v46  ;;  %v733_v50 = vpop.f32.mrb[15].mxu0  ;;  %v806_v51 = vpop.f32.mrb[15].mxu1 }
 0x197   : > { %834 = vst [vmem:[#allocation2 + $0xc8] sm:$0xff] %v730_v40  ;;  %836 = vst [vmem:[#allocation2 + $0xd8] sm:$0xff] %v803_v41  ;;  %v734_v52 = vadd.f32 %v733_v50, %v3681_v47  ;;  %v807_v53 = vadd.f32 %v806_v51, %v3684_v48 }
 0x198   : > { %837 = vst [vmem:[#allocation2 + $0xe0] sm:$0xff] %v732_v44  ;;  %839 = vst [vmem:[#allocation2 + $0xf0] sm:$0xff] %v805_v49 }
 0x199   : > { %838 = vst [vmem:[#allocation2 + $0xe8] sm:$0xff] %v734_v52  ;;  %840 = vst [vmem:[#allocation2 + $0xf8] sm:$0xff] %v807_v53 }
 0x19a PF: > { %p2706_p7 = scmp.le.s32.totalorder %s3355_s8, 0 }
 0x19b   : > { %v3018_v45 = vld [vmem:[%s3633_s14 + $0x4] ss:$16 sps:$4 sm:$0xff] (!%p2706_p7)   ;;  %v3020_v46 = vld [vmem:[%s3633_s14 + $0xc] ss:$16 sps:$4 sm:$0xff] (!%p2706_p7)   ;;  %v3371_v47 = vmov (!%p2706_p7), 0   ;;  %v890_v32 = vlaneseq (!%p2706_p7) }
 0x19c   : > { %844 = sbr.rel (%p2706_p7) target bundleno = 687 (0x2af), region = 68  ;;  %1102 = vmatprep.mubr.bf16.mxu0 (!%p2706_p7), %v3371_v47  ;;  %1175 = vmatprep.mubr.bf16.mxu1 (!%p2706_p7), %v3371_v47  ;;  %v3022_v48 = vld [vmem:[%s3633_s14] ss:$16 sps:$4 sm:$0xff] (!%p2706_p7)   ;;  %v3023_v54 = vld [vmem:[%s3633_s14 + $0x8] ss:$16 sps:$4 sm:$0xff] (!%p2706_p7)  }
 0x19d   : > { %1070 = vmatprep.subr.bf16.mxu0 (!%p2706_p7), %v3018_v45  ;;  %1143 = vmatprep.subr.bf16.mxu1 (!%p2706_p7), %v3020_v46  ;;  %v3024_v55 = vld [vmem:[%s3633_s14 + $0x24] ss:$16 sps:$4 sm:$0xff] (!%p2706_p7)   ;;  %v3026_v56 = vld [vmem:[%s3633_s14 + $0x2c] ss:$16 sps:$4 sm:$0xff] (!%p2706_p7)   ;;  %v3028_v57 = vld [vmem:[%s3633_s14 + $0x20] ss:$16 sps:$4 sm:$0xff] (!%p2706_p7)  }
 0x19e   : > { %1071 = vmatpush1.bf16.msra.mxu0 (!%p2706_p7), %v3022_v48  ;;  %1144 = vmatpush1.bf16.msra.mxu1 (!%p2706_p7), %v3023_v54  ;;  %v3029_v58 = vld [vmem:[%s3633_s14 + $0x28] ss:$16 sps:$4 sm:$0xff] (!%p2706_p7)   ;;  %v3030_v59 = vld [vmem:[%s3633_s14 + $0x44] ss:$16 sps:$4 sm:$0xff] (!%p2706_p7)   ;;  %v3032_v60 = vld [vmem:[%s3633_s14 + $0x4c] ss:$16 sps:$4 sm:$0xff] (!%p2706_p7)  }
 0x19f   : > { %1072 = vmatprep.subr.bf16.mxu0 (!%p2706_p7), %v3024_v55  ;;  %1145 = vmatprep.subr.bf16.mxu1 (!%p2706_p7), %v3026_v56  ;;  %v3034_v61 = vld [vmem:[%s3633_s14 + $0x40] ss:$16 sps:$4 sm:$0xff] (!%p2706_p7)   ;;  %v3035_v62 = vld [vmem:[%s3633_s14 + $0x48] ss:$16 sps:$4 sm:$0xff] (!%p2706_p7)   ;;  %v3036_v63 = vld [vmem:[%s3633_s14 + $0x64] ss:$16 sps:$4 sm:$0xff] (!%p2706_p7)  }
 0x1a0   : > { %v3038_v0 = vld [vmem:[%s3633_s14 + $0x6c] ss:$16 sps:$4 sm:$0xff] (!%p2706_p7)   ;;  %v3040_v2 = vld [vmem:[%s3633_s14 + $0x60] ss:$16 sps:$4 sm:$0xff] (!%p2706_p7)   ;;  %v3041_v3 = vld [vmem:[%s3633_s14 + $0x68] ss:$16 sps:$4 sm:$0xff] (!%p2706_p7)  }
 0x1a1   : > { %v3042_v4 = vld [vmem:[%s3633_s14 + $0x84] ss:$16 sps:$4 sm:$0xff] (!%p2706_p7)   ;;  %v3044_v5 = vld [vmem:[%s3633_s14 + $0x8c] ss:$16 sps:$4 sm:$0xff] (!%p2706_p7)   ;;  %v3046_v6 = vld [vmem:[%s3633_s14 + $0x80] ss:$16 sps:$4 sm:$0xff] (!%p2706_p7)  }
 0x1a2   : > { %1073 = vmatpush1.bf16.msra.mxu0 (!%p2706_p7), %v3028_v57  ;;  %1146 = vmatpush1.bf16.msra.mxu1 (!%p2706_p7), %v3029_v58  ;;  %v3047_v7 = vld [vmem:[%s3633_s14 + $0x88] ss:$16 sps:$4 sm:$0xff] (!%p2706_p7)   ;;  %v3048_v8 = vld [vmem:[%s3633_s14 + $0xa4] ss:$16 sps:$4 sm:$0xff] (!%p2706_p7)   ;;  %v3050_v9 = vld [vmem:[%s3633_s14 + $0xac] ss:$16 sps:$4 sm:$0xff] (!%p2706_p7)  }
 0x1a3   : > { %1074 = vmatprep.subr.bf16.mxu0 %v3030_v59  ;;  %1147 = vmatprep.subr.bf16.mxu1 %v3032_v60  ;;  %v3052_v10 = vld [vmem:[%s3633_s14 + $0xa0] ss:$16 sps:$4 sm:$0xff]   ;;  %v3053_v11 = vld [vmem:[%s3633_s14 + $0xa8] ss:$16 sps:$4 sm:$0xff]   ;;  %v3054_v12 = vld [vmem:[%s3633_s14 + $0xc4] ss:$16 sps:$4 sm:$0xff]  }
 0x1a4   : > { %v3056_v13 = vld [vmem:[%s3633_s14 + $0xcc] ss:$16 sps:$4 sm:$0xff]   ;;  %v3058_v14 = vld [vmem:[%s3633_s14 + $0xc0] ss:$16 sps:$4 sm:$0xff]   ;;  %v3059_v15 = vld [vmem:[%s3633_s14 + $0xc8] ss:$16 sps:$4 sm:$0xff]  }
 0x1a5   : > { %v3060_v16 = vld [vmem:[%s3633_s14 + $0xe4] ss:$16 sps:$4 sm:$0xff]   ;;  %v3062_v17 = vld [vmem:[%s3633_s14 + $0xec] ss:$16 sps:$4 sm:$0xff]   ;;  %v3064_v18 = vld [vmem:[%s3633_s14 + $0xe0] ss:$16 sps:$4 sm:$0xff]  }
 0x1a6   : > { %1075 = vmatpush1.bf16.msra.mxu0 %v3034_v61  ;;  %1148 = vmatpush1.bf16.msra.mxu1 %v3035_v62  ;;  %v3065_v19 = vld [vmem:[%s3633_s14 + $0xe8] ss:$16 sps:$4 sm:$0xff]   ;;  %v877_v20 = vld [vmem:[#allocation3] sm:$0xff]  ;;  %v879_v23 = vld [vmem:[#allocation3 + $0x10] sm:$0xff]  ;;  %v891_v33 = vshrl.u32 %v890_v32, 7 }
 0x1a7   : > { %1076 = vmatprep.subr.bf16.mxu0 %v3036_v63  ;;  %1149 = vmatprep.subr.bf16.mxu1 %v3038_v0  ;;  %v878_v21 = vld [vmem:[#allocation3 + $0x8] sm:$0xff]  ;;  %v880_v24 = vld [vmem:[#allocation3 + $0x18] sm:$0xff]  ;;  %v881_v26 = vld [vmem:[#allocation3 + $0x20] sm:$0xff] }
 0x1a8   : > { %v885_v22 = vpack.c.bf16 %v878_v21, %v877_v20  ;;  %v886_v25 = vpack.c.bf16 %v880_v24, %v879_v23  ;;  %v882_v27 = vld [vmem:[#allocation3 + $0x28] sm:$0xff]  ;;  %v883_v29 = vld [vmem:[#allocation3 + $0x30] sm:$0xff]  ;;  %v884_v30 = vld [vmem:[#allocation3 + $0x38] sm:$0xff]  ;;  %v892_v34 = vsub.s32 0, %v891_v33  ;;  %v900_v35 = vsub.s32 2, %v891_v33 }
 0x1a9   : > { %v887_v28 = vpack.c.bf16 %v882_v27, %v881_v26  ;;  %v888_v31 = vpack.c.bf16 %v884_v30, %v883_v29  ;;  %v896_v36 = vsub.s32 1, %v891_v33  ;;  %v904_v37 = vsub.s32 3, %v891_v33 }
 0x1aa   : > { %1077 = vmatpush1.bf16.msra.mxu0 %v3040_v2  ;;  %1150 = vmatpush1.bf16.msra.mxu1 %v3041_v3  ;;  %v3760_v38 = vrot.slane %v3651_v1, %v892_v34  ;;  %v3763_v39 = vrot.slane %v3651_v1, %v900_v35 }
 0x1ab   : > { %1078 = vmatprep.subr.bf16.mxu0 %v3042_v4  ;;  %1151 = vmatprep.subr.bf16.mxu1 %v3044_v5  ;;  %v3766_v40 = vrot.slane %v3651_v1, %v896_v36  ;;  %v3769_v41 = vrot.slane %v3651_v1, %v904_v37 }
 0x1ae   : > { %1079 = vmatpush1.bf16.msra.mxu0 %v3046_v6  ;;  %1152 = vmatpush1.bf16.msra.mxu1 %v3047_v7 }
 0x1af   : > { %1080 = vmatprep.subr.bf16.mxu0 %v3048_v8  ;;  %1153 = vmatprep.subr.bf16.mxu1 %v3050_v9 }
 0x1b2   : > { %1081 = vmatpush1.bf16.msra.mxu0 %v3052_v10  ;;  %1154 = vmatpush1.bf16.msra.mxu1 %v3053_v11 }
 0x1b3   : > { %1082 = vmatprep.subr.bf16.mxu0 %v3054_v12  ;;  %1155 = vmatprep.subr.bf16.mxu1 %v3056_v13 }
 0x1b6   : > { %1083 = vmatpush1.bf16.msra.mxu0 %v3058_v14  ;;  %1156 = vmatpush1.bf16.msra.mxu1 %v3059_v15 }
 0x1b7   : > { %1084 = vmatprep.subr.bf16.mxu0 %v3060_v16  ;;  %1157 = vmatprep.subr.bf16.mxu1 %v3062_v17 }
 0x1ba   : > { %1085 = vmatpush1.bf16.msra.mxu0 %v3064_v18  ;;  %1158 = vmatpush1.bf16.msra.mxu1 %v3065_v19 }
 0x1bd   : > { %1103 = vmatmul.mubr.bf16.vlgmr.msra.gmra.mrb[0].mxu0 %v885_v22  ;;  %1176 = vmatmul.mubr.bf16.vlgmr.msra.gmra.mrb[0].mxu1 %v885_v22 }
 0x1be   : > { %1112 = vmatprep.mubr.bf16.mxu0 %v3371_v47  ;;  %1185 = vmatprep.mubr.bf16.mxu1 %v3371_v47 }
 0x1c5   : > { %1113 = vmatmul.mubr.bf16.gmra.mrb[4].mxu0 %v886_v25  ;;  %1186 = vmatmul.mubr.bf16.gmra.mrb[4].mxu1 %v886_v25 }
 0x1c6   : > { %1122 = vmatprep.mubr.bf16.mxu0 %v3371_v47  ;;  %1195 = vmatprep.mubr.bf16.mxu1 %v3371_v47 }
 0x1cd   : > { %1123 = vmatmul.mubr.bf16.gmra.mrb[8].mxu0 %v887_v28  ;;  %1196 = vmatmul.mubr.bf16.gmra.mrb[8].mxu1 %v887_v28 }
 0x1ce   : > { %1132 = vmatprep.mubr.bf16.mxu0 %v3371_v47  ;;  %1205 = vmatprep.mubr.bf16.mxu1 %v3371_v47 }
 0x1d5   : > { %1133 = vmatmul.mubr.bf16.gmra.mrb[12].mxu0 %v888_v31  ;;  %1206 = vmatmul.mubr.bf16.gmra.mrb[12].mxu1 %v888_v31 }
 0x290   : > { %v1104_v42 = vpop.f32.mrb[0].mxu0  ;;  %v1177_v43 = vpop.f32.mrb[0].mxu1 }
 0x291   : > { %v1105_v44 = vadd.f32 %v1104_v42, %v3760_v38  ;;  %v1178_v49 = vadd.f32 %v1177_v43, %v3763_v39  ;;  %v1106_v50 = vpop.f32.mrb[1].mxu0  ;;  %v1179_v51 = vpop.f32.mrb[1].mxu1 }
 0x292   : > { %v1107_v52 = vadd.f32 %v1106_v50, %v3766_v40  ;;  %v1180_v53 = vadd.f32 %v1179_v51, %v3769_v41  ;;  %v1108_v45 = vpop.f32.mrb[2].mxu0  ;;  %v1181_v46 = vpop.f32.mrb[2].mxu1 }
 0x293   : > { %1216 = vst [vmem:[#allocation2] sm:$0xff] %v1105_v44  ;;  %1218 = vst [vmem:[#allocation2 + $0x10] sm:$0xff] %v1178_v49  ;;  %v1109_v47 = vadd.f32 %v1108_v45, %v3760_v38  ;;  %v1182_v1 = vadd.f32 %v1181_v46, %v3763_v39  ;;  %v1110_v48 = vpop.f32.mrb[3].mxu0  ;;  %v1183_v54 = vpop.f32.mrb[3].mxu1 }
 0x294   : > { %1217 = vst [vmem:[#allocation2 + $0x8] sm:$0xff] %v1107_v52  ;;  %1219 = vst [vmem:[#allocation2 + $0x18] sm:$0xff] %v1180_v53  ;;  %v1111_v55 = vadd.f32 %v1110_v48, %v3766_v40  ;;  %v1184_v56 = vadd.f32 %v1183_v54, %v3769_v41 }
 0x295   : > { %1220 = vst [vmem:[#allocation2 + $0x20] sm:$0xff] %v1109_v47  ;;  %1222 = vst [vmem:[#allocation2 + $0x30] sm:$0xff] %v1182_v1 }
 0x296   : > { %1221 = vst [vmem:[#allocation2 + $0x28] sm:$0xff] %v1111_v55  ;;  %1223 = vst [vmem:[#allocation2 + $0x38] sm:$0xff] %v1184_v56 }
 0x298   : > { %v1114_v57 = vpop.f32.mrb[4].mxu0  ;;  %v1187_v58 = vpop.f32.mrb[4].mxu1 }
 0x299   : > { %v1115_v59 = vadd.f32 %v1114_v57, %v3760_v38  ;;  %v1188_v60 = vadd.f32 %v1187_v58, %v3763_v39  ;;  %v1116_v61 = vpop.f32.mrb[5].mxu0  ;;  %v1189_v62 = vpop.f32.mrb[5].mxu1 }
 0x29a   : > { %v1117_v63 = vadd.f32 %v1116_v61, %v3766_v40  ;;  %v1190_v0 = vadd.f32 %v1189_v62, %v3769_v41  ;;  %v1118_v2 = vpop.f32.mrb[6].mxu0  ;;  %v1191_v3 = vpop.f32.mrb[6].mxu1 }
 0x29b   : > { %1224 = vst [vmem:[#allocation2 + $0x40] sm:$0xff] %v1115_v59  ;;  %1226 = vst [vmem:[#allocation2 + $0x50] sm:$0xff] %v1188_v60  ;;  %v1119_v4 = vadd.f32 %v1118_v2, %v3760_v38  ;;  %v1192_v5 = vadd.f32 %v1191_v3, %v3763_v39  ;;  %v1120_v6 = vpop.f32.mrb[7].mxu0  ;;  %v1193_v7 = vpop.f32.mrb[7].mxu1 }
 0x29c   : > { %1225 = vst [vmem:[#allocation2 + $0x48] sm:$0xff] %v1117_v63  ;;  %1227 = vst [vmem:[#allocation2 + $0x58] sm:$0xff] %v1190_v0  ;;  %v1121_v8 = vadd.f32 %v1120_v6, %v3766_v40  ;;  %v1194_v9 = vadd.f32 %v1193_v7, %v3769_v41 }
 0x29d   : > { %1228 = vst [vmem:[#allocation2 + $0x60] sm:$0xff] %v1119_v4  ;;  %1230 = vst [vmem:[#allocation2 + $0x70] sm:$0xff] %v1192_v5 }
 0x29e   : > { %1229 = vst [vmem:[#allocation2 + $0x68] sm:$0xff] %v1121_v8  ;;  %1231 = vst [vmem:[#allocation2 + $0x78] sm:$0xff] %v1194_v9 }
 0x2a0   : > { %v1124_v10 = vpop.f32.mrb[8].mxu0  ;;  %v1197_v11 = vpop.f32.mrb[8].mxu1 }
 0x2a1   : > { %v1125_v12 = vadd.f32 %v1124_v10, %v3760_v38  ;;  %v1198_v13 = vadd.f32 %v1197_v11, %v3763_v39  ;;  %v1126_v14 = vpop.f32.mrb[9].mxu0  ;;  %v1199_v15 = vpop.f32.mrb[9].mxu1 }
 0x2a2   : > { %v1127_v16 = vadd.f32 %v1126_v14, %v3766_v40  ;;  %v1200_v17 = vadd.f32 %v1199_v15, %v3769_v41  ;;  %v1128_v18 = vpop.f32.mrb[10].mxu0  ;;  %v1201_v19 = vpop.f32.mrb[10].mxu1 }
 0x2a3   : > { %1232 = vst [vmem:[#allocation2 + $0x80] sm:$0xff] %v1125_v12  ;;  %1234 = vst [vmem:[#allocation2 + $0x90] sm:$0xff] %v1198_v13  ;;  %v1129_v20 = vadd.f32 %v1128_v18, %v3760_v38  ;;  %v1202_v21 = vadd.f32 %v1201_v19, %v3763_v39  ;;  %v1130_v22 = vpop.f32.mrb[11].mxu0  ;;  %v1203_v23 = vpop.f32.mrb[11].mxu1 }
 0x2a4   : > { %1233 = vst [vmem:[#allocation2 + $0x88] sm:$0xff] %v1127_v16  ;;  %1235 = vst [vmem:[#allocation2 + $0x98] sm:$0xff] %v1200_v17  ;;  %v1131_v24 = vadd.f32 %v1130_v22, %v3766_v40  ;;  %v1204_v25 = vadd.f32 %v1203_v23, %v3769_v41 }
 0x2a5   : > { %1236 = vst [vmem:[#allocation2 + $0xa0] sm:$0xff] %v1129_v20  ;;  %1238 = vst [vmem:[#allocation2 + $0xb0] sm:$0xff] %v1202_v21 }
 0x2a6   : > { %1237 = vst [vmem:[#allocation2 + $0xa8] sm:$0xff] %v1131_v24  ;;  %1239 = vst [vmem:[#allocation2 + $0xb8] sm:$0xff] %v1204_v25 }
 0x2a8   : > { %v1134_v26 = vpop.f32.mrb[12].mxu0  ;;  %v1207_v27 = vpop.f32.mrb[12].mxu1 }
 0x2a9   : > { %v1135_v28 = vadd.f32 %v1134_v26, %v3760_v38  ;;  %v1208_v29 = vadd.f32 %v1207_v27, %v3763_v39  ;;  %v1136_v30 = vpop.f32.mrb[13].mxu0  ;;  %v1209_v31 = vpop.f32.mrb[13].mxu1 }
 0x2aa   : > { %v1137_v32 = vadd.f32 %v1136_v30, %v3766_v40  ;;  %v1210_v33 = vadd.f32 %v1209_v31, %v3769_v41  ;;  %v1138_v34 = vpop.f32.mrb[14].mxu0  ;;  %v1211_v35 = vpop.f32.mrb[14].mxu1 }
 0x2ab   : > { %1240 = vst [vmem:[#allocation2 + $0xc0] sm:$0xff] %v1135_v28  ;;  %1242 = vst [vmem:[#allocation2 + $0xd0] sm:$0xff] %v1208_v29  ;;  %v1139_v36 = vadd.f32 %v1138_v34, %v3760_v38  ;;  %v1212_v37 = vadd.f32 %v1211_v35, %v3763_v39  ;;  %v1140_v42 = vpop.f32.mrb[15].mxu0  ;;  %v1213_v43 = vpop.f32.mrb[15].mxu1 }
 0x2ac   : > { %1241 = vst [vmem:[#allocation2 + $0xc8] sm:$0xff] %v1137_v32  ;;  %1243 = vst [vmem:[#allocation2 + $0xd8] sm:$0xff] %v1210_v33  ;;  %v1141_v44 = vadd.f32 %v1140_v42, %v3766_v40  ;;  %v1214_v49 = vadd.f32 %v1213_v43, %v3769_v41 }
 0x2ad   : > { %1244 = vst [vmem:[#allocation2 + $0xe0] sm:$0xff] %v1139_v36  ;;  %1246 = vst [vmem:[#allocation2 + $0xf0] sm:$0xff] %v1212_v37 }
 0x2ae   : > { %1245 = vst [vmem:[#allocation2 + $0xe8] sm:$0xff] %v1141_v44  ;;  %1247 = vst [vmem:[#allocation2 + $0xf8] sm:$0xff] %v1214_v49 }
 0x2af PF: > { %v3804_v38 = vld [vmem:[%s3640_s16 + $0x4] ss:$16 sps:$4 sm:$0xff]   ;;  %v3807_v39 = vld [vmem:[%s3640_s16] ss:$16 sps:$4 sm:$0xff]   ;;  %v3372_v40 = vmov 0   ;;  %v3373_v11 = vmov 0.0|0.0  }
 0x2b0   : > { %1485 = vmatprep.mubr.bf16.mxu0 %v3372_v40  ;;  %1526 = vmatprep.mubr.bf16.mxu1 %v3372_v40  ;;  %v3813_v41 = vld [vmem:[%s3640_s16 + $0x24] ss:$16 sps:$4 sm:$0xff]   ;;  %v3817_v50 = vld [vmem:[%s3640_s16 + $0xc] ss:$16 sps:$4 sm:$0xff]   ;;  %v3820_v51 = vld [vmem:[%s3640_s16 + $0x20] ss:$16 sps:$4 sm:$0xff]  }
 0x2b1   : > { %1453 = vmatprep.subr.bf16.mxu0 %v3804_v38  ;;  %v3823_v52 = vld [vmem:[%s3640_s16 + $0x8] ss:$16 sps:$4 sm:$0xff]   ;;  %v3827_v53 = vld [vmem:[%s3640_s16 + $0x44] ss:$16 sps:$4 sm:$0xff]   ;;  %1494 = vmatprep.subr.bf16.mxu1 %v3817_v50  ;;  %v3831_v45 = vld [vmem:[%s3640_s16 + $0x2c] ss:$16 sps:$4 sm:$0xff]  }
 0x2b2   : > { %1454 = vmatpush1.bf16.msra.mxu0 %v3807_v39  ;;  %1495 = vmatpush1.bf16.msra.mxu1 %v3823_v52  ;;  %v3835_v46 = vld [vmem:[%s3640_s16 + $0x28] ss:$16 sps:$4 sm:$0xff]   ;;  %v3840_v47 = vld [vmem:[%s3640_s16 + $0x40] ss:$16 sps:$4 sm:$0xff]   ;;  %v3844_v1 = vld [vmem:[%s3640_s16 + $0x64] ss:$16 sps:$4 sm:$0xff]  }
 0x2b3   : > { %1455 = vmatprep.subr.bf16.mxu0 %v3813_v41  ;;  %1496 = vmatprep.subr.bf16.mxu1 %v3831_v45  ;;  %v3847_v48 = vld [vmem:[%s3640_s16 + $0x4c] ss:$16 sps:$4 sm:$0xff]   ;;  %v3851_v54 = vld [vmem:[%s3640_s16 + $0x48] ss:$16 sps:$4 sm:$0xff]   ;;  %v3856_v55 = vld [vmem:[%s3640_s16 + $0x60] ss:$16 sps:$4 sm:$0xff]  }
 0x2b4   : > { %v3859_v56 = vld [vmem:[%s3640_s16 + $0x6c] ss:$16 sps:$4 sm:$0xff]   ;;  %v3863_v57 = vld [vmem:[%s3640_s16 + $0x84] ss:$16 sps:$4 sm:$0xff]   ;;  %v3867_v58 = vld [vmem:[%s3640_s16 + $0x80] ss:$16 sps:$4 sm:$0xff]  }
 0x2b5   : > { %v3870_v59 = vld [vmem:[%s3640_s16 + $0x68] ss:$16 sps:$4 sm:$0xff]   ;;  %v3875_v60 = vld [vmem:[%s3640_s16 + $0x8c] ss:$16 sps:$4 sm:$0xff]   ;;  %v3879_v61 = vld [vmem:[%s3640_s16 + $0xa4] ss:$16 sps:$4 sm:$0xff]  }
 0x2b6   : > { %1456 = vmatpush1.bf16.msra.mxu0 %v3820_v51  ;;  %1497 = vmatpush1.bf16.msra.mxu1 %v3835_v46  ;;  %v3883_v62 = vld [vmem:[%s3640_s16 + $0x88] ss:$16 sps:$4 sm:$0xff]   ;;  %v3888_v63 = vld [vmem:[%s3640_s16 + $0xa0] ss:$16 sps:$4 sm:$0xff]   ;;  %v3891_v0 = vld [vmem:[%s3640_s16 + $0xac] ss:$16 sps:$4 sm:$0xff]  }
 0x2b7   : > { %1457 = vmatprep.subr.bf16.mxu0 %v3827_v53  ;;  %1498 = vmatprep.subr.bf16.mxu1 %v3847_v48  ;;  %v3895_v2 = vld [vmem:[%s3640_s16 + $0xc4] ss:$16 sps:$4 sm:$0xff]   ;;  %v3899_v3 = vld [vmem:[%s3640_s16 + $0xa8] ss:$16 sps:$4 sm:$0xff]   ;;  %v3904_v4 = vld [vmem:[%s3640_s16 + $0xc0] ss:$16 sps:$4 sm:$0xff]  }
 0x2b8   : > { %v3907_v5 = vld [vmem:[%s3640_s16 + $0xcc] ss:$16 sps:$4 sm:$0xff]   ;;  %v3911_v6 = vld [vmem:[%s3640_s16 + $0xe4] ss:$16 sps:$4 sm:$0xff]   ;;  %v3915_v7 = vld [vmem:[%s3640_s16 + $0xc8] ss:$16 sps:$4 sm:$0xff]  }
 0x2b9   : > { %v3920_v8 = vld [vmem:[%s3640_s16 + $0xe0] ss:$16 sps:$4 sm:$0xff]   ;;  %v3923_v9 = vld [vmem:[%s3640_s16 + $0xec] ss:$16 sps:$4 sm:$0xff]   ;;  %v3928_v10 = vld [vmem:[%s3640_s16 + $0xe8] ss:$16 sps:$4 sm:$0xff]  }
 0x2ba   : > { %1458 = vmatpush1.bf16.msra.mxu0 %v3840_v47  ;;  %1499 = vmatpush1.bf16.msra.mxu1 %v3851_v54  ;;  %v1288_v12 = vld [vmem:[#allocation2] sm:$0xff]  ;;  %v1289_v13 = vld [vmem:[#allocation2 + $0x8] sm:$0xff]  ;;  %v1290_v17 = vld [vmem:[#allocation2 + $0x10] sm:$0xff]  ;;  %p2771_p9 = scmp.ge.s32.totalorder %s3355_s8, 1 }
 0x2bb   : > { %1459 = vmatprep.subr.bf16.mxu0 %v3844_v1  ;;  %1500 = vmatprep.subr.bf16.mxu1 %v3859_v56  ;;  %v1291_v27 = vld [vmem:[#allocation2 + $0x18] sm:$0xff] }
 0x2be   : > { %1460 = vmatpush1.bf16.msra.mxu0 %v3856_v55  ;;  %1501 = vmatpush1.bf16.msra.mxu1 %v3870_v59 }
 0x2bf   : > { %1461 = vmatprep.subr.bf16.mxu0 %v3863_v57  ;;  %1502 = vmatprep.subr.bf16.mxu1 %v3875_v60 }
 0x2c2   : > { %1462 = vmatpush1.bf16.msra.mxu0 %v3867_v58  ;;  %1503 = vmatpush1.bf16.msra.mxu1 %v3883_v62 }
 0x2c3   : > { %1463 = vmatprep.subr.bf16.mxu0 %v3879_v61  ;;  %1504 = vmatprep.subr.bf16.mxu1 %v3891_v0 }
 0x2c6   : > { %1464 = vmatpush1.bf16.msra.mxu0 %v3888_v63  ;;  %1505 = vmatpush1.bf16.msra.mxu1 %v3899_v3 }
 0x2c7   : > { %1465 = vmatprep.subr.bf16.mxu0 %v3895_v2  ;;  %1506 = vmatprep.subr.bf16.mxu1 %v3907_v5 }
 0x2ca   : > { %1466 = vmatpush1.bf16.msra.mxu0 %v3904_v4  ;;  %1507 = vmatpush1.bf16.msra.mxu1 %v3915_v7 }
 0x2cb   : > { %1467 = vmatprep.subr.bf16.mxu0 %v3911_v6  ;;  %1508 = vmatprep.subr.bf16.mxu1 %v3923_v9 }
 0x2ce   : > { %1468 = vmatpush1.bf16.msra.mxu0 %v3920_v8  ;;  %1509 = vmatpush1.bf16.msra.mxu1 %v3928_v10 }
 0x2d1   : > { %1486 = vmatmul.mubr.bf16.vlgmr.msra.gmra.mrb[0].mxu0 %v3373_v11  ;;  %1527 = vmatmul.mubr.bf16.vlgmr.msra.gmra.mrb[0].mxu1 %v3373_v11 }
 0x3a4   : > { %v1487_v14 = vpop.f32.mrb[0].mxu0  ;;  %v1528_v22 = vpop.f32.mrb[0].mxu1 }
 0x3a5   : > { %v1535_v15 = vadd.f32 %v1487_v14, %v1288_v12  ;;  %v1489_v16 = vpop.f32.mrb[1].mxu0  ;;  %v1537_v24 = vadd.f32 %v1528_v22, %v1290_v17  ;;  %v1530_v25 = vpop.f32.mrb[1].mxu1 }
 0x3a6   : > { %v1536_v18 = vadd.f32 %v1489_v16, %v1289_v13  ;;  %v1491_v19 = vpop.f32.mrb[2].mxu0  ;;  %v1532_v26 = vpop.f32.mrb[2].mxu1  ;;  %v1538_v29 = vadd.f32 %v1530_v25, %v1291_v27 }
 0x3a7   : > { %v1539_v20 = vmul.f32 0.5, %v1535_v15  ;;  %v1492_v21 = vpop.f32.mrb[3].mxu0  ;;  %v1533_v28 = vpop.f32.mrb[3].mxu1 }
 0x3a8   : > { %v1543_v23 = vmul.f32 0.5, %v1536_v18  ;;  %v1548_v30 = vmul.f32 0.5, %v1538_v29 }
 0x3a9   : > { %3114 = vtanh.f32 %v1539_v20 }
 0x3aa   : > { %3116 = vtanh.f32 %v1543_v23 }
 0x3ab   : > { %3118 = vtanh.f32 %v1537_v24 }
 0x3ac   : > { %3120 = vtanh.f32 %v1548_v30 }
 0x3b3   : > { %v3115_v31 = vpop.eup %3114 }
 0x3b4   : > { %v3117_v32 = vpop.eup %3116  ;;  %v1541_v33 = vmul.f32 0.5, %v3115_v31 }
 0x3b5   : > { %v3119_v34 = vpop.eup %3118  ;;  %v1545_v35 = vmul.f32 0.5, %v3117_v32 }
 0x3b6   : > { %v1542_v36 = vadd.f32 0.5, %v1541_v33  ;;  %v3121_v49 = vpop.eup %3120 }
 0x3b7   : > { %v1546_v37 = vadd.f32 0.5, %v1545_v35  ;;  %v1550_v11 = vmul.f32 0.5, %v3121_v49 }
 0x3b8   : > { %v1553_v42 = vmul.f32 %v3119_v34, %v1542_v36 }
 0x3b9   : > { %v1552_v43 = vmul.f32 0.0, %v1546_v37  ;;  %v1551_v12 = vadd.f32 0.5, %v1550_v11 }
 0x3bb   : > { %v1554_v44 = vadd.f32 %v1553_v42, %v1552_v43 }
 0x3bd   : > { %3122 = vtanh.f32 %v1554_v44  ;;  %1557 = vst [vmem:[#allocation5] sm:$0xff] %v1554_v44 }
 0x3c4   : > { %1561 = sbr.rel (%p2771_p9) target bundleno = 971 (0x3cb), region = 72 }
 0x3c7   : > { %v3123_v13 = vpop.eup %3122 }
 0x3c8   : > { %v1556_v14 = vmul.f32 %v3123_v13, %v1551_v12 }
 0x3ca   : > { %1558 = vst [vmem:[#allocation4] sm:$0xff] %v1556_v14  ;;  %1562 = vst [vmem:[#allocation3] sm:$0xff] (!%p2771_p9), %v1556_v14 }
 0x3cb PF: > { %1573 = vmatprep.subr.bf16.mxu0 %v3804_v38  ;;  %1614 = vmatprep.subr.bf16.mxu1 %v3817_v50  ;;  %v1568_v17 = vld [vmem:[#allocation2 + $0x20] sm:$0xff]  ;;  %v1569_v18 = vld [vmem:[#allocation2 + $0x28] sm:$0xff]  ;;  %v1570_v20 = vld [vmem:[#allocation2 + $0x30] sm:$0xff] }
 0x3cc   : > { %1574 = vmatpush1.bf16.msra.mxu0 %v3807_v39  ;;  %1615 = vmatpush1.bf16.msra.mxu1 %v3823_v52  ;;  %v1571_v33 = vld [vmem:[#allocation2 + $0x38] sm:$0xff]  ;;  %v1564_v11 = vld [vmem:[#allocation5] sm:$0xff] }
 0x3cd   : > { %1575 = vmatprep.subr.bf16.mxu0 %v3813_v41  ;;  %1616 = vmatprep.subr.bf16.mxu1 %v3831_v45 }
 0x3ce   : > { %1605 = vmatprep.mubr.bf16.mxu0 %v3372_v40  ;;  %1646 = vmatprep.mubr.bf16.mxu1 %v3372_v40 }
 0x3d0   : > { %1576 = vmatpush1.bf16.msra.mxu0 %v3820_v51  ;;  %1617 = vmatpush1.bf16.msra.mxu1 %v3835_v46 }
 0x3d1   : > { %1577 = vmatprep.subr.bf16.mxu0 %v3827_v53  ;;  %1618 = vmatprep.subr.bf16.mxu1 %v3847_v48  ;;  %v1563_v15 = vld [vmem:[#allocation4] sm:$0xff] }
 0x3d2   : > { %v1572_v16 = vpack.c.bf16 %v1563_v15, %v1563_v15 }
 0x3d4   : > { %1578 = vmatpush1.bf16.msra.mxu0 %v3840_v47  ;;  %1619 = vmatpush1.bf16.msra.mxu1 %v3851_v54 }
 0x3d5   : > { %1579 = vmatprep.subr.bf16.mxu0 %v3844_v1  ;;  %1620 = vmatprep.subr.bf16.mxu1 %v3859_v56 }
 0x3d8   : > { %1580 = vmatpush1.bf16.msra.mxu0 %v3856_v55  ;;  %1621 = vmatpush1.bf16.msra.mxu1 %v3870_v59 }
 0x3d9   : > { %1581 = vmatprep.subr.bf16.mxu0 %v3863_v57  ;;  %1622 = vmatprep.subr.bf16.mxu1 %v3875_v60 }
 0x3dc   : > { %1582 = vmatpush1.bf16.msra.mxu0 %v3867_v58  ;;  %1623 = vmatpush1.bf16.msra.mxu1 %v3883_v62 }
 0x3dd   : > { %1583 = vmatprep.subr.bf16.mxu0 %v3879_v61  ;;  %1624 = vmatprep.subr.bf16.mxu1 %v3891_v0 }
 0x3e0   : > { %1584 = vmatpush1.bf16.msra.mxu0 %v3888_v63  ;;  %1625 = vmatpush1.bf16.msra.mxu1 %v3899_v3 }
 0x3e1   : > { %1585 = vmatprep.subr.bf16.mxu0 %v3895_v2  ;;  %1626 = vmatprep.subr.bf16.mxu1 %v3907_v5 }
 0x3e4   : > { %1586 = vmatpush1.bf16.msra.mxu0 %v3904_v4  ;;  %1627 = vmatpush1.bf16.msra.mxu1 %v3915_v7 }
 0x3e5   : > { %1587 = vmatprep.subr.bf16.mxu0 %v3911_v6  ;;  %1628 = vmatprep.subr.bf16.mxu1 %v3923_v9 }
 0x3e8   : > { %1588 = vmatpush1.bf16.msra.mxu0 %v3920_v8  ;;  %1629 = vmatpush1.bf16.msra.mxu1 %v3928_v10 }
 0x3eb   : > { %1606 = vmatmul.mubr.bf16.vlgmr.msra.gmra.mrb[4].mxu0 %v1572_v16  ;;  %1647 = vmatmul.mubr.bf16.vlgmr.msra.gmra.mrb[4].mxu1 %v1572_v16 }
 0x4be   : > { %v1607_v19 = vpop.f32.mrb[4].mxu0  ;;  %v1648_v21 = vpop.f32.mrb[4].mxu1 }
 0x4bf   : > { %v1655_v22 = vadd.f32 %v1607_v19, %v1568_v17  ;;  %v1609_v23 = vpop.f32.mrb[5].mxu0  ;;  %v1650_v24 = vpop.f32.mrb[5].mxu1  ;;  %v1657_v30 = vadd.f32 %v1648_v21, %v1570_v20 }
 0x4c0   : > { %v1656_v25 = vadd.f32 %v1609_v23, %v1569_v18  ;;  %v1611_v26 = vpop.f32.mrb[6].mxu0  ;;  %v1652_v27 = vpop.f32.mrb[6].mxu1  ;;  %v1658_v34 = vadd.f32 %v1650_v24, %v1571_v33 }
 0x4c1   : > { %v1659_v28 = vmul.f32 0.5, %v1655_v22  ;;  %v1612_v29 = vpop.f32.mrb[7].mxu0  ;;  %v1653_v31 = vpop.f32.mrb[7].mxu1 }
 0x4c2   : > { %v1663_v32 = vmul.f32 0.5, %v1656_v25  ;;  %v1668_v35 = vmul.f32 0.5, %v1658_v34 }
 0x4c3   : > { %3124 = vtanh.f32 %v1659_v28 }
 0x4c4   : > { %3126 = vtanh.f32 %v1663_v32 }
 0x4c5   : > { %3128 = vtanh.f32 %v1657_v30 }
 0x4c6   : > { %3130 = vtanh.f32 %v1668_v35 }
 0x4cd   : > { %v3125_v36 = vpop.eup %3124 }
 0x4ce   : > { %v3127_v37 = vpop.eup %3126  ;;  %v1661_v42 = vmul.f32 0.5, %v3125_v36 }
 0x4cf   : > { %v3129_v43 = vpop.eup %3128  ;;  %v1665_v44 = vmul.f32 0.5, %v3127_v37 }
 0x4d0   : > { %v1662_v49 = vadd.f32 0.5, %v1661_v42  ;;  %v3131_v16 = vpop.eup %3130 }
 0x4d1   : > { %v1666_v12 = vadd.f32 0.5, %v1665_v44  ;;  %v1670_v17 = vmul.f32 0.5, %v3131_v16 }
 0x4d2   : > { %v1673_v13 = vmul.f32 %v3129_v43, %v1662_v49 }
 0x4d3   : > { %v1672_v14 = vmul.f32 %v1666_v12, %v1564_v11  ;;  %v1671_v18 = vadd.f32 0.5, %v1670_v17 }
 0x4d5   : > { %v1674_v15 = vadd.f32 %v1673_v13, %v1672_v14 }
 0x4d7   : > { %3132 = vtanh.f32 %v1674_v15  ;;  %1677 = vst [vmem:[#allocation5] sm:$0xff] %v1674_v15 }
 0x4de   : > { %1681 = sbr.rel (%p2771_p9) target bundleno = 1253 (0x4e5), region = 76 }
 0x4e1   : > { %v3133_v19 = vpop.eup %3132 }
 0x4e2   : > { %v1676_v20 = vmul.f32 %v3133_v19, %v1671_v18 }
 0x4e4   : > { %1678 = vst [vmem:[#allocation4] sm:$0xff] %v1676_v20  ;;  %1683 = vst [vmem:[#allocation3 + $0x8] sm:$0xff] (!%p2771_p9), %v1676_v20 }
 0x4e5 PF: > { %1694 = vmatprep.subr.bf16.mxu0 %v3804_v38  ;;  %1735 = vmatprep.subr.bf16.mxu1 %v3817_v50  ;;  %v1689_v23 = vld [vmem:[#allocation2 + $0x40] sm:$0xff]  ;;  %v1690_v24 = vld [vmem:[#allocation2 + $0x48] sm:$0xff]  ;;  %v1691_v26 = vld [vmem:[#allocation2 + $0x50] sm:$0xff] }
 0x4e6   : > { %1695 = vmatpush1.bf16.msra.mxu0 %v3807_v39  ;;  %1736 = vmatpush1.bf16.msra.mxu1 %v3823_v52  ;;  %v1692_v43 = vld [vmem:[#allocation2 + $0x58] sm:$0xff]  ;;  %v1685_v17 = vld [vmem:[#allocation5] sm:$0xff] }
 0x4e7   : > { %1696 = vmatprep.subr.bf16.mxu0 %v3813_v41  ;;  %1737 = vmatprep.subr.bf16.mxu1 %v3831_v45 }
 0x4e8   : > { %1726 = vmatprep.mubr.bf16.mxu0 %v3372_v40  ;;  %1767 = vmatprep.mubr.bf16.mxu1 %v3372_v40 }
 0x4ea   : > { %1697 = vmatpush1.bf16.msra.mxu0 %v3820_v51  ;;  %1738 = vmatpush1.bf16.msra.mxu1 %v3835_v46 }
 0x4eb   : > { %1698 = vmatprep.subr.bf16.mxu0 %v3827_v53  ;;  %1739 = vmatprep.subr.bf16.mxu1 %v3847_v48  ;;  %v1684_v21 = vld [vmem:[#allocation4] sm:$0xff] }
 0x4ec   : > { %v1693_v22 = vpack.c.bf16 %v1684_v21, %v1684_v21 }
 0x4ee   : > { %1699 = vmatpush1.bf16.msra.mxu0 %v3840_v47  ;;  %1740 = vmatpush1.bf16.msra.mxu1 %v3851_v54 }
 0x4ef   : > { %1700 = vmatprep.subr.bf16.mxu0 %v3844_v1  ;;  %1741 = vmatprep.subr.bf16.mxu1 %v3859_v56 }
 0x4f2   : > { %1701 = vmatpush1.bf16.msra.mxu0 %v3856_v55  ;;  %1742 = vmatpush1.bf16.msra.mxu1 %v3870_v59 }
 0x4f3   : > { %1702 = vmatprep.subr.bf16.mxu0 %v3863_v57  ;;  %1743 = vmatprep.subr.bf16.mxu1 %v3875_v60 }
 0x4f6   : > { %1703 = vmatpush1.bf16.msra.mxu0 %v3867_v58  ;;  %1744 = vmatpush1.bf16.msra.mxu1 %v3883_v62 }
 0x4f7   : > { %1704 = vmatprep.subr.bf16.mxu0 %v3879_v61  ;;  %1745 = vmatprep.subr.bf16.mxu1 %v3891_v0 }
 0x4fa   : > { %1705 = vmatpush1.bf16.msra.mxu0 %v3888_v63  ;;  %1746 = vmatpush1.bf16.msra.mxu1 %v3899_v3 }
 0x4fb   : > { %1706 = vmatprep.subr.bf16.mxu0 %v3895_v2  ;;  %1747 = vmatprep.subr.bf16.mxu1 %v3907_v5 }
 0x4fe   : > { %1707 = vmatpush1.bf16.msra.mxu0 %v3904_v4  ;;  %1748 = vmatpush1.bf16.msra.mxu1 %v3915_v7 }
 0x4ff   : > { %1708 = vmatprep.subr.bf16.mxu0 %v3911_v6  ;;  %1749 = vmatprep.subr.bf16.mxu1 %v3923_v9 }
 0x502   : > { %1709 = vmatpush1.bf16.msra.mxu0 %v3920_v8  ;;  %1750 = vmatpush1.bf16.msra.mxu1 %v3928_v10 }
 0x505   : > { %1727 = vmatmul.mubr.bf16.vlgmr.msra.gmra.mrb[8].mxu0 %v1693_v22  ;;  %1768 = vmatmul.mubr.bf16.vlgmr.msra.gmra.mrb[8].mxu1 %v1693_v22 }
 0x5d8   : > { %v1728_v25 = vpop.f32.mrb[8].mxu0  ;;  %v1769_v27 = vpop.f32.mrb[8].mxu1 }
 0x5d9   : > { %v1776_v28 = vadd.f32 %v1728_v25, %v1689_v23  ;;  %v1730_v29 = vpop.f32.mrb[9].mxu0  ;;  %v1771_v30 = vpop.f32.mrb[9].mxu1  ;;  %v1778_v36 = vadd.f32 %v1769_v27, %v1691_v26 }
 0x5da   : > { %v1777_v31 = vadd.f32 %v1730_v29, %v1690_v24  ;;  %v1732_v32 = vpop.f32.mrb[10].mxu0  ;;  %v1773_v33 = vpop.f32.mrb[10].mxu1  ;;  %v1779_v44 = vadd.f32 %v1771_v30, %v1692_v43 }
 0x5db   : > { %v1780_v34 = vmul.f32 0.5, %v1776_v28  ;;  %v1733_v35 = vpop.f32.mrb[11].mxu0  ;;  %v1774_v37 = vpop.f32.mrb[11].mxu1 }
 0x5dc   : > { %v1784_v42 = vmul.f32 0.5, %v1777_v31  ;;  %v1789_v49 = vmul.f32 0.5, %v1779_v44 }
 0x5dd   : > { %3134 = vtanh.f32 %v1780_v34 }
 0x5de   : > { %3136 = vtanh.f32 %v1784_v42 }
 0x5df   : > { %3138 = vtanh.f32 %v1778_v36 }
 0x5e0   : > { %3140 = vtanh.f32 %v1789_v49 }
 0x5e7   : > { %v3135_v11 = vpop.eup %3134 }
 0x5e8   : > { %v3137_v12 = vpop.eup %3136  ;;  %v1782_v13 = vmul.f32 0.5, %v3135_v11 }
 0x5e9   : > { %v3139_v14 = vpop.eup %3138  ;;  %v1786_v15 = vmul.f32 0.5, %v3137_v12 }
 0x5ea   : > { %v1783_v16 = vadd.f32 0.5, %v1782_v13  ;;  %v3141_v22 = vpop.eup %3140 }
 0x5eb   : > { %v1787_v18 = vadd.f32 0.5, %v1786_v15  ;;  %v1791_v23 = vmul.f32 0.5, %v3141_v22 }
 0x5ec   : > { %v1794_v19 = vmul.f32 %v3139_v14, %v1783_v16 }
 0x5ed   : > { %v1793_v20 = vmul.f32 %v1787_v18, %v1685_v17  ;;  %v1792_v24 = vadd.f32 0.5, %v1791_v23 }
 0x5ef   : > { %v1795_v21 = vadd.f32 %v1794_v19, %v1793_v20 }
 0x5f1   : > { %3142 = vtanh.f32 %v1795_v21  ;;  %1798 = vst [vmem:[#allocation5] sm:$0xff] %v1795_v21 }
 0x5f8   : > { %1802 = sbr.rel (%p2771_p9) target bundleno = 1535 (0x5ff), region = 80 }
 0x5fb   : > { %v3143_v25 = vpop.eup %3142 }
 0x5fc   : > { %v1797_v26 = vmul.f32 %v3143_v25, %v1792_v24 }
 0x5fe   : > { %1799 = vst [vmem:[#allocation4] sm:$0xff] %v1797_v26  ;;  %1804 = vst [vmem:[#allocation3 + $0x10] sm:$0xff] (!%p2771_p9), %v1797_v26 }
 0x5ff PF: > { %1815 = vmatprep.subr.bf16.mxu0 %v3804_v38  ;;  %1856 = vmatprep.subr.bf16.mxu1 %v3817_v50  ;;  %v1810_v29 = vld [vmem:[#allocation2 + $0x60] sm:$0xff]  ;;  %v1811_v30 = vld [vmem:[#allocation2 + $0x68] sm:$0xff]  ;;  %v1812_v32 = vld [vmem:[#allocation2 + $0x70] sm:$0xff] }
 0x600   : > { %1816 = vmatpush1.bf16.msra.mxu0 %v3807_v39  ;;  %1857 = vmatpush1.bf16.msra.mxu1 %v3823_v52  ;;  %v1813_v14 = vld [vmem:[#allocation2 + $0x78] sm:$0xff]  ;;  %v1806_v23 = vld [vmem:[#allocation5] sm:$0xff] }
 0x601   : > { %1817 = vmatprep.subr.bf16.mxu0 %v3813_v41  ;;  %1858 = vmatprep.subr.bf16.mxu1 %v3831_v45 }
 0x602   : > { %1847 = vmatprep.mubr.bf16.mxu0 %v3372_v40  ;;  %1888 = vmatprep.mubr.bf16.mxu1 %v3372_v40 }
 0x604   : > { %1818 = vmatpush1.bf16.msra.mxu0 %v3820_v51  ;;  %1859 = vmatpush1.bf16.msra.mxu1 %v3835_v46 }
 0x605   : > { %1819 = vmatprep.subr.bf16.mxu0 %v3827_v53  ;;  %1860 = vmatprep.subr.bf16.mxu1 %v3847_v48  ;;  %v1805_v27 = vld [vmem:[#allocation4] sm:$0xff] }
 0x606   : > { %v1814_v28 = vpack.c.bf16 %v1805_v27, %v1805_v27 }
 0x608   : > { %1820 = vmatpush1.bf16.msra.mxu0 %v3840_v47  ;;  %1861 = vmatpush1.bf16.msra.mxu1 %v3851_v54 }
 0x609   : > { %1821 = vmatprep.subr.bf16.mxu0 %v3844_v1  ;;  %1862 = vmatprep.subr.bf16.mxu1 %v3859_v56 }
 0x60c   : > { %1822 = vmatpush1.bf16.msra.mxu0 %v3856_v55  ;;  %1863 = vmatpush1.bf16.msra.mxu1 %v3870_v59 }
 0x60d   : > { %1823 = vmatprep.subr.bf16.mxu0 %v3863_v57  ;;  %1864 = vmatprep.subr.bf16.mxu1 %v3875_v60 }
 0x610   : > { %1824 = vmatpush1.bf16.msra.mxu0 %v3867_v58  ;;  %1865 = vmatpush1.bf16.msra.mxu1 %v3883_v62 }
 0x611   : > { %1825 = vmatprep.subr.bf16.mxu0 %v3879_v61  ;;  %1866 = vmatprep.subr.bf16.mxu1 %v3891_v0 }
 0x614   : > { %1826 = vmatpush1.bf16.msra.mxu0 %v3888_v63  ;;  %1867 = vmatpush1.bf16.msra.mxu1 %v3899_v3 }
 0x615   : > { %1827 = vmatprep.subr.bf16.mxu0 %v3895_v2  ;;  %1868 = vmatprep.subr.bf16.mxu1 %v3907_v5 }
 0x618   : > { %1828 = vmatpush1.bf16.msra.mxu0 %v3904_v4  ;;  %1869 = vmatpush1.bf16.msra.mxu1 %v3915_v7 }
 0x619   : > { %1829 = vmatprep.subr.bf16.mxu0 %v3911_v6  ;;  %1870 = vmatprep.subr.bf16.mxu1 %v3923_v9 }
 0x61c   : > { %1830 = vmatpush1.bf16.msra.mxu0 %v3920_v8  ;;  %1871 = vmatpush1.bf16.msra.mxu1 %v3928_v10 }
 0x61f   : > { %1848 = vmatmul.mubr.bf16.vlgmr.msra.gmra.mrb[12].mxu0 %v1814_v28  ;;  %1889 = vmatmul.mubr.bf16.vlgmr.msra.gmra.mrb[12].mxu1 %v1814_v28 }
 0x6f2   : > { %v1849_v31 = vpop.f32.mrb[12].mxu0  ;;  %v1890_v33 = vpop.f32.mrb[12].mxu1 }
 0x6f3   : > { %v1897_v34 = vadd.f32 %v1849_v31, %v1810_v29  ;;  %v1851_v35 = vpop.f32.mrb[13].mxu0  ;;  %v1892_v36 = vpop.f32.mrb[13].mxu1  ;;  %v1899_v11 = vadd.f32 %v1890_v33, %v1812_v32 }
 0x6f4   : > { %v1898_v37 = vadd.f32 %v1851_v35, %v1811_v30  ;;  %v1853_v42 = vpop.f32.mrb[14].mxu0  ;;  %v1894_v43 = vpop.f32.mrb[14].mxu1  ;;  %v1900_v15 = vadd.f32 %v1892_v36, %v1813_v14 }
 0x6f5   : > { %v1901_v44 = vmul.f32 0.5, %v1897_v34  ;;  %v1854_v49 = vpop.f32.mrb[15].mxu0  ;;  %v1895_v12 = vpop.f32.mrb[15].mxu1 }
 0x6f6   : > { %v1905_v13 = vmul.f32 0.5, %v1898_v37  ;;  %v1910_v16 = vmul.f32 0.5, %v1900_v15 }
 0x6f7   : > { %3144 = vtanh.f32 %v1901_v44 }
 0x6f8   : > { %3146 = vtanh.f32 %v1905_v13 }
 0x6f9   : > { %3148 = vtanh.f32 %v1899_v11 }
 0x6fa   : > { %3150 = vtanh.f32 %v1910_v16 }
 0x701   : > { %v3145_v17 = vpop.eup %3144 }
 0x702   : > { %v3147_v18 = vpop.eup %3146  ;;  %v1903_v19 = vmul.f32 0.5, %v3145_v17 }
 0x703   : > { %v3149_v20 = vpop.eup %3148  ;;  %v1907_v21 = vmul.f32 0.5, %v3147_v18 }
 0x704   : > { %v1904_v22 = vadd.f32 0.5, %v1903_v19  ;;  %v3151_v28 = vpop.eup %3150 }
 0x705   : > { %v1908_v24 = vadd.f32 0.5, %v1907_v21  ;;  %v1912_v29 = vmul.f32 0.5, %v3151_v28 }
 0x706   : > { %v1915_v25 = vmul.f32 %v3149_v20, %v1904_v22 }
 0x707   : > { %v1914_v26 = vmul.f32 %v1908_v24, %v1806_v23  ;;  %v1913_v30 = vadd.f32 0.5, %v1912_v29 }
 0x709   : > { %v1916_v27 = vadd.f32 %v1915_v25, %v1914_v26 }
 0x70b   : > { %3152 = vtanh.f32 %v1916_v27  ;;  %1919 = vst [vmem:[#allocation5] sm:$0xff] %v1916_v27 }
 0x712   : > { %1923 = sbr.rel (%p2771_p9) target bundleno = 1817 (0x719), region = 84 }
 0x715   : > { %v3153_v31 = vpop.eup %3152 }
 0x716   : > { %v1918_v32 = vmul.f32 %v3153_v31, %v1913_v30 }
 0x718   : > { %1920 = vst [vmem:[#allocation4] sm:$0xff] %v1918_v32  ;;  %1925 = vst [vmem:[#allocation3 + $0x18] sm:$0xff] (!%p2771_p9), %v1918_v32 }
 0x719 PF: > { %1936 = vmatprep.subr.bf16.mxu0 %v3804_v38  ;;  %1977 = vmatprep.subr.bf16.mxu1 %v3817_v50  ;;  %v1931_v35 = vld [vmem:[#allocation2 + $0x80] sm:$0xff]  ;;  %v1932_v36 = vld [vmem:[#allocation2 + $0x88] sm:$0xff]  ;;  %v1933_v42 = vld [vmem:[#allocation2 + $0x90] sm:$0xff] }
 0x71a   : > { %1937 = vmatpush1.bf16.msra.mxu0 %v3807_v39  ;;  %1978 = vmatpush1.bf16.msra.mxu1 %v3823_v52  ;;  %v1934_v20 = vld [vmem:[#allocation2 + $0x98] sm:$0xff]  ;;  %v1927_v29 = vld [vmem:[#allocation5] sm:$0xff] }
 0x71b   : > { %1938 = vmatprep.subr.bf16.mxu0 %v3813_v41  ;;  %1979 = vmatprep.subr.bf16.mxu1 %v3831_v45 }
 0x71c   : > { %1968 = vmatprep.mubr.bf16.mxu0 %v3372_v40  ;;  %2009 = vmatprep.mubr.bf16.mxu1 %v3372_v40 }
 0x71e   : > { %1939 = vmatpush1.bf16.msra.mxu0 %v3820_v51  ;;  %1980 = vmatpush1.bf16.msra.mxu1 %v3835_v46 }
 0x71f   : > { %1940 = vmatprep.subr.bf16.mxu0 %v3827_v53  ;;  %1981 = vmatprep.subr.bf16.mxu1 %v3847_v48  ;;  %v1926_v33 = vld [vmem:[#allocation4] sm:$0xff] }
 0x720   : > { %v1935_v34 = vpack.c.bf16 %v1926_v33, %v1926_v33 }
 0x722   : > { %1941 = vmatpush1.bf16.msra.mxu0 %v3840_v47  ;;  %1982 = vmatpush1.bf16.msra.mxu1 %v3851_v54 }
 0x723   : > { %1942 = vmatprep.subr.bf16.mxu0 %v3844_v1  ;;  %1983 = vmatprep.subr.bf16.mxu1 %v3859_v56 }
 0x726   : > { %1943 = vmatpush1.bf16.msra.mxu0 %v3856_v55  ;;  %1984 = vmatpush1.bf16.msra.mxu1 %v3870_v59 }
 0x727   : > { %1944 = vmatprep.subr.bf16.mxu0 %v3863_v57  ;;  %1985 = vmatprep.subr.bf16.mxu1 %v3875_v60 }
 0x72a   : > { %1945 = vmatpush1.bf16.msra.mxu0 %v3867_v58  ;;  %1986 = vmatpush1.bf16.msra.mxu1 %v3883_v62 }
 0x72b   : > { %1946 = vmatprep.subr.bf16.mxu0 %v3879_v61  ;;  %1987 = vmatprep.subr.bf16.mxu1 %v3891_v0 }
 0x72e   : > { %1947 = vmatpush1.bf16.msra.mxu0 %v3888_v63  ;;  %1988 = vmatpush1.bf16.msra.mxu1 %v3899_v3 }
 0x72f   : > { %1948 = vmatprep.subr.bf16.mxu0 %v3895_v2  ;;  %1989 = vmatprep.subr.bf16.mxu1 %v3907_v5 }
 0x732   : > { %1949 = vmatpush1.bf16.msra.mxu0 %v3904_v4  ;;  %1990 = vmatpush1.bf16.msra.mxu1 %v3915_v7 }
 0x733   : > { %1950 = vmatprep.subr.bf16.mxu0 %v3911_v6  ;;  %1991 = vmatprep.subr.bf16.mxu1 %v3923_v9 }
 0x736   : > { %1951 = vmatpush1.bf16.msra.mxu0 %v3920_v8  ;;  %1992 = vmatpush1.bf16.msra.mxu1 %v3928_v10 }
 0x739   : > { %1969 = vmatmul.mubr.bf16.vlgmr.msra.gmra.mrb[16].mxu0 %v1935_v34  ;;  %2010 = vmatmul.mubr.bf16.vlgmr.msra.gmra.mrb[16].mxu1 %v1935_v34 }
 0x80c   : > { %v1970_v37 = vpop.f32.mrb[16].mxu0  ;;  %v2011_v43 = vpop.f32.mrb[16].mxu1 }
 0x80d   : > { %v2018_v44 = vadd.f32 %v1970_v37, %v1931_v35  ;;  %v1972_v49 = vpop.f32.mrb[17].mxu0  ;;  %v2013_v11 = vpop.f32.mrb[17].mxu1  ;;  %v2020_v17 = vadd.f32 %v2011_v43, %v1933_v42 }
 0x80e   : > { %v2019_v12 = vadd.f32 %v1972_v49, %v1932_v36  ;;  %v1974_v13 = vpop.f32.mrb[18].mxu0  ;;  %v2015_v14 = vpop.f32.mrb[18].mxu1  ;;  %v2021_v21 = vadd.f32 %v2013_v11, %v1934_v20 }
 0x80f   : > { %v2022_v15 = vmul.f32 0.5, %v2018_v44  ;;  %v1975_v16 = vpop.f32.mrb[19].mxu0  ;;  %v2016_v18 = vpop.f32.mrb[19].mxu1 }
 0x810   : > { %v2026_v19 = vmul.f32 0.5, %v2019_v12  ;;  %v2031_v22 = vmul.f32 0.5, %v2021_v21 }
 0x811   : > { %3154 = vtanh.f32 %v2022_v15 }
 0x812   : > { %3156 = vtanh.f32 %v2026_v19 }
 0x813   : > { %3158 = vtanh.f32 %v2020_v17 }
 0x814   : > { %3160 = vtanh.f32 %v2031_v22 }
 0x81b   : > { %v3155_v23 = vpop.eup %3154 }
 0x81c   : > { %v3157_v24 = vpop.eup %3156  ;;  %v2024_v25 = vmul.f32 0.5, %v3155_v23 }
 0x81d   : > { %v3159_v26 = vpop.eup %3158  ;;  %v2028_v27 = vmul.f32 0.5, %v3157_v24 }
 0x81e   : > { %v2025_v28 = vadd.f32 0.5, %v2024_v25  ;;  %v3161_v34 = vpop.eup %3160 }
 0x81f   : > { %v2029_v30 = vadd.f32 0.5, %v2028_v27  ;;  %v2033_v35 = vmul.f32 0.5, %v3161_v34 }
 0x820   : > { %v2036_v31 = vmul.f32 %v3159_v26, %v2025_v28 }
 0x821   : > { %v2035_v32 = vmul.f32 %v2029_v30, %v1927_v29  ;;  %v2034_v36 = vadd.f32 0.5, %v2033_v35 }
 0x823   : > { %v2037_v33 = vadd.f32 %v2036_v31, %v2035_v32 }
 0x825   : > { %3162 = vtanh.f32 %v2037_v33  ;;  %2040 = vst [vmem:[#allocation5] sm:$0xff] %v2037_v33 }
 0x82c   : > { %2044 = sbr.rel (%p2771_p9) target bundleno = 2099 (0x833), region = 88 }
 0x82f   : > { %v3163_v37 = vpop.eup %3162 }
 0x830   : > { %v2039_v42 = vmul.f32 %v3163_v37, %v2034_v36 }
 0x832   : > { %2041 = vst [vmem:[#allocation4] sm:$0xff] %v2039_v42  ;;  %2046 = vst [vmem:[#allocation3 + $0x20] sm:$0xff] (!%p2771_p9), %v2039_v42 }
 0x833 PF: > { %2057 = vmatprep.subr.bf16.mxu0 %v3804_v38  ;;  %2098 = vmatprep.subr.bf16.mxu1 %v3817_v50  ;;  %v2052_v49 = vld [vmem:[#allocation2 + $0xa0] sm:$0xff]  ;;  %v2053_v11 = vld [vmem:[#allocation2 + $0xa8] sm:$0xff]  ;;  %v2054_v13 = vld [vmem:[#allocation2 + $0xb0] sm:$0xff] }
 0x834   : > { %2058 = vmatpush1.bf16.msra.mxu0 %v3807_v39  ;;  %2099 = vmatpush1.bf16.msra.mxu1 %v3823_v52  ;;  %v2055_v26 = vld [vmem:[#allocation2 + $0xb8] sm:$0xff]  ;;  %v2048_v35 = vld [vmem:[#allocation5] sm:$0xff] }
 0x835   : > { %2059 = vmatprep.subr.bf16.mxu0 %v3813_v41  ;;  %2100 = vmatprep.subr.bf16.mxu1 %v3831_v45 }
 0x836   : > { %2089 = vmatprep.mubr.bf16.mxu0 %v3372_v40  ;;  %2130 = vmatprep.mubr.bf16.mxu1 %v3372_v40 }
 0x838   : > { %2060 = vmatpush1.bf16.msra.mxu0 %v3820_v51  ;;  %2101 = vmatpush1.bf16.msra.mxu1 %v3835_v46 }
 0x839   : > { %2061 = vmatprep.subr.bf16.mxu0 %v3827_v53  ;;  %2102 = vmatprep.subr.bf16.mxu1 %v3847_v48  ;;  %v2047_v43 = vld [vmem:[#allocation4] sm:$0xff] }
 0x83a   : > { %v2056_v44 = vpack.c.bf16 %v2047_v43, %v2047_v43 }
 0x83c   : > { %2062 = vmatpush1.bf16.msra.mxu0 %v3840_v47  ;;  %2103 = vmatpush1.bf16.msra.mxu1 %v3851_v54 }
 0x83d   : > { %2063 = vmatprep.subr.bf16.mxu0 %v3844_v1  ;;  %2104 = vmatprep.subr.bf16.mxu1 %v3859_v56 }
 0x840   : > { %2064 = vmatpush1.bf16.msra.mxu0 %v3856_v55  ;;  %2105 = vmatpush1.bf16.msra.mxu1 %v3870_v59 }
 0x841   : > { %2065 = vmatprep.subr.bf16.mxu0 %v3863_v57  ;;  %2106 = vmatprep.subr.bf16.mxu1 %v3875_v60 }
 0x844   : > { %2066 = vmatpush1.bf16.msra.mxu0 %v3867_v58  ;;  %2107 = vmatpush1.bf16.msra.mxu1 %v3883_v62 }
 0x845   : > { %2067 = vmatprep.subr.bf16.mxu0 %v3879_v61  ;;  %2108 = vmatprep.subr.bf16.mxu1 %v3891_v0 }
 0x848   : > { %2068 = vmatpush1.bf16.msra.mxu0 %v3888_v63  ;;  %2109 = vmatpush1.bf16.msra.mxu1 %v3899_v3 }
 0x849   : > { %2069 = vmatprep.subr.bf16.mxu0 %v3895_v2  ;;  %2110 = vmatprep.subr.bf16.mxu1 %v3907_v5 }
 0x84c   : > { %2070 = vmatpush1.bf16.msra.mxu0 %v3904_v4  ;;  %2111 = vmatpush1.bf16.msra.mxu1 %v3915_v7 }
 0x84d   : > { %2071 = vmatprep.subr.bf16.mxu0 %v3911_v6  ;;  %2112 = vmatprep.subr.bf16.mxu1 %v3923_v9 }
 0x850   : > { %2072 = vmatpush1.bf16.msra.mxu0 %v3920_v8  ;;  %2113 = vmatpush1.bf16.msra.mxu1 %v3928_v10 }
 0x853   : > { %2090 = vmatmul.mubr.bf16.vlgmr.msra.gmra.mrb[20].mxu0 %v2056_v44  ;;  %2131 = vmatmul.mubr.bf16.vlgmr.msra.gmra.mrb[20].mxu1 %v2056_v44 }
 0x926   : > { %v2091_v12 = vpop.f32.mrb[20].mxu0  ;;  %v2132_v14 = vpop.f32.mrb[20].mxu1 }
 0x927   : > { %v2139_v15 = vadd.f32 %v2091_v12, %v2052_v49  ;;  %v2093_v16 = vpop.f32.mrb[21].mxu0  ;;  %v2134_v17 = vpop.f32.mrb[21].mxu1  ;;  %v2141_v23 = vadd.f32 %v2132_v14, %v2054_v13 }
 0x928   : > { %v2140_v18 = vadd.f32 %v2093_v16, %v2053_v11  ;;  %v2095_v19 = vpop.f32.mrb[22].mxu0  ;;  %v2136_v20 = vpop.f32.mrb[22].mxu1  ;;  %v2142_v27 = vadd.f32 %v2134_v17, %v2055_v26 }
 0x929   : > { %v2143_v21 = vmul.f32 0.5, %v2139_v15  ;;  %v2096_v22 = vpop.f32.mrb[23].mxu0  ;;  %v2137_v24 = vpop.f32.mrb[23].mxu1 }
 0x92a   : > { %v2147_v25 = vmul.f32 0.5, %v2140_v18  ;;  %v2152_v28 = vmul.f32 0.5, %v2142_v27 }
 0x92b   : > { %3164 = vtanh.f32 %v2143_v21 }
 0x92c   : > { %3166 = vtanh.f32 %v2147_v25 }
 0x92d   : > { %3168 = vtanh.f32 %v2141_v23 }
 0x92e   : > { %3170 = vtanh.f32 %v2152_v28 }
 0x935   : > { %v3165_v29 = vpop.eup %3164 }
 0x936   : > { %v3167_v30 = vpop.eup %3166  ;;  %v2145_v31 = vmul.f32 0.5, %v3165_v29 }
 0x937   : > { %v3169_v32 = vpop.eup %3168  ;;  %v2149_v33 = vmul.f32 0.5, %v3167_v30 }
 0x938   : > { %v2146_v34 = vadd.f32 0.5, %v2145_v31  ;;  %v3171_v44 = vpop.eup %3170 }
 0x939   : > { %v2150_v36 = vadd.f32 0.5, %v2149_v33  ;;  %v2154_v49 = vmul.f32 0.5, %v3171_v44 }
 0x93a   : > { %v2157_v37 = vmul.f32 %v3169_v32, %v2146_v34 }
 0x93b   : > { %v2156_v42 = vmul.f32 %v2150_v36, %v2048_v35  ;;  %v2155_v11 = vadd.f32 0.5, %v2154_v49 }
 0x93d   : > { %v2158_v43 = vadd.f32 %v2157_v37, %v2156_v42 }
 0x93f   : > { %3172 = vtanh.f32 %v2158_v43  ;;  %2161 = vst [vmem:[#allocation5] sm:$0xff] %v2158_v43 }
 0x946   : > { %2165 = sbr.rel (%p2771_p9) target bundleno = 2381 (0x94d), region = 92 }
 0x949   : > { %v3173_v12 = vpop.eup %3172 }
 0x94a   : > { %v2160_v13 = vmul.f32 %v3173_v12, %v2155_v11 }
 0x94c   : > { %2162 = vst [vmem:[#allocation4] sm:$0xff] %v2160_v13  ;;  %2167 = vst [vmem:[#allocation3 + $0x28] sm:$0xff] (!%p2771_p9), %v2160_v13 }
 0x94d PF: > { %2178 = vmatprep.subr.bf16.mxu0 %v3804_v38  ;;  %2219 = vmatprep.subr.bf16.mxu1 %v3817_v50  ;;  %v2173_v16 = vld [vmem:[#allocation2 + $0xc0] sm:$0xff]  ;;  %v2174_v17 = vld [vmem:[#allocation2 + $0xc8] sm:$0xff]  ;;  %v2175_v19 = vld [vmem:[#allocation2 + $0xd0] sm:$0xff] }
 0x94e   : > { %2179 = vmatpush1.bf16.msra.mxu0 %v3807_v39  ;;  %2220 = vmatpush1.bf16.msra.mxu1 %v3823_v52  ;;  %v2176_v32 = vld [vmem:[#allocation2 + $0xd8] sm:$0xff]  ;;  %v2169_v49 = vld [vmem:[#allocation5] sm:$0xff] }
 0x94f   : > { %2180 = vmatprep.subr.bf16.mxu0 %v3813_v41  ;;  %2221 = vmatprep.subr.bf16.mxu1 %v3831_v45 }
 0x950   : > { %2210 = vmatprep.mubr.bf16.mxu0 %v3372_v40  ;;  %2251 = vmatprep.mubr.bf16.mxu1 %v3372_v40 }
 0x952   : > { %2181 = vmatpush1.bf16.msra.mxu0 %v3820_v51  ;;  %2222 = vmatpush1.bf16.msra.mxu1 %v3835_v46 }
 0x953   : > { %2182 = vmatprep.subr.bf16.mxu0 %v3827_v53  ;;  %2223 = vmatprep.subr.bf16.mxu1 %v3847_v48  ;;  %v2168_v14 = vld [vmem:[#allocation4] sm:$0xff] }
 0x954   : > { %v2177_v15 = vpack.c.bf16 %v2168_v14, %v2168_v14 }
 0x956   : > { %2183 = vmatpush1.bf16.msra.mxu0 %v3840_v47  ;;  %2224 = vmatpush1.bf16.msra.mxu1 %v3851_v54 }
 0x957   : > { %2184 = vmatprep.subr.bf16.mxu0 %v3844_v1  ;;  %2225 = vmatprep.subr.bf16.mxu1 %v3859_v56 }
 0x95a   : > { %2185 = vmatpush1.bf16.msra.mxu0 %v3856_v55  ;;  %2226 = vmatpush1.bf16.msra.mxu1 %v3870_v59 }
 0x95b   : > { %2186 = vmatprep.subr.bf16.mxu0 %v3863_v57  ;;  %2227 = vmatprep.subr.bf16.mxu1 %v3875_v60 }
 0x95e   : > { %2187 = vmatpush1.bf16.msra.mxu0 %v3867_v58  ;;  %2228 = vmatpush1.bf16.msra.mxu1 %v3883_v62 }
 0x95f   : > { %2188 = vmatprep.subr.bf16.mxu0 %v3879_v61  ;;  %2229 = vmatprep.subr.bf16.mxu1 %v3891_v0 }
 0x962   : > { %2189 = vmatpush1.bf16.msra.mxu0 %v3888_v63  ;;  %2230 = vmatpush1.bf16.msra.mxu1 %v3899_v3 }
 0x963   : > { %2190 = vmatprep.subr.bf16.mxu0 %v3895_v2  ;;  %2231 = vmatprep.subr.bf16.mxu1 %v3907_v5 }
 0x966   : > { %2191 = vmatpush1.bf16.msra.mxu0 %v3904_v4  ;;  %2232 = vmatpush1.bf16.msra.mxu1 %v3915_v7 }
 0x967   : > { %2192 = vmatprep.subr.bf16.mxu0 %v3911_v6  ;;  %2233 = vmatprep.subr.bf16.mxu1 %v3923_v9 }
 0x96a   : > { %2193 = vmatpush1.bf16.msra.mxu0 %v3920_v8  ;;  %2234 = vmatpush1.bf16.msra.mxu1 %v3928_v10 }
 0x96d   : > { %2211 = vmatmul.mubr.bf16.vlgmr.msra.gmra.mrb[24].mxu0 %v2177_v15  ;;  %2252 = vmatmul.mubr.bf16.vlgmr.msra.gmra.mrb[24].mxu1 %v2177_v15 }
 0xa40   : > { %v2212_v18 = vpop.f32.mrb[24].mxu0  ;;  %v2253_v20 = vpop.f32.mrb[24].mxu1 }
 0xa41   : > { %v2260_v21 = vadd.f32 %v2212_v18, %v2173_v16  ;;  %v2214_v22 = vpop.f32.mrb[25].mxu0  ;;  %v2255_v23 = vpop.f32.mrb[25].mxu1  ;;  %v2262_v29 = vadd.f32 %v2253_v20, %v2175_v19 }
 0xa42   : > { %v2261_v24 = vadd.f32 %v2214_v22, %v2174_v17  ;;  %v2216_v25 = vpop.f32.mrb[26].mxu0  ;;  %v2257_v26 = vpop.f32.mrb[26].mxu1  ;;  %v2263_v33 = vadd.f32 %v2255_v23, %v2176_v32 }
 0xa43   : > { %v2264_v27 = vmul.f32 0.5, %v2260_v21  ;;  %v2217_v28 = vpop.f32.mrb[27].mxu0  ;;  %v2258_v30 = vpop.f32.mrb[27].mxu1 }
 0xa44   : > { %v2268_v31 = vmul.f32 0.5, %v2261_v24  ;;  %v2273_v34 = vmul.f32 0.5, %v2263_v33 }
 0xa45   : > { %3174 = vtanh.f32 %v2264_v27 }
 0xa46   : > { %3176 = vtanh.f32 %v2268_v31 }
 0xa47   : > { %3178 = vtanh.f32 %v2262_v29 }
 0xa48   : > { %3180 = vtanh.f32 %v2273_v34 }
 0xa4f   : > { %v3175_v35 = vpop.eup %3174 }
 0xa50   : > { %v3177_v36 = vpop.eup %3176  ;;  %v2266_v37 = vmul.f32 0.5, %v3175_v35 }
 0xa51   : > { %v3179_v42 = vpop.eup %3178  ;;  %v2270_v43 = vmul.f32 0.5, %v3177_v36 }
 0xa52   : > { %v2267_v44 = vadd.f32 0.5, %v2266_v37  ;;  %v3181_v15 = vpop.eup %3180 }
 0xa53   : > { %v2271_v11 = vadd.f32 0.5, %v2270_v43  ;;  %v2275_v16 = vmul.f32 0.5, %v3181_v15 }
 0xa54   : > { %v2278_v12 = vmul.f32 %v3179_v42, %v2267_v44 }
 0xa55   : > { %v2277_v13 = vmul.f32 %v2271_v11, %v2169_v49  ;;  %v2276_v17 = vadd.f32 0.5, %v2275_v16 }
 0xa57   : > { %v2279_v14 = vadd.f32 %v2278_v12, %v2277_v13 }
 0xa59   : > { %3182 = vtanh.f32 %v2279_v14  ;;  %2282 = vst [vmem:[#allocation5] sm:$0xff] %v2279_v14 }
 0xa60   : > { %2286 = sbr.rel (%p2771_p9) target bundleno = 2663 (0xa67), region = 96 }
 0xa63   : > { %v3183_v18 = vpop.eup %3182 }
 0xa64   : > { %v2281_v19 = vmul.f32 %v3183_v18, %v2276_v17 }
 0xa66   : > { %2283 = vst [vmem:[#allocation4] sm:$0xff] %v2281_v19  ;;  %2288 = vst [vmem:[#allocation3 + $0x30] sm:$0xff] (!%p2771_p9), %v2281_v19 }
 0xa67 PF: > { %2299 = vmatprep.subr.bf16.mxu0 %v3804_v38  ;;  %2340 = vmatprep.subr.bf16.mxu1 %v3817_v50 }
 0xa68   : > { %2300 = vmatpush1.bf16.msra.mxu0 %v3807_v39  ;;  %2341 = vmatpush1.bf16.msra.mxu1 %v3823_v52 }
 0xa69   : > { %2301 = vmatprep.subr.bf16.mxu0 %v3813_v41  ;;  %2342 = vmatprep.subr.bf16.mxu1 %v3831_v45  ;;  %v2295_v41 = vld [vmem:[#allocation2 + $0xe8] sm:$0xff] }
 0xa6a   : > { %2331 = vmatprep.mubr.bf16.mxu0 %v3372_v40  ;;  %2372 = vmatprep.mubr.bf16.mxu1 %v3372_v40  ;;  %v2294_v40 = vld [vmem:[#allocation2 + $0xe0] sm:$0xff] }
 0xa6c   : > { %2302 = vmatpush1.bf16.msra.mxu0 %v3820_v51  ;;  %2343 = vmatpush1.bf16.msra.mxu1 %v3835_v46  ;;  %v2296_v51 = vld [vmem:[#allocation2 + $0xf0] sm:$0xff] }
 0xa6d   : > { %2303 = vmatprep.subr.bf16.mxu0 %v3827_v53  ;;  %2344 = vmatprep.subr.bf16.mxu1 %v3847_v48  ;;  %v2289_v38 = vld [vmem:[#allocation4] sm:$0xff] }
 0xa6e   : > { %v2298_v39 = vpack.c.bf16 %v2289_v38, %v2289_v38 }
 0xa70   : > { %2304 = vmatpush1.bf16.msra.mxu0 %v3840_v47  ;;  %2345 = vmatpush1.bf16.msra.mxu1 %v3851_v54 }
 0xa71   : > { %2305 = vmatprep.subr.bf16.mxu0 %v3844_v1  ;;  %2346 = vmatprep.subr.bf16.mxu1 %v3859_v56 }
 0xa74   : > { %2306 = vmatpush1.bf16.msra.mxu0 %v3856_v55  ;;  %2347 = vmatpush1.bf16.msra.mxu1 %v3870_v59  ;;  %v2297_v59 = vld [vmem:[#allocation2 + $0xf8] sm:$0xff] }
 0xa75   : > { %2307 = vmatprep.subr.bf16.mxu0 %v3863_v57  ;;  %2348 = vmatprep.subr.bf16.mxu1 %v3875_v60 }
 0xa78   : > { %2308 = vmatpush1.bf16.msra.mxu0 %v3867_v58  ;;  %2349 = vmatpush1.bf16.msra.mxu1 %v3883_v62 }
 0xa79   : > { %2309 = vmatprep.subr.bf16.mxu0 %v3879_v61  ;;  %2350 = vmatprep.subr.bf16.mxu1 %v3891_v0 }
 0xa7c   : > { %2310 = vmatpush1.bf16.msra.mxu0 %v3888_v63  ;;  %2351 = vmatpush1.bf16.msra.mxu1 %v3899_v3 }
 0xa7d   : > { %2311 = vmatprep.subr.bf16.mxu0 %v3895_v2  ;;  %2352 = vmatprep.subr.bf16.mxu1 %v3907_v5  ;;  %v2290_v5 = vld [vmem:[#allocation5] sm:$0xff] }
 0xa80   : > { %2312 = vmatpush1.bf16.msra.mxu0 %v3904_v4  ;;  %2353 = vmatpush1.bf16.msra.mxu1 %v3915_v7 }
 0xa81   : > { %2313 = vmatprep.subr.bf16.mxu0 %v3911_v6  ;;  %2354 = vmatprep.subr.bf16.mxu1 %v3923_v9 }
 0xa84   : > { %2314 = vmatpush1.bf16.msra.mxu0 %v3920_v8  ;;  %2355 = vmatpush1.bf16.msra.mxu1 %v3928_v10 }
 0xa87   : > { %2332 = vmatmul.mubr.bf16.vlgmr.msra.gmra.mrb[28].mxu0 %v2298_v39  ;;  %2373 = vmatmul.mubr.bf16.vlgmr.msra.gmra.mrb[28].mxu1 %v2298_v39 }
 0xb5a   : > { %v2333_v50 = vpop.f32.mrb[28].mxu0  ;;  %v2374_v52 = vpop.f32.mrb[28].mxu1 }
 0xb5b   : > { %v2381_v53 = vadd.f32 %v2333_v50, %v2294_v40  ;;  %v2335_v45 = vpop.f32.mrb[29].mxu0  ;;  %v2376_v46 = vpop.f32.mrb[29].mxu1  ;;  %v2383_v56 = vadd.f32 %v2374_v52, %v2296_v51 }
 0xb5c   : > { %v2382_v47 = vadd.f32 %v2335_v45, %v2295_v41  ;;  %v2337_v1 = vpop.f32.mrb[30].mxu0  ;;  %v2378_v48 = vpop.f32.mrb[30].mxu1  ;;  %v2384_v60 = vadd.f32 %v2376_v46, %v2297_v59 }
 0xb5d   : > { %v2385_v54 = vmul.f32 0.5, %v2381_v53  ;;  %v2338_v55 = vpop.f32.mrb[31].mxu0  ;;  %v2379_v57 = vpop.f32.mrb[31].mxu1 }
 0xb5e   : > { %v2389_v58 = vmul.f32 0.5, %v2382_v47  ;;  %v2394_v61 = vmul.f32 0.5, %v2384_v60 }
 0xb5f   : > { %3184 = vtanh.f32 %v2385_v54 }
 0xb60   : > { %3186 = vtanh.f32 %v2389_v58 }
 0xb61   : > { %3188 = vtanh.f32 %v2383_v56 }
 0xb62   : > { %3190 = vtanh.f32 %v2394_v61 }
 0xb69   : > { %v3185_v62 = vpop.eup %3184 }
 0xb6a   : > { %v3187_v63 = vpop.eup %3186  ;;  %v2387_v0 = vmul.f32 0.5, %v3185_v62 }
 0xb6b   : > { %v3189_v2 = vpop.eup %3188  ;;  %v2391_v3 = vmul.f32 0.5, %v3187_v63 }
 0xb6c   : > { %v2388_v4 = vadd.f32 0.5, %v2387_v0  ;;  %v3191_v10 = vpop.eup %3190 }
 0xb6d   : > { %v2392_v6 = vadd.f32 0.5, %v2391_v3  ;;  %v2396_v20 = vmul.f32 0.5, %v3191_v10 }
 0xb6e   : > { %v2399_v7 = vmul.f32 %v3189_v2, %v2388_v4 }
 0xb6f   : > { %v2398_v8 = vmul.f32 %v2392_v6, %v2290_v5  ;;  %v2397_v21 = vadd.f32 0.5, %v2396_v20 }
 0xb71   : > { %v2400_v9 = vadd.f32 %v2399_v7, %v2398_v8 }
 0xb73   : > { %3192 = vtanh.f32 %v2400_v9  ;;  %2403 = vst [vmem:[#allocation5] sm:$0xff] %v2400_v9 }
 0xb7a   : > { %2407 = sbr.rel (%p2771_p9) target bundleno = 2945 (0xb81), region = 100 }
 0xb7d   : > { %v3193_v22 = vpop.eup %3192 }
 0xb7e   : > { %v2402_v23 = vmul.f32 %v3193_v22, %v2397_v21 }
 0xb80   : > { %2404 = vst [vmem:[#allocation4] sm:$0xff] %v2402_v23  ;;  %2409 = vst [vmem:[#allocation3 + $0x38] sm:$0xff] (!%p2771_p9), %v2402_v23 }
 0xb81 PF: > { %p2779_p2 = scmp.ne.s32.totalorder %s3355_s8, 1 }
 0xb82   : > { %v2415_v24 = vld [vmem:[%s4268_s5] sm:$0xff] (!%p2779_p2)  ;;  %v2416_v25 = vld [vmem:[%s4268_s5 + $0x8] sm:$0xff] (!%p2779_p2)  ;;  %v2417_v26 = vld [vmem:[%s4268_s5 + $0x10] sm:$0xff] (!%p2779_p2)  ;;  %v3374_v27 = vmov (!%p2779_p2), 0.0|0.0   ;;  %vm3375_vm0 = vmmov (!%p2779_p2), 0   ;;  %v3376_v30 = vmov (!%p2779_p2), 0.0  }
 0xb83   : > { %2413 = sbr.rel (%p2779_p2) target bundleno = 3212 (0xc8c), region = 104  ;;  %2838 = vmatprep.subr.bf16.mxu0 (!%p2779_p2), %v3374_v27  ;;  %v2839_v28 = vpack.c.bf16 (!%p2779_p2), %v2416_v25, %v2415_v24  ;;  %v2418_v29 = vld [vmem:[%s4268_s5 + $0x18] sm:$0xff] (!%p2779_p2)  ;;  %2835 = vmatprep.mubr.msk.f32.mxu0 (!%p2779_p2), %vm3375_vm0, %v3376_v30  ;;  %v2419_v32 = vld [vmem:[%s4268_s5 + $0x20] sm:$0xff] (!%p2779_p2)  ;;  %v2420_v33 = vld [vmem:[%s4268_s5 + $0x28] sm:$0xff] (!%p2779_p2)  ;;  %vm2512_vm1 = vcmask (!%p2779_p2), 7168  }
 0xb84   : > { %v2842_v31 = vpack.c.bf16 (!%p2779_p2), %v2418_v29, %v2417_v26  ;;  %v2845_v34 = vpack.c.bf16 (!%p2779_p2), %v2420_v33, %v2419_v32  ;;  %v2421_v35 = vld [vmem:[%s4268_s5 + $0x30] sm:$0xff] (!%p2779_p2)  ;;  %v2422_v36 = vld [vmem:[%s4268_s5 + $0x38] sm:$0xff] (!%p2779_p2)  ;;  %v2423_v42 = vld [vmem:[%s4268_s5 + $0x40] sm:$0xff] (!%p2779_p2) }
 0xb85   : > { %2840 = vmatpush3.bf16.msra.mxu0 (!%p2779_p2), %v2839_v28  ;;  %v2848_v37 = vpack.c.bf16 (!%p2779_p2), %v2422_v36, %v2421_v35  ;;  %v2424_v43 = vld [vmem:[%s4268_s5 + $0x48] sm:$0xff] (!%p2779_p2)  ;;  %v2425_v49 = vld [vmem:[%s4268_s5 + $0x50] sm:$0xff] (!%p2779_p2)  ;;  %v2426_v11 = vld [vmem:[%s4268_s5 + $0x58] sm:$0xff] (!%p2779_p2) }
 0xb86   : > { %2841 = vmatprep.subr.bf16.mxu0 (!%p2779_p2), %v3374_v27  ;;  %v2851_v44 = vpack.c.bf16 (!%p2779_p2), %v2424_v43, %v2423_v42  ;;  %v2854_v12 = vpack.c.bf16 (!%p2779_p2), %v2426_v11, %v2425_v49  ;;  %v2427_v13 = vld [vmem:[%s4268_s5 + $0x60] sm:$0xff] (!%p2779_p2)  ;;  %v2428_v14 = vld [vmem:[%s4268_s5 + $0x68] sm:$0xff] (!%p2779_p2)  ;;  %v2429_v16 = vld [vmem:[%s4268_s5 + $0x70] sm:$0xff] (!%p2779_p2) }
 0xb87   : > { %v2857_v15 = vpack.c.bf16 (!%p2779_p2), %v2428_v14, %v2427_v13  ;;  %v2430_v17 = vld [vmem:[%s4268_s5 + $0x78] sm:$0xff] (!%p2779_p2)  ;;  %v2414_v19 = vld [vmem:[#allocation4] sm:$0xff] (!%p2779_p2)  ;;  %v2780_v38 = vld [vmem:[#allocation6] ss:$0 sm:$0xff] (!%p2779_p2) }
 0xb88   : > { %v2860_v18 = vpack.c.bf16 (!%p2779_p2), %v2430_v17, %v2429_v16 }
 0xb89   : > { %2843 = vmatpush3.bf16.msra.mxu0 (!%p2779_p2), %v2842_v31 }
 0xb8a   : > { %2844 = vmatprep.subr.bf16.mxu0 %v3374_v27 }
 0xb8d   : > { %2846 = vmatpush3.bf16.msra.mxu0 %v2845_v34 }
 0xb8e   : > { %2847 = vmatprep.subr.bf16.mxu0 %v3374_v27 }
 0xb91   : > { %2849 = vmatpush3.bf16.msra.mxu0 %v2848_v37 }
 0xb92   : > { %2850 = vmatprep.subr.bf16.mxu0 %v3374_v27 }
 0xb95   : > { %2852 = vmatpush3.bf16.msra.mxu0 %v2851_v44 }
 0xb96   : > { %2853 = vmatprep.subr.bf16.mxu0 %v3374_v27 }
 0xb99   : > { %2855 = vmatpush3.bf16.msra.mxu0 %v2854_v12 }
 0xb9a   : > { %2856 = vmatprep.subr.bf16.mxu0 %v3374_v27 }
 0xb9d   : > { %2858 = vmatpush3.bf16.msra.mxu0 %v2857_v15 }
 0xb9e   : > { %2859 = vmatprep.subr.bf16.mxu0 %v3374_v27 }
 0xba1   : > { %2861 = vmatpush3.bf16.msra.mxu0 %v2860_v18 }
 0xba4   : > { %2836 = vmatmul.mubr.f32.vlgmr.msra.gmra.mrb[0].mxu0 %v2414_v19 }
 0xc77   : > { %v2504_v39 = vpop.f32.mrb[0].mxu0 }
 0xc78   : > { %v2505_v40 = vadd.f32 %v2780_v38, %v2504_v39  ;;  %v2837_v41 = vpop.f32.mrb[1].mxu0 }
 0xc7a   : > { %v2508_v50 = vmul.f32 0.5, %v2505_v40 }
 0xc7c   : > { %3194 = vtanh.f32 %v2508_v50 }
 0xc86   : > { %v3195_v51 = vpop.eup %3194 }
 0xc87   : > { %v2510_v52 = vmul.f32 0.5, %v3195_v51 }
 0xc89   : > { %v2511_v53 = vadd.f32 0.5, %v2510_v52 }
 0xc8b   : > { %2513 = vst.msk [vmem:[%s4270_s7] sm:$0xff] %vm2512_vm1, %v2511_v53 }
 0xc8c PF: > { %s23_s10 = sadd.s32 1, %s3363_s10   ;;  %s4306_s26 = smov %s3339_s27 }
 0xc8d   : > { %p20_p4 = scmp.ge.s32.totalorder %s23_s10, 4   ;;  %s4307_s27 = smov %s3343_s28 }
 0xc8e   : > { %s4308_s28 = smov %s3553_s11  ;;  %s4309_s29 = smov %s3351_s30 }
 0xc8f   : > { %s4253_s30 = smov 0   ;;  %s4310_s8 = smov %s3359_s9 }
 0xc90   : > { %s4311_s9 = smov %s4313_s6  ;;  %22 = sbr.rel (!%p20_p4) target bundleno = 9 (0x9), region = 169 }
 0xc97   :  { %2533 = vsyncpa [#allocation8], 1 }
 0xc98   :  { %2535 = vsyncpa [#allocation8 + $0x1], 1 }
 0xc99   :  { %2536 = vsyncpa [#allocation10], 1 }
 0xc9a   :  { %2538 = vsyncpa [#allocation10 + $0x1], 1 }

</bundles_post_ra>
